<compile_context>
chip_gen: v6e
topology: v6e:2x2x1
jax: 0.10.0
libtpu: 0.0.40
codegen_flags: <defaults>
</compile_context>

<pallas_src>
import functools

import jax
import jax.numpy as jnp
from jax.experimental import pallas as pl
from jax.experimental.pallas import tpu as pltpu

NEG_SLOPE = 0.01          # F.leaky_relu default
GP = 128                  # per-gate lane stride (each GRU gate gets a full 128-lane tile)


def _leaky_relu(x):
    return jnp.where(x > 0, x, NEG_SLOPE * x)


def _gru_cell(gi, h, whh_b, bhn_b, H2):
    """One PyTorch GRU cell step (gate order r,z,n).

    gi already contains W_ih x + b_ih + [b_hr | b_hz | 0] (lane-padded per gate).
    whh_b is bf16, gates lane-padded to GP; bhn_b is b_hn broadcast to (B, H2).
    """
    gh = jnp.dot(h.astype(jnp.bfloat16), whh_b,
                 preferred_element_type=jnp.float32)                    # (B, 3*GP)
    # Slices below all start at 128-lane tile boundaries -> no lane rotates.
    r = jax.nn.sigmoid(gi[:, 0:H2] + gh[:, 0:H2])
    z = jax.nn.sigmoid(gi[:, GP:GP + H2] + gh[:, GP:GP + H2])
    n = jnp.tanh(gi[:, 2 * GP:2 * GP + H2]
                 + r * (gh[:, 2 * GP:2 * GP + H2] + bhn_b))
    return (1.0 - z) * n + z * h


# ----------------------------------------------------------------------------
# Fused kernel (one grid step = one independent group of B samples):
#   xt    : (T*B, D)      time-major slab (row index = t*B + b)
#   w0/1/2: (D, H1) bf16  conv1d taps (k = 0,1,2); bconv: (1, H1) f32
#   wfc   : (H1, H2) bf16; bfc: (1, H2) f32
#   wih   : (L, H2, 3*GP) bf16   gate order [r|z|n], each gate lane-padded to GP
#   whh   : (L, H2, 3*GP) bf16
#   bih   : (L, 1, 3*GP) f32     b_ih + [b_hr | b_hz | 0]   (lane-padded)
#   bhn   : (L, 1, H2)  f32      b_hn
#   watt  : (H2, H2) bf16; batt: (1, H2) f32
#   wlast, wattv : (1, H2) f32   fc_out weight row split [last_hidden | att_pool]
#   bout  : (1, 1) f32
#   out   : (B, 1) f32
# ----------------------------------------------------------------------------
def alstm_kernel(xt_ref, w0_ref, w1_ref, w2_ref, bconv_ref,
                 wfc_ref, bfc_ref,
                 wih_ref, whh_ref, bih_ref, bhn_ref,
                 watt_ref, batt_ref, wlast_ref, wattv_ref, bout_ref,
                 out_ref, *, B, T, H2, L):
    TB = T * B

    # ---- Conv1d(k=3, padding=1) as three B-row-shifted tap matmuls
    #      (im2col folded into the kernel) + LeakyReLU + fc_in + LeakyReLU.
    x = xt_ref[...]                                                     # (T*B, D) f32
    zrow = jnp.zeros((B, x.shape[1]), x.dtype)
    x_prev = jnp.concatenate([zrow, x[:TB - B]], axis=0).astype(jnp.bfloat16)  # x_{t-1}
    x_cur = x.astype(jnp.bfloat16)                                             # x_{t}
    x_next = jnp.concatenate([x[B:], zrow], axis=0).astype(jnp.bfloat16)       # x_{t+1}
    y = (jnp.dot(x_prev, w0_ref[...], preferred_element_type=jnp.float32)
         + jnp.dot(x_cur, w1_ref[...], preferred_element_type=jnp.float32)
         + jnp.dot(x_next, w2_ref[...], preferred_element_type=jnp.float32)
         + bconv_ref[...])
    y = _leaky_relu(y)                                                  # (T*B, H1)
    feat = _leaky_relu(
        jnp.dot(y.astype(jnp.bfloat16), wfc_ref[...],
                preferred_element_type=jnp.float32) + bfc_ref[...])     # (T*B, H2)

    # ---- 3-layer GRU, step-major so layer l+1 step t only waits on layer l step t
    #      (critical path ~ T + L - 1 cells). Layer 0 input projection hoisted.
    # TODO(synk): inter-layer GRU dropout (p=0.9) skipped — eval-mode semantics.
    gi0_all = (jnp.dot(feat.astype(jnp.bfloat16), wih_ref[0],
                       preferred_element_type=jnp.float32)
               + bih_ref[0])                                            # (T*B, 3*GP)

    # Hoist bias broadcasts out of the unrolled loops (no CSE of broadcast_in_dim).
    bih_b = [jnp.broadcast_to(bih_ref[l], (B, 3 * GP)) for l in range(1, L)]
    bhn_b = [jnp.broadcast_to(bhn_ref[l], (B, H2)) for l in range(L)]

    h = [jnp.zeros((B, H2), jnp.float32) for _ in range(L)]
    outs = []
    for t in range(T):                                                  # statically unrolled
        gi = gi0_all[t * B:(t + 1) * B, :]                              # sublane-aligned slice
        h[0] = _gru_cell(gi, h[0], whh_ref[0], bhn_b[0], H2)
        for l in range(1, L):
            gi = (jnp.dot(h[l - 1].astype(jnp.bfloat16), wih_ref[l],
                          preferred_element_type=jnp.float32) + bih_b[l - 1])
            h[l] = _gru_cell(gi, h[l], whh_ref[l], bhn_b[l], H2)
        outs.append(h[L - 1])

    # ---- Attention: softmax over time (per batch, hidden unit) of att_fc(rnn_out),
    #      multiplied by rnn_out, then AdaptiveAvgPool1d(1) over time.
    seq = jnp.concatenate(outs, axis=0)                                 # (T*B, H2) time-major
    att = (jnp.dot(seq.astype(jnp.bfloat16), watt_ref[...],
                   preferred_element_type=jnp.float32) + batt_ref[...])  # (T*B, H2)
    att3 = att.reshape(T, B, H2)
    seq3 = seq.reshape(T, B, H2)
    m = jnp.max(att3, axis=0)                                           # (B, H2)
    e3 = jnp.exp(att3 - m[None, :, :])                                  # one-shot exp
    denom = jnp.sum(e3, axis=0)                                         # (B, H2)
    inv = pl.reciprocal(denom, approx=True)  # EUP slot; tiny deviation from exact softmax
    out_att = jnp.sum(e3 * seq3, axis=0) * inv * (1.0 / T)              # (B, H2)

    # ---- fc_out on cat([rnn_out[:, -1, :], out_att]) as VPU mul + lane reduce.
    last = outs[T - 1]                                                  # (B, H2)
    out = (jnp.sum(last * wlast_ref[...] + out_att * wattv_ref[...],
                   axis=1, keepdims=True) + bout_ref[...])              # (B, 1)
    out_ref[...] = out


def alstm_forward(x_flat, kparams, *, B, D, T, H2, L, groups):
    """x_flat: (groups*B, D*T) — PyTorch forward does inputs.view(N, d_feat, -1)."""
    (w0, w1, w2, bconv, wfc, bfc, wih, whh, bih, bhn,
     watt, batt, wlast, wattv, bout) = kparams
    G = groups
    # Single cheap host-side relayout: (G,B,D,T) -> time-major (G, T*B, D).
    xt = x_flat.reshape(G, B, D, T).transpose(0, 3, 1, 2).reshape(G, T * B, D)

    kernel = functools.partial(alstm_kernel, B=B, T=T, H2=H2, L=L)

    def full(shape):   # weight blocks: full array, constant index_map -> stays VMEM-resident
        return pl.BlockSpec(shape, lambda g, _n=len(shape): (0,) * _n)

    out = pl.pallas_call(
        kernel,
        out_shape=jax.ShapeDtypeStruct((G, B, 1), jnp.float32),
        grid=(G,),
        in_specs=[
            pl.BlockSpec((None, T * B, D), lambda g: (g, 0, 0)),
            full(w0.shape), full(w1.shape), full(w2.shape), full(bconv.shape),
            full(wfc.shape), full(bfc.shape),
            full(wih.shape), full(whh.shape), full(bih.shape), full(bhn.shape),
            full(watt.shape), full(batt.shape),
            full(wlast.shape), full(wattv.shape), full(bout.shape),
        ],
        out_specs=pl.BlockSpec((None, B, 1), lambda g: (g, 0, 0)),
        compiler_params=pltpu.CompilerParams(
            dimension_semantics=("parallel",)),        # v7x: split groups across both TCs
    )(xt, w0, w1, w2, bconv, wfc, bfc, wih, whh, bih, bhn,
      watt, batt, wlast, wattv, bout)
    return out.reshape(G * B, 1)


# ----------------------------------------------------------------------------
if __name__ == "__main__":
    # Small shapes consistent with the module's forward (scaled-down defaults).
    B, D, T = 8, 16, 8            # per-group batch, d_feat, sequence length
    H1, H2, L = 32, 32, 3         # hidden_size1, hidden_size2, num_layers
    G = 2                         # independent sample groups (grid axis)

    key = jax.random.PRNGKey(0)
    ks = iter(jax.random.split(key, 32))

    def xavier(k, shape):         # PyTorch xavier_uniform_ on (out, in) weights
        fan_out, fan_in = shape
        lim = (6.0 / (fan_in + fan_out)) ** 0.5
        return jax.random.uniform(k, shape, jnp.float32, -lim, lim)

    # conv1: PyTorch Conv1d(D, H1, k=3, padding=1): weight (H1, D, 3), bias (H1,)
    conv_w = jax.random.normal(next(ks), (H1, D, 3), jnp.float32) * (1.0 / (3 * D)) ** 0.5
    cb = (1.0 / (3 * D)) ** 0.5
    conv_b = jax.random.uniform(next(ks), (H1,), jnp.float32, -cb, cb)

    # fc_in / att_fc / fc_out: xavier weights, zero biases (init_weights)
    fcin_w = xavier(next(ks), (H2, H1))
    attfc_w = xavier(next(ks), (H2, H2))
    out_w = xavier(next(ks), (1, 2 * H2))

    # GRU: L layers, weight_ih/hh (3H2, H2) gate order [r, z, n]; biases zeroed
    gru_wih = [jnp.transpose(xavier(next(ks), (3 * H2, H2))) for _ in range(L)]   # (H2, 3H2)
    gru_whh = [jnp.transpose(xavier(next(ks), (3 * H2, H2))) for _ in range(L)]
    gru_bih = [jnp.zeros((3 * H2,), jnp.float32) for _ in range(L)]
    gru_bhh = [jnp.zeros((3 * H2,), jnp.float32) for _ in range(L)]

    # ---- pack into kernel layout (bf16 matmul weights, lane-padded gates) ----
    bf16 = jnp.bfloat16

    def pad_gates(w):             # (H2, 3*H2) -> (H2, 3*GP): one 128-lane tile per gate
        out = jnp.zeros((w.shape[0], 3 * GP), w.dtype)
        for g in range(3):
            out = out.at[:, g * GP:g * GP + H2].set(w[:, g * H2:(g + 1) * H2])
        return out

    def pad_gate_bias(b):         # (3*H2,) -> (1, 3*GP)
        out = jnp.zeros((3 * GP,), b.dtype)
        for g in range(3):
            out = out.at[g * GP:g * GP + H2].set(b[g * H2:(g + 1) * H2])
        return out.reshape(1, 3 * GP)

    w0 = jnp.transpose(conv_w[:, :, 0]).astype(bf16)     # (D, H1) tap t-1
    w1 = jnp.transpose(conv_w[:, :, 1]).astype(bf16)     # tap t
    w2 = jnp.transpose(conv_w[:, :, 2]).astype(bf16)     # tap t+1
    bconv = conv_b.reshape(1, H1)
    wfc = jnp.transpose(fcin_w).astype(bf16)             # (H1, H2)
    bfc = jnp.zeros((1, H2), jnp.float32)

    wih_l, whh_l, bih_l, bhn_l = [], [], [], []
    for l in range(L):
        wih_l.append(pad_gates(gru_wih[l]).astype(bf16))
        whh_l.append(pad_gates(gru_whh[l]).astype(bf16))
        # fold b_hr, b_hz into the input-side bias; b_hn stays inside r*(.)
        comb = gru_bih[l] + jnp.concatenate(
            [gru_bhh[l][:2 * H2], jnp.zeros((H2,), jnp.float32)])
        bih_l.append(pad_gate_bias(comb))
        bhn_l.append(gru_bhh[l][2 * H2:].reshape(1, H2))
    wih = jnp.stack(wih_l)                                # (L, H2, 3*GP) bf16
    whh = jnp.stack(whh_l)
    bih = jnp.stack(bih_l)                                # (L, 1, 3*GP) f32
    bhn = jnp.stack(bhn_l)                                # (L, 1, H2) f32

    watt = jnp.transpose(attfc_w).astype(bf16)            # (H2, H2)
    batt = jnp.zeros((1, H2), jnp.float32)
    wlast = out_w[:, :H2]                                 # (1, H2) fc_out: last-hidden half
    wattv = out_w[:, H2:]                                 # (1, H2) fc_out: att-pool half
    bout = jnp.zeros((1, 1), jnp.float32)

    kparams = (w0, w1, w2, bconv, wfc, bfc, wih, whh, bih, bhn,
               watt, batt, wlast, wattv, bout)

    # forward does inputs.view(N, d_feat, -1), so feed a flat (G*B, D*T)
    x = jax.random.normal(next(ks), (G * B, D * T), jnp.float32)

    fwd = jax.jit(functools.partial(alstm_forward, B=B, D=D, T=T, H2=H2, L=L, groups=G))
    out = jax.block_until_ready(fwd(x, kparams))
    assert out.shape == (G * B, 1)
    assert bool(jnp.all(jnp.isfinite(out)))
    print("KERNEL_OK")
</pallas_src>

<mosaic_0001>
module attributes {stable_mosaic.version = 11 : i64} {
  func.func @alstm_kernel(%arg0: i32, %arg1: memref<1x64x16xf32, #tpu.memory_space<vmem>>, %arg2: memref<16x32xbf16, #tpu.memory_space<vmem>>, %arg3: memref<16x32xbf16, #tpu.memory_space<vmem>>, %arg4: memref<16x32xbf16, #tpu.memory_space<vmem>>, %arg5: memref<1x32xf32, #tpu.memory_space<vmem>>, %arg6: memref<32x32xbf16, #tpu.memory_space<vmem>>, %arg7: memref<1x32xf32, #tpu.memory_space<vmem>>, %arg8: memref<3x32x384xbf16, #tpu.memory_space<vmem>>, %arg9: memref<3x32x384xbf16, #tpu.memory_space<vmem>>, %arg10: memref<3x1x384xf32, #tpu.memory_space<vmem>>, %arg11: memref<3x1x32xf32, #tpu.memory_space<vmem>>, %arg12: memref<32x32xbf16, #tpu.memory_space<vmem>>, %arg13: memref<1x32xf32, #tpu.memory_space<vmem>>, %arg14: memref<1x32xf32, #tpu.memory_space<vmem>>, %arg15: memref<1x32xf32, #tpu.memory_space<vmem>>, %arg16: memref<1x1xf32, #tpu.memory_space<vmem>>, %arg17: memref<1x8x1xf32, #tpu.memory_space<vmem>>) attributes {dimension_semantics = [#tpu.dimension_semantics<parallel>], iteration_bounds = array<i64: 2>, scalar_prefetch = 0 : i64, scratch_operands = 0 : i64, tpu.core_type = #tpu.core_type<tc>, window_params = [{transform_indices = @transform_0, window_bounds = array<i64: 1, 64, 16>}, {pipeline_mode = #tpu.pipeline_mode<synchronous>, transform_indices = @transform_1, window_bounds = array<i64: 16, 32>}, {pipeline_mode = #tpu.pipeline_mode<synchronous>, transform_indices = @transform_2, window_bounds = array<i64: 16, 32>}, {pipeline_mode = #tpu.pipeline_mode<synchronous>, transform_indices = @transform_3, window_bounds = array<i64: 16, 32>}, {pipeline_mode = #tpu.pipeline_mode<synchronous>, transform_indices = @transform_4, window_bounds = array<i64: 1, 32>}, {pipeline_mode = #tpu.pipeline_mode<synchronous>, transform_indices = @transform_5, window_bounds = array<i64: 32, 32>}, {pipeline_mode = #tpu.pipeline_mode<synchronous>, transform_indices = @transform_6, window_bounds = array<i64: 1, 32>}, {pipeline_mode = #tpu.pipeline_mode<synchronous>, transform_indices = @transform_7, window_bounds = array<i64: 3, 32, 384>}, {pipeline_mode = #tpu.pipeline_mode<synchronous>, transform_indices = @transform_8, window_bounds = array<i64: 3, 32, 384>}, {pipeline_mode = #tpu.pipeline_mode<synchronous>, transform_indices = @transform_9, window_bounds = array<i64: 3, 1, 384>}, {pipeline_mode = #tpu.pipeline_mode<synchronous>, transform_indices = @transform_10, window_bounds = array<i64: 3, 1, 32>}, {pipeline_mode = #tpu.pipeline_mode<synchronous>, transform_indices = @transform_11, window_bounds = array<i64: 32, 32>}, {pipeline_mode = #tpu.pipeline_mode<synchronous>, transform_indices = @transform_12, window_bounds = array<i64: 1, 32>}, {pipeline_mode = #tpu.pipeline_mode<synchronous>, transform_indices = @transform_13, window_bounds = array<i64: 1, 32>}, {pipeline_mode = #tpu.pipeline_mode<synchronous>, transform_indices = @transform_14, window_bounds = array<i64: 1, 32>}, {pipeline_mode = #tpu.pipeline_mode<synchronous>, transform_indices = @transform_15, window_bounds = array<i64: 1, 1>}, {transform_indices = @transform_16, window_bounds = array<i64: 1, 8, 1>}]} {
    %c0 = arith.constant 0 : index
    %c0_0 = arith.constant 0 : index
    %c0_1 = arith.constant 0 : index
    %0 = vector.load %arg1[%c0, %c0_0, %c0_1] : memref<1x64x16xf32, #tpu.memory_space<vmem>>, vector<1x64x16xf32>
    %1 = vector.shape_cast %0 : vector<1x64x16xf32> to vector<64x16xf32>
    %cst = arith.constant 0.000000e+00 : f32
    %2 = vector.broadcast %cst : f32 to vector<8x16xf32>
    %3 = vector.extract_strided_slice %1 {offsets = [0, 0], sizes = [56, 16], strides = [1, 1]} : vector<64x16xf32> to vector<56x16xf32>
    %4 = tpu.concatenate %2, %3 in 0 : vector<8x16xf32>, vector<56x16xf32> -> vector<64x16xf32>
    %5 = arith.truncf %4 : vector<64x16xf32> to vector<64x16xbf16>
    %6 = arith.truncf %1 : vector<64x16xf32> to vector<64x16xbf16>
    %7 = vector.extract_strided_slice %1 {offsets = [8, 0], sizes = [56, 16], strides = [1, 1]} : vector<64x16xf32> to vector<56x16xf32>
    %8 = tpu.concatenate %7, %2 in 0 : vector<56x16xf32>, vector<8x16xf32> -> vector<64x16xf32>
    %9 = arith.truncf %8 : vector<64x16xf32> to vector<64x16xbf16>
    %c0_2 = arith.constant 0 : index
    %c0_3 = arith.constant 0 : index
    %10 = vector.load %arg2[%c0_2, %c0_3] : memref<16x32xbf16, #tpu.memory_space<vmem>>, vector<16x32xbf16>
    %cst_4 = arith.constant dense<0.000000e+00> : vector<64x32xf32>
    %11 = tpu.matmul %5, %10, %cst_4 {dimension_numbers = #tpu.dot_dimension_numbers<[1], [0], [0], [1], [0, 0, 1, 1], [], []>} : vector<64x16xbf16>, vector<16x32xbf16>, vector<64x32xf32> -> vector<64x32xf32>
    %c0_5 = arith.constant 0 : index
    %c0_6 = arith.constant 0 : index
    %12 = vector.load %arg3[%c0_5, %c0_6] : memref<16x32xbf16, #tpu.memory_space<vmem>>, vector<16x32xbf16>
    %cst_7 = arith.constant dense<0.000000e+00> : vector<64x32xf32>
    %13 = tpu.matmul %6, %12, %cst_7 {dimension_numbers = #tpu.dot_dimension_numbers<[1], [0], [0], [1], [0, 0, 1, 1], [], []>} : vector<64x16xbf16>, vector<16x32xbf16>, vector<64x32xf32> -> vector<64x32xf32>
    %14 = arith.addf %11, %13 : vector<64x32xf32>
    %c0_8 = arith.constant 0 : index
    %c0_9 = arith.constant 0 : index
    %15 = vector.load %arg4[%c0_8, %c0_9] : memref<16x32xbf16, #tpu.memory_space<vmem>>, vector<16x32xbf16>
    %cst_10 = arith.constant dense<0.000000e+00> : vector<64x32xf32>
    %16 = tpu.matmul %9, %15, %cst_10 {dimension_numbers = #tpu.dot_dimension_numbers<[1], [0], [0], [1], [0, 0, 1, 1], [], []>} : vector<64x16xbf16>, vector<16x32xbf16>, vector<64x32xf32> -> vector<64x32xf32>
    %17 = arith.addf %14, %16 : vector<64x32xf32>
    %c0_11 = arith.constant 0 : index
    %c0_12 = arith.constant 0 : index
    %18 = vector.load %arg5[%c0_11, %c0_12] : memref<1x32xf32, #tpu.memory_space<vmem>>, vector<1x32xf32>
    %19 = vector.broadcast %18 : vector<1x32xf32> to vector<64x32xf32>
    %20 = arith.addf %17, %19 : vector<64x32xf32>
    %cst_13 = arith.constant 0.000000e+00 : f32
    %21 = vector.broadcast %cst_13 : f32 to vector<64x32xf32>
    %22 = arith.cmpf ogt, %20, %21 : vector<64x32xf32>
    %cst_14 = arith.constant 0.00999999977 : f32
    %23 = vector.broadcast %cst_14 : f32 to vector<64x32xf32>
    %24 = arith.mulf %23, %20 : vector<64x32xf32>
    %25 = arith.select %22, %20, %24 : vector<64x32xi1>, vector<64x32xf32>
    %26 = arith.truncf %25 : vector<64x32xf32> to vector<64x32xbf16>
    %c0_15 = arith.constant 0 : index
    %c0_16 = arith.constant 0 : index
    %27 = vector.load %arg6[%c0_15, %c0_16] : memref<32x32xbf16, #tpu.memory_space<vmem>>, vector<32x32xbf16>
    %cst_17 = arith.constant dense<0.000000e+00> : vector<64x32xf32>
    %28 = tpu.matmul %26, %27, %cst_17 {dimension_numbers = #tpu.dot_dimension_numbers<[1], [0], [0], [1], [0, 0, 1, 1], [], []>} : vector<64x32xbf16>, vector<32x32xbf16>, vector<64x32xf32> -> vector<64x32xf32>
    %c0_18 = arith.constant 0 : index
    %c0_19 = arith.constant 0 : index
    %29 = vector.load %arg7[%c0_18, %c0_19] : memref<1x32xf32, #tpu.memory_space<vmem>>, vector<1x32xf32>
    %30 = vector.broadcast %29 : vector<1x32xf32> to vector<64x32xf32>
    %31 = arith.addf %28, %30 : vector<64x32xf32>
    %cst_20 = arith.constant 0.000000e+00 : f32
    %32 = vector.broadcast %cst_20 : f32 to vector<64x32xf32>
    %33 = arith.cmpf ogt, %31, %32 : vector<64x32xf32>
    %cst_21 = arith.constant 0.00999999977 : f32
    %34 = vector.broadcast %cst_21 : f32 to vector<64x32xf32>
    %35 = arith.mulf %34, %31 : vector<64x32xf32>
    %36 = arith.select %33, %31, %35 : vector<64x32xi1>, vector<64x32xf32>
    %37 = arith.truncf %36 : vector<64x32xf32> to vector<64x32xbf16>
    %c0_22 = arith.constant 0 : index
    %c0_23 = arith.constant 0 : index
    %c0_24 = arith.constant 0 : index
    %38 = vector.load %arg8[%c0_22, %c0_23, %c0_24] : memref<3x32x384xbf16, #tpu.memory_space<vmem>>, vector<1x32x384xbf16>
    %39 = vector.shape_cast %38 : vector<1x32x384xbf16> to vector<32x384xbf16>
    %cst_25 = arith.constant dense<0.000000e+00> : vector<64x384xf32>
    %40 = tpu.matmul %37, %39, %cst_25 {dimension_numbers = #tpu.dot_dimension_numbers<[1], [0], [0], [1], [0, 0, 1, 1], [], []>} : vector<64x32xbf16>, vector<32x384xbf16>, vector<64x384xf32> -> vector<64x384xf32>
    %c0_26 = arith.constant 0 : index
    %c0_27 = arith.constant 0 : index
    %c0_28 = arith.constant 0 : index
    %41 = vector.load %arg10[%c0_26, %c0_27, %c0_28] : memref<3x1x384xf32, #tpu.memory_space<vmem>>, vector<1x1x384xf32>
    %42 = vector.shape_cast %41 : vector<1x1x384xf32> to vector<1x384xf32>
    %43 = vector.broadcast %42 : vector<1x384xf32> to vector<64x384xf32>
    %44 = arith.addf %40, %43 : vector<64x384xf32>
    %c1 = arith.constant 1 : index
    %c0_29 = arith.constant 0 : index
    %c0_30 = arith.constant 0 : index
    %45 = vector.load %arg10[%c1, %c0_29, %c0_30] : memref<3x1x384xf32, #tpu.memory_space<vmem>>, vector<1x1x384xf32>
    %46 = vector.shape_cast %45 : vector<1x1x384xf32> to vector<1x384xf32>
    %47 = vector.shape_cast %46 : vector<1x384xf32> to vector<1x384xf32>
    %48 = vector.broadcast %47 : vector<1x384xf32> to vector<8x384xf32>
    %c2 = arith.constant 2 : index
    %c0_31 = arith.constant 0 : index
    %c0_32 = arith.constant 0 : index
    %49 = vector.load %arg10[%c2, %c0_31, %c0_32] : memref<3x1x384xf32, #tpu.memory_space<vmem>>, vector<1x1x384xf32>
    %50 = vector.shape_cast %49 : vector<1x1x384xf32> to vector<1x384xf32>
    %51 = vector.shape_cast %50 : vector<1x384xf32> to vector<1x384xf32>
    %52 = vector.broadcast %51 : vector<1x384xf32> to vector<8x384xf32>
    %c0_33 = arith.constant 0 : index
    %c0_34 = arith.constant 0 : index
    %c0_35 = arith.constant 0 : index
    %53 = vector.load %arg11[%c0_33, %c0_34, %c0_35] : memref<3x1x32xf32, #tpu.memory_space<vmem>>, vector<1x1x32xf32>
    %54 = vector.shape_cast %53 : vector<1x1x32xf32> to vector<1x32xf32>
    %55 = vector.shape_cast %54 : vector<1x32xf32> to vector<1x32xf32>
    %56 = vector.broadcast %55 : vector<1x32xf32> to vector<8x32xf32>
    %c1_36 = arith.constant 1 : index
    %c0_37 = arith.constant 0 : index
    %c0_38 = arith.constant 0 : index
    %57 = vector.load %arg11[%c1_36, %c0_37, %c0_38] : memref<3x1x32xf32, #tpu.memory_space<vmem>>, vector<1x1x32xf32>
    %58 = vector.shape_cast %57 : vector<1x1x32xf32> to vector<1x32xf32>
    %59 = vector.shape_cast %58 : vector<1x32xf32> to vector<1x32xf32>
    %60 = vector.broadcast %59 : vector<1x32xf32> to vector<8x32xf32>
    %c2_39 = arith.constant 2 : index
    %c0_40 = arith.constant 0 : index
    %c0_41 = arith.constant 0 : index
    %61 = vector.load %arg11[%c2_39, %c0_40, %c0_41] : memref<3x1x32xf32, #tpu.memory_space<vmem>>, vector<1x1x32xf32>
    %62 = vector.shape_cast %61 : vector<1x1x32xf32> to vector<1x32xf32>
    %63 = vector.shape_cast %62 : vector<1x32xf32> to vector<1x32xf32>
    %64 = vector.broadcast %63 : vector<1x32xf32> to vector<8x32xf32>
    %cst_42 = arith.constant 0.000000e+00 : f32
    %65 = vector.broadcast %cst_42 : f32 to vector<8x32xf32>
    %cst_43 = arith.constant 0.000000e+00 : f32
    %66 = vector.broadcast %cst_43 : f32 to vector<8x32xf32>
    %cst_44 = arith.constant 0.000000e+00 : f32
    %67 = vector.broadcast %cst_44 : f32 to vector<8x32xf32>
    %68 = vector.extract_strided_slice %44 {offsets = [0, 0], sizes = [8, 384], strides = [1, 1]} : vector<64x384xf32> to vector<8x384xf32>
    %c0_45 = arith.constant 0 : index
    %c0_46 = arith.constant 0 : index
    %c0_47 = arith.constant 0 : index
    %69 = vector.load %arg9[%c0_45, %c0_46, %c0_47] : memref<3x32x384xbf16, #tpu.memory_space<vmem>>, vector<1x32x384xbf16>
    %70 = vector.shape_cast %69 : vector<1x32x384xbf16> to vector<32x384xbf16>
    %71 = arith.truncf %65 : vector<8x32xf32> to vector<8x32xbf16>
    %cst_48 = arith.constant dense<0.000000e+00> : vector<8x384xf32>
    %72 = tpu.matmul %71, %70, %cst_48 {dimension_numbers = #tpu.dot_dimension_numbers<[1], [0], [0], [1], [0, 0, 1, 1], [], []>} : vector<8x32xbf16>, vector<32x384xbf16>, vector<8x384xf32> -> vector<8x384xf32>
    %73 = vector.extract_strided_slice %68 {offsets = [0, 0], sizes = [8, 32], strides = [1, 1]} : vector<8x384xf32> to vector<8x32xf32>
    %74 = vector.extract_strided_slice %72 {offsets = [0, 0], sizes = [8, 32], strides = [1, 1]} : vector<8x384xf32> to vector<8x32xf32>
    %75 = arith.addf %73, %74 : vector<8x32xf32>
    %76 = arith.negf %75 : vector<8x32xf32>
    %77 = math.exp %76 : vector<8x32xf32>
    %cst_49 = arith.constant 1.000000e+00 : f32
    %78 = vector.broadcast %cst_49 : f32 to vector<8x32xf32>
    %79 = arith.addf %78, %77 : vector<8x32xf32>
    %80 = arith.divf %78, %79 : vector<8x32xf32>
    %81 = vector.extract_strided_slice %68 {offsets = [0, 128], sizes = [8, 32], strides = [1, 1]} : vector<8x384xf32> to vector<8x32xf32>
    %82 = vector.extract_strided_slice %72 {offsets = [0, 128], sizes = [8, 32], strides = [1, 1]} : vector<8x384xf32> to vector<8x32xf32>
    %83 = arith.addf %81, %82 : vector<8x32xf32>
    %84 = arith.negf %83 : vector<8x32xf32>
    %85 = math.exp %84 : vector<8x32xf32>
    %cst_50 = arith.constant 1.000000e+00 : f32
    %86 = vector.broadcast %cst_50 : f32 to vector<8x32xf32>
    %87 = arith.addf %86, %85 : vector<8x32xf32>
    %88 = arith.divf %86, %87 : vector<8x32xf32>
    %89 = vector.extract_strided_slice %68 {offsets = [0, 256], sizes = [8, 32], strides = [1, 1]} : vector<8x384xf32> to vector<8x32xf32>
    %90 = vector.extract_strided_slice %72 {offsets = [0, 256], sizes = [8, 32], strides = [1, 1]} : vector<8x384xf32> to vector<8x32xf32>
    %91 = arith.addf %90, %56 : vector<8x32xf32>
    %92 = arith.mulf %80, %91 : vector<8x32xf32>
    %93 = arith.addf %89, %92 : vector<8x32xf32>
    %94 = math.tanh %93 : vector<8x32xf32>
    %cst_51 = arith.constant 1.000000e+00 : f32
    %95 = vector.broadcast %cst_51 : f32 to vector<8x32xf32>
    %96 = arith.subf %95, %88 : vector<8x32xf32>
    %97 = arith.mulf %96, %94 : vector<8x32xf32>
    %98 = arith.mulf %88, %65 : vector<8x32xf32>
    %99 = arith.addf %97, %98 : vector<8x32xf32>
    %100 = arith.truncf %99 : vector<8x32xf32> to vector<8x32xbf16>
    %c1_52 = arith.constant 1 : index
    %c0_53 = arith.constant 0 : index
    %c0_54 = arith.constant 0 : index
    %101 = vector.load %arg8[%c1_52, %c0_53, %c0_54] : memref<3x32x384xbf16, #tpu.memory_space<vmem>>, vector<1x32x384xbf16>
    %102 = vector.shape_cast %101 : vector<1x32x384xbf16> to vector<32x384xbf16>
    %cst_55 = arith.constant dense<0.000000e+00> : vector<8x384xf32>
    %103 = tpu.matmul %100, %102, %cst_55 {dimension_numbers = #tpu.dot_dimension_numbers<[1], [0], [0], [1], [0, 0, 1, 1], [], []>} : vector<8x32xbf16>, vector<32x384xbf16>, vector<8x384xf32> -> vector<8x384xf32>
    %104 = arith.addf %103, %48 : vector<8x384xf32>
    %c1_56 = arith.constant 1 : index
    %c0_57 = arith.constant 0 : index
    %c0_58 = arith.constant 0 : index
    %105 = vector.load %arg9[%c1_56, %c0_57, %c0_58] : memref<3x32x384xbf16, #tpu.memory_space<vmem>>, vector<1x32x384xbf16>
    %106 = vector.shape_cast %105 : vector<1x32x384xbf16> to vector<32x384xbf16>
    %107 = arith.truncf %66 : vector<8x32xf32> to vector<8x32xbf16>
    %cst_59 = arith.constant dense<0.000000e+00> : vector<8x384xf32>
    %108 = tpu.matmul %107, %106, %cst_59 {dimension_numbers = #tpu.dot_dimension_numbers<[1], [0], [0], [1], [0, 0, 1, 1], [], []>} : vector<8x32xbf16>, vector<32x384xbf16>, vector<8x384xf32> -> vector<8x384xf32>
    %109 = vector.extract_strided_slice %104 {offsets = [0, 0], sizes = [8, 32], strides = [1, 1]} : vector<8x384xf32> to vector<8x32xf32>
    %110 = vector.extract_strided_slice %108 {offsets = [0, 0], sizes = [8, 32], strides = [1, 1]} : vector<8x384xf32> to vector<8x32xf32>
    %111 = arith.addf %109, %110 : vector<8x32xf32>
    %112 = arith.negf %111 : vector<8x32xf32>
    %113 = math.exp %112 : vector<8x32xf32>
    %cst_60 = arith.constant 1.000000e+00 : f32
    %114 = vector.broadcast %cst_60 : f32 to vector<8x32xf32>
    %115 = arith.addf %114, %113 : vector<8x32xf32>
    %116 = arith.divf %114, %115 : vector<8x32xf32>
    %117 = vector.extract_strided_slice %104 {offsets = [0, 128], sizes = [8, 32], strides = [1, 1]} : vector<8x384xf32> to vector<8x32xf32>
    %118 = vector.extract_strided_slice %108 {offsets = [0, 128], sizes = [8, 32], strides = [1, 1]} : vector<8x384xf32> to vector<8x32xf32>
    %119 = arith.addf %117, %118 : vector<8x32xf32>
    %120 = arith.negf %119 : vector<8x32xf32>
    %121 = math.exp %120 : vector<8x32xf32>
    %cst_61 = arith.constant 1.000000e+00 : f32
    %122 = vector.broadcast %cst_61 : f32 to vector<8x32xf32>
    %123 = arith.addf %122, %121 : vector<8x32xf32>
    %124 = arith.divf %122, %123 : vector<8x32xf32>
    %125 = vector.extract_strided_slice %104 {offsets = [0, 256], sizes = [8, 32], strides = [1, 1]} : vector<8x384xf32> to vector<8x32xf32>
    %126 = vector.extract_strided_slice %108 {offsets = [0, 256], sizes = [8, 32], strides = [1, 1]} : vector<8x384xf32> to vector<8x32xf32>
    %127 = arith.addf %126, %60 : vector<8x32xf32>
    %128 = arith.mulf %116, %127 : vector<8x32xf32>
    %129 = arith.addf %125, %128 : vector<8x32xf32>
    %130 = math.tanh %129 : vector<8x32xf32>
    %cst_62 = arith.constant 1.000000e+00 : f32
    %131 = vector.broadcast %cst_62 : f32 to vector<8x32xf32>
    %132 = arith.subf %131, %124 : vector<8x32xf32>
    %133 = arith.mulf %132, %130 : vector<8x32xf32>
    %134 = arith.mulf %124, %66 : vector<8x32xf32>
    %135 = arith.addf %133, %134 : vector<8x32xf32>
    %136 = arith.truncf %135 : vector<8x32xf32> to vector<8x32xbf16>
    %c2_63 = arith.constant 2 : index
    %c0_64 = arith.constant 0 : index
    %c0_65 = arith.constant 0 : index
    %137 = vector.load %arg8[%c2_63, %c0_64, %c0_65] : memref<3x32x384xbf16, #tpu.memory_space<vmem>>, vector<1x32x384xbf16>
    %138 = vector.shape_cast %137 : vector<1x32x384xbf16> to vector<32x384xbf16>
    %cst_66 = arith.constant dense<0.000000e+00> : vector<8x384xf32>
    %139 = tpu.matmul %136, %138, %cst_66 {dimension_numbers = #tpu.dot_dimension_numbers<[1], [0], [0], [1], [0, 0, 1, 1], [], []>} : vector<8x32xbf16>, vector<32x384xbf16>, vector<8x384xf32> -> vector<8x384xf32>
    %140 = arith.addf %139, %52 : vector<8x384xf32>
    %c2_67 = arith.constant 2 : index
    %c0_68 = arith.constant 0 : index
    %c0_69 = arith.constant 0 : index
    %141 = vector.load %arg9[%c2_67, %c0_68, %c0_69] : memref<3x32x384xbf16, #tpu.memory_space<vmem>>, vector<1x32x384xbf16>
    %142 = vector.shape_cast %141 : vector<1x32x384xbf16> to vector<32x384xbf16>
    %143 = arith.truncf %67 : vector<8x32xf32> to vector<8x32xbf16>
    %cst_70 = arith.constant dense<0.000000e+00> : vector<8x384xf32>
    %144 = tpu.matmul %143, %142, %cst_70 {dimension_numbers = #tpu.dot_dimension_numbers<[1], [0], [0], [1], [0, 0, 1, 1], [], []>} : vector<8x32xbf16>, vector<32x384xbf16>, vector<8x384xf32> -> vector<8x384xf32>
    %145 = vector.extract_strided_slice %140 {offsets = [0, 0], sizes = [8, 32], strides = [1, 1]} : vector<8x384xf32> to vector<8x32xf32>
    %146 = vector.extract_strided_slice %144 {offsets = [0, 0], sizes = [8, 32], strides = [1, 1]} : vector<8x384xf32> to vector<8x32xf32>
    %147 = arith.addf %145, %146 : vector<8x32xf32>
    %148 = arith.negf %147 : vector<8x32xf32>
    %149 = math.exp %148 : vector<8x32xf32>
    %cst_71 = arith.constant 1.000000e+00 : f32
    %150 = vector.broadcast %cst_71 : f32 to vector<8x32xf32>
    %151 = arith.addf %150, %149 : vector<8x32xf32>
    %152 = arith.divf %150, %151 : vector<8x32xf32>
    %153 = vector.extract_strided_slice %140 {offsets = [0, 128], sizes = [8, 32], strides = [1, 1]} : vector<8x384xf32> to vector<8x32xf32>
    %154 = vector.extract_strided_slice %144 {offsets = [0, 128], sizes = [8, 32], strides = [1, 1]} : vector<8x384xf32> to vector<8x32xf32>
    %155 = arith.addf %153, %154 : vector<8x32xf32>
    %156 = arith.negf %155 : vector<8x32xf32>
    %157 = math.exp %156 : vector<8x32xf32>
    %cst_72 = arith.constant 1.000000e+00 : f32
    %158 = vector.broadcast %cst_72 : f32 to vector<8x32xf32>
    %159 = arith.addf %158, %157 : vector<8x32xf32>
    %160 = arith.divf %158, %159 : vector<8x32xf32>
    %161 = vector.extract_strided_slice %140 {offsets = [0, 256], sizes = [8, 32], strides = [1, 1]} : vector<8x384xf32> to vector<8x32xf32>
    %162 = vector.extract_strided_slice %144 {offsets = [0, 256], sizes = [8, 32], strides = [1, 1]} : vector<8x384xf32> to vector<8x32xf32>
    %163 = arith.addf %162, %64 : vector<8x32xf32>
    %164 = arith.mulf %152, %163 : vector<8x32xf32>
    %165 = arith.addf %161, %164 : vector<8x32xf32>
    %166 = math.tanh %165 : vector<8x32xf32>
    %cst_73 = arith.constant 1.000000e+00 : f32
    %167 = vector.broadcast %cst_73 : f32 to vector<8x32xf32>
    %168 = arith.subf %167, %160 : vector<8x32xf32>
    %169 = arith.mulf %168, %166 : vector<8x32xf32>
    %170 = arith.mulf %160, %67 : vector<8x32xf32>
    %171 = arith.addf %169, %170 : vector<8x32xf32>
    %172 = vector.extract_strided_slice %44 {offsets = [8, 0], sizes = [8, 384], strides = [1, 1]} : vector<64x384xf32> to vector<8x384xf32>
    %c0_74 = arith.constant 0 : index
    %c0_75 = arith.constant 0 : index
    %c0_76 = arith.constant 0 : index
    %173 = vector.load %arg9[%c0_74, %c0_75, %c0_76] : memref<3x32x384xbf16, #tpu.memory_space<vmem>>, vector<1x32x384xbf16>
    %174 = vector.shape_cast %173 : vector<1x32x384xbf16> to vector<32x384xbf16>
    %175 = arith.truncf %99 : vector<8x32xf32> to vector<8x32xbf16>
    %cst_77 = arith.constant dense<0.000000e+00> : vector<8x384xf32>
    %176 = tpu.matmul %175, %174, %cst_77 {dimension_numbers = #tpu.dot_dimension_numbers<[1], [0], [0], [1], [0, 0, 1, 1], [], []>} : vector<8x32xbf16>, vector<32x384xbf16>, vector<8x384xf32> -> vector<8x384xf32>
    %177 = vector.extract_strided_slice %172 {offsets = [0, 0], sizes = [8, 32], strides = [1, 1]} : vector<8x384xf32> to vector<8x32xf32>
    %178 = vector.extract_strided_slice %176 {offsets = [0, 0], sizes = [8, 32], strides = [1, 1]} : vector<8x384xf32> to vector<8x32xf32>
    %179 = arith.addf %177, %178 : vector<8x32xf32>
    %180 = arith.negf %179 : vector<8x32xf32>
    %181 = math.exp %180 : vector<8x32xf32>
    %cst_78 = arith.constant 1.000000e+00 : f32
    %182 = vector.broadcast %cst_78 : f32 to vector<8x32xf32>
    %183 = arith.addf %182, %181 : vector<8x32xf32>
    %184 = arith.divf %182, %183 : vector<8x32xf32>
    %185 = vector.extract_strided_slice %172 {offsets = [0, 128], sizes = [8, 32], strides = [1, 1]} : vector<8x384xf32> to vector<8x32xf32>
    %186 = vector.extract_strided_slice %176 {offsets = [0, 128], sizes = [8, 32], strides = [1, 1]} : vector<8x384xf32> to vector<8x32xf32>
    %187 = arith.addf %185, %186 : vector<8x32xf32>
    %188 = arith.negf %187 : vector<8x32xf32>
    %189 = math.exp %188 : vector<8x32xf32>
    %cst_79 = arith.constant 1.000000e+00 : f32
    %190 = vector.broadcast %cst_79 : f32 to vector<8x32xf32>
    %191 = arith.addf %190, %189 : vector<8x32xf32>
    %192 = arith.divf %190, %191 : vector<8x32xf32>
    %193 = vector.extract_strided_slice %172 {offsets = [0, 256], sizes = [8, 32], strides = [1, 1]} : vector<8x384xf32> to vector<8x32xf32>
    %194 = vector.extract_strided_slice %176 {offsets = [0, 256], sizes = [8, 32], strides = [1, 1]} : vector<8x384xf32> to vector<8x32xf32>
    %195 = arith.addf %194, %56 : vector<8x32xf32>
    %196 = arith.mulf %184, %195 : vector<8x32xf32>
    %197 = arith.addf %193, %196 : vector<8x32xf32>
    %198 = math.tanh %197 : vector<8x32xf32>
    %cst_80 = arith.constant 1.000000e+00 : f32
    %199 = vector.broadcast %cst_80 : f32 to vector<8x32xf32>
    %200 = arith.subf %199, %192 : vector<8x32xf32>
    %201 = arith.mulf %200, %198 : vector<8x32xf32>
    %202 = arith.mulf %192, %99 : vector<8x32xf32>
    %203 = arith.addf %201, %202 : vector<8x32xf32>
    %204 = arith.truncf %203 : vector<8x32xf32> to vector<8x32xbf16>
    %c1_81 = arith.constant 1 : index
    %c0_82 = arith.constant 0 : index
    %c0_83 = arith.constant 0 : index
    %205 = vector.load %arg8[%c1_81, %c0_82, %c0_83] : memref<3x32x384xbf16, #tpu.memory_space<vmem>>, vector<1x32x384xbf16>
    %206 = vector.shape_cast %205 : vector<1x32x384xbf16> to vector<32x384xbf16>
    %cst_84 = arith.constant dense<0.000000e+00> : vector<8x384xf32>
    %207 = tpu.matmul %204, %206, %cst_84 {dimension_numbers = #tpu.dot_dimension_numbers<[1], [0], [0], [1], [0, 0, 1, 1], [], []>} : vector<8x32xbf16>, vector<32x384xbf16>, vector<8x384xf32> -> vector<8x384xf32>
    %208 = arith.addf %207, %48 : vector<8x384xf32>
    %c1_85 = arith.constant 1 : index
    %c0_86 = arith.constant 0 : index
    %c0_87 = arith.constant 0 : index
    %209 = vector.load %arg9[%c1_85, %c0_86, %c0_87] : memref<3x32x384xbf16, #tpu.memory_space<vmem>>, vector<1x32x384xbf16>
    %210 = vector.shape_cast %209 : vector<1x32x384xbf16> to vector<32x384xbf16>
    %211 = arith.truncf %135 : vector<8x32xf32> to vector<8x32xbf16>
    %cst_88 = arith.constant dense<0.000000e+00> : vector<8x384xf32>
    %212 = tpu.matmul %211, %210, %cst_88 {dimension_numbers = #tpu.dot_dimension_numbers<[1], [0], [0], [1], [0, 0, 1, 1], [], []>} : vector<8x32xbf16>, vector<32x384xbf16>, vector<8x384xf32> -> vector<8x384xf32>
    %213 = vector.extract_strided_slice %208 {offsets = [0, 0], sizes = [8, 32], strides = [1, 1]} : vector<8x384xf32> to vector<8x32xf32>
    %214 = vector.extract_strided_slice %212 {offsets = [0, 0], sizes = [8, 32], strides = [1, 1]} : vector<8x384xf32> to vector<8x32xf32>
    %215 = arith.addf %213, %214 : vector<8x32xf32>
    %216 = arith.negf %215 : vector<8x32xf32>
    %217 = math.exp %216 : vector<8x32xf32>
    %cst_89 = arith.constant 1.000000e+00 : f32
    %218 = vector.broadcast %cst_89 : f32 to vector<8x32xf32>
    %219 = arith.addf %218, %217 : vector<8x32xf32>
    %220 = arith.divf %218, %219 : vector<8x32xf32>
    %221 = vector.extract_strided_slice %208 {offsets = [0, 128], sizes = [8, 32], strides = [1, 1]} : vector<8x384xf32> to vector<8x32xf32>
    %222 = vector.extract_strided_slice %212 {offsets = [0, 128], sizes = [8, 32], strides = [1, 1]} : vector<8x384xf32> to vector<8x32xf32>
    %223 = arith.addf %221, %222 : vector<8x32xf32>
    %224 = arith.negf %223 : vector<8x32xf32>
    %225 = math.exp %224 : vector<8x32xf32>
    %cst_90 = arith.constant 1.000000e+00 : f32
    %226 = vector.broadcast %cst_90 : f32 to vector<8x32xf32>
    %227 = arith.addf %226, %225 : vector<8x32xf32>
    %228 = arith.divf %226, %227 : vector<8x32xf32>
    %229 = vector.extract_strided_slice %208 {offsets = [0, 256], sizes = [8, 32], strides = [1, 1]} : vector<8x384xf32> to vector<8x32xf32>
    %230 = vector.extract_strided_slice %212 {offsets = [0, 256], sizes = [8, 32], strides = [1, 1]} : vector<8x384xf32> to vector<8x32xf32>
    %231 = arith.addf %230, %60 : vector<8x32xf32>
    %232 = arith.mulf %220, %231 : vector<8x32xf32>
    %233 = arith.addf %229, %232 : vector<8x32xf32>
    %234 = math.tanh %233 : vector<8x32xf32>
    %cst_91 = arith.constant 1.000000e+00 : f32
    %235 = vector.broadcast %cst_91 : f32 to vector<8x32xf32>
    %236 = arith.subf %235, %228 : vector<8x32xf32>
    %237 = arith.mulf %236, %234 : vector<8x32xf32>
    %238 = arith.mulf %228, %135 : vector<8x32xf32>
    %239 = arith.addf %237, %238 : vector<8x32xf32>
    %240 = arith.truncf %239 : vector<8x32xf32> to vector<8x32xbf16>
    %c2_92 = arith.constant 2 : index
    %c0_93 = arith.constant 0 : index
    %c0_94 = arith.constant 0 : index
    %241 = vector.load %arg8[%c2_92, %c0_93, %c0_94] : memref<3x32x384xbf16, #tpu.memory_space<vmem>>, vector<1x32x384xbf16>
    %242 = vector.shape_cast %241 : vector<1x32x384xbf16> to vector<32x384xbf16>
    %cst_95 = arith.constant dense<0.000000e+00> : vector<8x384xf32>
    %243 = tpu.matmul %240, %242, %cst_95 {dimension_numbers = #tpu.dot_dimension_numbers<[1], [0], [0], [1], [0, 0, 1, 1], [], []>} : vector<8x32xbf16>, vector<32x384xbf16>, vector<8x384xf32> -> vector<8x384xf32>
    %244 = arith.addf %243, %52 : vector<8x384xf32>
    %c2_96 = arith.constant 2 : index
    %c0_97 = arith.constant 0 : index
    %c0_98 = arith.constant 0 : index
    %245 = vector.load %arg9[%c2_96, %c0_97, %c0_98] : memref<3x32x384xbf16, #tpu.memory_space<vmem>>, vector<1x32x384xbf16>
    %246 = vector.shape_cast %245 : vector<1x32x384xbf16> to vector<32x384xbf16>
    %247 = arith.truncf %171 : vector<8x32xf32> to vector<8x32xbf16>
    %cst_99 = arith.constant dense<0.000000e+00> : vector<8x384xf32>
    %248 = tpu.matmul %247, %246, %cst_99 {dimension_numbers = #tpu.dot_dimension_numbers<[1], [0], [0], [1], [0, 0, 1, 1], [], []>} : vector<8x32xbf16>, vector<32x384xbf16>, vector<8x384xf32> -> vector<8x384xf32>
    %249 = vector.extract_strided_slice %244 {offsets = [0, 0], sizes = [8, 32], strides = [1, 1]} : vector<8x384xf32> to vector<8x32xf32>
    %250 = vector.extract_strided_slice %248 {offsets = [0, 0], sizes = [8, 32], strides = [1, 1]} : vector<8x384xf32> to vector<8x32xf32>
    %251 = arith.addf %249, %250 : vector<8x32xf32>
    %252 = arith.negf %251 : vector<8x32xf32>
    %253 = math.exp %252 : vector<8x32xf32>
    %cst_100 = arith.constant 1.000000e+00 : f32
    %254 = vector.broadcast %cst_100 : f32 to vector<8x32xf32>
    %255 = arith.addf %254, %253 : vector<8x32xf32>
    %256 = arith.divf %254, %255 : vector<8x32xf32>
    %257 = vector.extract_strided_slice %244 {offsets = [0, 128], sizes = [8, 32], strides = [1, 1]} : vector<8x384xf32> to vector<8x32xf32>
    %258 = vector.extract_strided_slice %248 {offsets = [0, 128], sizes = [8, 32], strides = [1, 1]} : vector<8x384xf32> to vector<8x32xf32>
    %259 = arith.addf %257, %258 : vector<8x32xf32>
    %260 = arith.negf %259 : vector<8x32xf32>
    %261 = math.exp %260 : vector<8x32xf32>
    %cst_101 = arith.constant 1.000000e+00 : f32
    %262 = vector.broadcast %cst_101 : f32 to vector<8x32xf32>
    %263 = arith.addf %262, %261 : vector<8x32xf32>
    %264 = arith.divf %262, %263 : vector<8x32xf32>
    %265 = vector.extract_strided_slice %244 {offsets = [0, 256], sizes = [8, 32], strides = [1, 1]} : vector<8x384xf32> to vector<8x32xf32>
    %266 = vector.extract_strided_slice %248 {offsets = [0, 256], sizes = [8, 32], strides = [1, 1]} : vector<8x384xf32> to vector<8x32xf32>
    %267 = arith.addf %266, %64 : vector<8x32xf32>
    %268 = arith.mulf %256, %267 : vector<8x32xf32>
    %269 = arith.addf %265, %268 : vector<8x32xf32>
    %270 = math.tanh %269 : vector<8x32xf32>
    %cst_102 = arith.constant 1.000000e+00 : f32
    %271 = vector.broadcast %cst_102 : f32 to vector<8x32xf32>
    %272 = arith.subf %271, %264 : vector<8x32xf32>
    %273 = arith.mulf %272, %270 : vector<8x32xf32>
    %274 = arith.mulf %264, %171 : vector<8x32xf32>
    %275 = arith.addf %273, %274 : vector<8x32xf32>
    %276 = vector.extract_strided_slice %44 {offsets = [16, 0], sizes = [8, 384], strides = [1, 1]} : vector<64x384xf32> to vector<8x384xf32>
    %c0_103 = arith.constant 0 : index
    %c0_104 = arith.constant 0 : index
    %c0_105 = arith.constant 0 : index
    %277 = vector.load %arg9[%c0_103, %c0_104, %c0_105] : memref<3x32x384xbf16, #tpu.memory_space<vmem>>, vector<1x32x384xbf16>
    %278 = vector.shape_cast %277 : vector<1x32x384xbf16> to vector<32x384xbf16>
    %279 = arith.truncf %203 : vector<8x32xf32> to vector<8x32xbf16>
    %cst_106 = arith.constant dense<0.000000e+00> : vector<8x384xf32>
    %280 = tpu.matmul %279, %278, %cst_106 {dimension_numbers = #tpu.dot_dimension_numbers<[1], [0], [0], [1], [0, 0, 1, 1], [], []>} : vector<8x32xbf16>, vector<32x384xbf16>, vector<8x384xf32> -> vector<8x384xf32>
    %281 = vector.extract_strided_slice %276 {offsets = [0, 0], sizes = [8, 32], strides = [1, 1]} : vector<8x384xf32> to vector<8x32xf32>
    %282 = vector.extract_strided_slice %280 {offsets = [0, 0], sizes = [8, 32], strides = [1, 1]} : vector<8x384xf32> to vector<8x32xf32>
    %283 = arith.addf %281, %282 : vector<8x32xf32>
    %284 = arith.negf %283 : vector<8x32xf32>
    %285 = math.exp %284 : vector<8x32xf32>
    %cst_107 = arith.constant 1.000000e+00 : f32
    %286 = vector.broadcast %cst_107 : f32 to vector<8x32xf32>
    %287 = arith.addf %286, %285 : vector<8x32xf32>
    %288 = arith.divf %286, %287 : vector<8x32xf32>
    %289 = vector.extract_strided_slice %276 {offsets = [0, 128], sizes = [8, 32], strides = [1, 1]} : vector<8x384xf32> to vector<8x32xf32>
    %290 = vector.extract_strided_slice %280 {offsets = [0, 128], sizes = [8, 32], strides = [1, 1]} : vector<8x384xf32> to vector<8x32xf32>
    %291 = arith.addf %289, %290 : vector<8x32xf32>
    %292 = arith.negf %291 : vector<8x32xf32>
    %293 = math.exp %292 : vector<8x32xf32>
    %cst_108 = arith.constant 1.000000e+00 : f32
    %294 = vector.broadcast %cst_108 : f32 to vector<8x32xf32>
    %295 = arith.addf %294, %293 : vector<8x32xf32>
    %296 = arith.divf %294, %295 : vector<8x32xf32>
    %297 = vector.extract_strided_slice %276 {offsets = [0, 256], sizes = [8, 32], strides = [1, 1]} : vector<8x384xf32> to vector<8x32xf32>
    %298 = vector.extract_strided_slice %280 {offsets = [0, 256], sizes = [8, 32], strides = [1, 1]} : vector<8x384xf32> to vector<8x32xf32>
    %299 = arith.addf %298, %56 : vector<8x32xf32>
    %300 = arith.mulf %288, %299 : vector<8x32xf32>
    %301 = arith.addf %297, %300 : vector<8x32xf32>
    %302 = math.tanh %301 : vector<8x32xf32>
    %cst_109 = arith.constant 1.000000e+00 : f32
    %303 = vector.broadcast %cst_109 : f32 to vector<8x32xf32>
    %304 = arith.subf %303, %296 : vector<8x32xf32>
    %305 = arith.mulf %304, %302 : vector<8x32xf32>
    %306 = arith.mulf %296, %203 : vector<8x32xf32>
    %307 = arith.addf %305, %306 : vector<8x32xf32>
    %308 = arith.truncf %307 : vector<8x32xf32> to vector<8x32xbf16>
    %c1_110 = arith.constant 1 : index
    %c0_111 = arith.constant 0 : index
    %c0_112 = arith.constant 0 : index
    %309 = vector.load %arg8[%c1_110, %c0_111, %c0_112] : memref<3x32x384xbf16, #tpu.memory_space<vmem>>, vector<1x32x384xbf16>
    %310 = vector.shape_cast %309 : vector<1x32x384xbf16> to vector<32x384xbf16>
    %cst_113 = arith.constant dense<0.000000e+00> : vector<8x384xf32>
    %311 = tpu.matmul %308, %310, %cst_113 {dimension_numbers = #tpu.dot_dimension_numbers<[1], [0], [0], [1], [0, 0, 1, 1], [], []>} : vector<8x32xbf16>, vector<32x384xbf16>, vector<8x384xf32> -> vector<8x384xf32>
    %312 = arith.addf %311, %48 : vector<8x384xf32>
    %c1_114 = arith.constant 1 : index
    %c0_115 = arith.constant 0 : index
    %c0_116 = arith.constant 0 : index
    %313 = vector.load %arg9[%c1_114, %c0_115, %c0_116] : memref<3x32x384xbf16, #tpu.memory_space<vmem>>, vector<1x32x384xbf16>
    %314 = vector.shape_cast %313 : vector<1x32x384xbf16> to vector<32x384xbf16>
    %315 = arith.truncf %239 : vector<8x32xf32> to vector<8x32xbf16>
    %cst_117 = arith.constant dense<0.000000e+00> : vector<8x384xf32>
    %316 = tpu.matmul %315, %314, %cst_117 {dimension_numbers = #tpu.dot_dimension_numbers<[1], [0], [0], [1], [0, 0, 1, 1], [], []>} : vector<8x32xbf16>, vector<32x384xbf16>, vector<8x384xf32> -> vector<8x384xf32>
    %317 = vector.extract_strided_slice %312 {offsets = [0, 0], sizes = [8, 32], strides = [1, 1]} : vector<8x384xf32> to vector<8x32xf32>
    %318 = vector.extract_strided_slice %316 {offsets = [0, 0], sizes = [8, 32], strides = [1, 1]} : vector<8x384xf32> to vector<8x32xf32>
    %319 = arith.addf %317, %318 : vector<8x32xf32>
    %320 = arith.negf %319 : vector<8x32xf32>
    %321 = math.exp %320 : vector<8x32xf32>
    %cst_118 = arith.constant 1.000000e+00 : f32
    %322 = vector.broadcast %cst_118 : f32 to vector<8x32xf32>
    %323 = arith.addf %322, %321 : vector<8x32xf32>
    %324 = arith.divf %322, %323 : vector<8x32xf32>
    %325 = vector.extract_strided_slice %312 {offsets = [0, 128], sizes = [8, 32], strides = [1, 1]} : vector<8x384xf32> to vector<8x32xf32>
    %326 = vector.extract_strided_slice %316 {offsets = [0, 128], sizes = [8, 32], strides = [1, 1]} : vector<8x384xf32> to vector<8x32xf32>
    %327 = arith.addf %325, %326 : vector<8x32xf32>
    %328 = arith.negf %327 : vector<8x32xf32>
    %329 = math.exp %328 : vector<8x32xf32>
    %cst_119 = arith.constant 1.000000e+00 : f32
    %330 = vector.broadcast %cst_119 : f32 to vector<8x32xf32>
    %331 = arith.addf %330, %329 : vector<8x32xf32>
    %332 = arith.divf %330, %331 : vector<8x32xf32>
    %333 = vector.extract_strided_slice %312 {offsets = [0, 256], sizes = [8, 32], strides = [1, 1]} : vector<8x384xf32> to vector<8x32xf32>
    %334 = vector.extract_strided_slice %316 {offsets = [0, 256], sizes = [8, 32], strides = [1, 1]} : vector<8x384xf32> to vector<8x32xf32>
    %335 = arith.addf %334, %60 : vector<8x32xf32>
    %336 = arith.mulf %324, %335 : vector<8x32xf32>
    %337 = arith.addf %333, %336 : vector<8x32xf32>
    %338 = math.tanh %337 : vector<8x32xf32>
    %cst_120 = arith.constant 1.000000e+00 : f32
    %339 = vector.broadcast %cst_120 : f32 to vector<8x32xf32>
    %340 = arith.subf %339, %332 : vector<8x32xf32>
    %341 = arith.mulf %340, %338 : vector<8x32xf32>
    %342 = arith.mulf %332, %239 : vector<8x32xf32>
    %343 = arith.addf %341, %342 : vector<8x32xf32>
    %344 = arith.truncf %343 : vector<8x32xf32> to vector<8x32xbf16>
    %c2_121 = arith.constant 2 : index
    %c0_122 = arith.constant 0 : index
    %c0_123 = arith.constant 0 : index
    %345 = vector.load %arg8[%c2_121, %c0_122, %c0_123] : memref<3x32x384xbf16, #tpu.memory_space<vmem>>, vector<1x32x384xbf16>
    %346 = vector.shape_cast %345 : vector<1x32x384xbf16> to vector<32x384xbf16>
    %cst_124 = arith.constant dense<0.000000e+00> : vector<8x384xf32>
    %347 = tpu.matmul %344, %346, %cst_124 {dimension_numbers = #tpu.dot_dimension_numbers<[1], [0], [0], [1], [0, 0, 1, 1], [], []>} : vector<8x32xbf16>, vector<32x384xbf16>, vector<8x384xf32> -> vector<8x384xf32>
    %348 = arith.addf %347, %52 : vector<8x384xf32>
    %c2_125 = arith.constant 2 : index
    %c0_126 = arith.constant 0 : index
    %c0_127 = arith.constant 0 : index
    %349 = vector.load %arg9[%c2_125, %c0_126, %c0_127] : memref<3x32x384xbf16, #tpu.memory_space<vmem>>, vector<1x32x384xbf16>
    %350 = vector.shape_cast %349 : vector<1x32x384xbf16> to vector<32x384xbf16>
    %351 = arith.truncf %275 : vector<8x32xf32> to vector<8x32xbf16>
    %cst_128 = arith.constant dense<0.000000e+00> : vector<8x384xf32>
    %352 = tpu.matmul %351, %350, %cst_128 {dimension_numbers = #tpu.dot_dimension_numbers<[1], [0], [0], [1], [0, 0, 1, 1], [], []>} : vector<8x32xbf16>, vector<32x384xbf16>, vector<8x384xf32> -> vector<8x384xf32>
    %353 = vector.extract_strided_slice %348 {offsets = [0, 0], sizes = [8, 32], strides = [1, 1]} : vector<8x384xf32> to vector<8x32xf32>
    %354 = vector.extract_strided_slice %352 {offsets = [0, 0], sizes = [8, 32], strides = [1, 1]} : vector<8x384xf32> to vector<8x32xf32>
    %355 = arith.addf %353, %354 : vector<8x32xf32>
    %356 = arith.negf %355 : vector<8x32xf32>
    %357 = math.exp %356 : vector<8x32xf32>
    %cst_129 = arith.constant 1.000000e+00 : f32
    %358 = vector.broadcast %cst_129 : f32 to vector<8x32xf32>
    %359 = arith.addf %358, %357 : vector<8x32xf32>
    %360 = arith.divf %358, %359 : vector<8x32xf32>
    %361 = vector.extract_strided_slice %348 {offsets = [0, 128], sizes = [8, 32], strides = [1, 1]} : vector<8x384xf32> to vector<8x32xf32>
    %362 = vector.extract_strided_slice %352 {offsets = [0, 128], sizes = [8, 32], strides = [1, 1]} : vector<8x384xf32> to vector<8x32xf32>
    %363 = arith.addf %361, %362 : vector<8x32xf32>
    %364 = arith.negf %363 : vector<8x32xf32>
    %365 = math.exp %364 : vector<8x32xf32>
    %cst_130 = arith.constant 1.000000e+00 : f32
    %366 = vector.broadcast %cst_130 : f32 to vector<8x32xf32>
    %367 = arith.addf %366, %365 : vector<8x32xf32>
    %368 = arith.divf %366, %367 : vector<8x32xf32>
    %369 = vector.extract_strided_slice %348 {offsets = [0, 256], sizes = [8, 32], strides = [1, 1]} : vector<8x384xf32> to vector<8x32xf32>
    %370 = vector.extract_strided_slice %352 {offsets = [0, 256], sizes = [8, 32], strides = [1, 1]} : vector<8x384xf32> to vector<8x32xf32>
    %371 = arith.addf %370, %64 : vector<8x32xf32>
    %372 = arith.mulf %360, %371 : vector<8x32xf32>
    %373 = arith.addf %369, %372 : vector<8x32xf32>
    %374 = math.tanh %373 : vector<8x32xf32>
    %cst_131 = arith.constant 1.000000e+00 : f32
    %375 = vector.broadcast %cst_131 : f32 to vector<8x32xf32>
    %376 = arith.subf %375, %368 : vector<8x32xf32>
    %377 = arith.mulf %376, %374 : vector<8x32xf32>
    %378 = arith.mulf %368, %275 : vector<8x32xf32>
    %379 = arith.addf %377, %378 : vector<8x32xf32>
    %380 = vector.extract_strided_slice %44 {offsets = [24, 0], sizes = [8, 384], strides = [1, 1]} : vector<64x384xf32> to vector<8x384xf32>
    %c0_132 = arith.constant 0 : index
    %c0_133 = arith.constant 0 : index
    %c0_134 = arith.constant 0 : index
    %381 = vector.load %arg9[%c0_132, %c0_133, %c0_134] : memref<3x32x384xbf16, #tpu.memory_space<vmem>>, vector<1x32x384xbf16>
    %382 = vector.shape_cast %381 : vector<1x32x384xbf16> to vector<32x384xbf16>
    %383 = arith.truncf %307 : vector<8x32xf32> to vector<8x32xbf16>
    %cst_135 = arith.constant dense<0.000000e+00> : vector<8x384xf32>
    %384 = tpu.matmul %383, %382, %cst_135 {dimension_numbers = #tpu.dot_dimension_numbers<[1], [0], [0], [1], [0, 0, 1, 1], [], []>} : vector<8x32xbf16>, vector<32x384xbf16>, vector<8x384xf32> -> vector<8x384xf32>
    %385 = vector.extract_strided_slice %380 {offsets = [0, 0], sizes = [8, 32], strides = [1, 1]} : vector<8x384xf32> to vector<8x32xf32>
    %386 = vector.extract_strided_slice %384 {offsets = [0, 0], sizes = [8, 32], strides = [1, 1]} : vector<8x384xf32> to vector<8x32xf32>
    %387 = arith.addf %385, %386 : vector<8x32xf32>
    %388 = arith.negf %387 : vector<8x32xf32>
    %389 = math.exp %388 : vector<8x32xf32>
    %cst_136 = arith.constant 1.000000e+00 : f32
    %390 = vector.broadcast %cst_136 : f32 to vector<8x32xf32>
    %391 = arith.addf %390, %389 : vector<8x32xf32>
    %392 = arith.divf %390, %391 : vector<8x32xf32>
    %393 = vector.extract_strided_slice %380 {offsets = [0, 128], sizes = [8, 32], strides = [1, 1]} : vector<8x384xf32> to vector<8x32xf32>
    %394 = vector.extract_strided_slice %384 {offsets = [0, 128], sizes = [8, 32], strides = [1, 1]} : vector<8x384xf32> to vector<8x32xf32>
    %395 = arith.addf %393, %394 : vector<8x32xf32>
    %396 = arith.negf %395 : vector<8x32xf32>
    %397 = math.exp %396 : vector<8x32xf32>
    %cst_137 = arith.constant 1.000000e+00 : f32
    %398 = vector.broadcast %cst_137 : f32 to vector<8x32xf32>
    %399 = arith.addf %398, %397 : vector<8x32xf32>
    %400 = arith.divf %398, %399 : vector<8x32xf32>
    %401 = vector.extract_strided_slice %380 {offsets = [0, 256], sizes = [8, 32], strides = [1, 1]} : vector<8x384xf32> to vector<8x32xf32>
    %402 = vector.extract_strided_slice %384 {offsets = [0, 256], sizes = [8, 32], strides = [1, 1]} : vector<8x384xf32> to vector<8x32xf32>
    %403 = arith.addf %402, %56 : vector<8x32xf32>
    %404 = arith.mulf %392, %403 : vector<8x32xf32>
    %405 = arith.addf %401, %404 : vector<8x32xf32>
    %406 = math.tanh %405 : vector<8x32xf32>
    %cst_138 = arith.constant 1.000000e+00 : f32
    %407 = vector.broadcast %cst_138 : f32 to vector<8x32xf32>
    %408 = arith.subf %407, %400 : vector<8x32xf32>
    %409 = arith.mulf %408, %406 : vector<8x32xf32>
    %410 = arith.mulf %400, %307 : vector<8x32xf32>
    %411 = arith.addf %409, %410 : vector<8x32xf32>
    %412 = arith.truncf %411 : vector<8x32xf32> to vector<8x32xbf16>
    %c1_139 = arith.constant 1 : index
    %c0_140 = arith.constant 0 : index
    %c0_141 = arith.constant 0 : index
    %413 = vector.load %arg8[%c1_139, %c0_140, %c0_141] : memref<3x32x384xbf16, #tpu.memory_space<vmem>>, vector<1x32x384xbf16>
    %414 = vector.shape_cast %413 : vector<1x32x384xbf16> to vector<32x384xbf16>
    %cst_142 = arith.constant dense<0.000000e+00> : vector<8x384xf32>
    %415 = tpu.matmul %412, %414, %cst_142 {dimension_numbers = #tpu.dot_dimension_numbers<[1], [0], [0], [1], [0, 0, 1, 1], [], []>} : vector<8x32xbf16>, vector<32x384xbf16>, vector<8x384xf32> -> vector<8x384xf32>
    %416 = arith.addf %415, %48 : vector<8x384xf32>
    %c1_143 = arith.constant 1 : index
    %c0_144 = arith.constant 0 : index
    %c0_145 = arith.constant 0 : index
    %417 = vector.load %arg9[%c1_143, %c0_144, %c0_145] : memref<3x32x384xbf16, #tpu.memory_space<vmem>>, vector<1x32x384xbf16>
    %418 = vector.shape_cast %417 : vector<1x32x384xbf16> to vector<32x384xbf16>
    %419 = arith.truncf %343 : vector<8x32xf32> to vector<8x32xbf16>
    %cst_146 = arith.constant dense<0.000000e+00> : vector<8x384xf32>
    %420 = tpu.matmul %419, %418, %cst_146 {dimension_numbers = #tpu.dot_dimension_numbers<[1], [0], [0], [1], [0, 0, 1, 1], [], []>} : vector<8x32xbf16>, vector<32x384xbf16>, vector<8x384xf32> -> vector<8x384xf32>
    %421 = vector.extract_strided_slice %416 {offsets = [0, 0], sizes = [8, 32], strides = [1, 1]} : vector<8x384xf32> to vector<8x32xf32>
    %422 = vector.extract_strided_slice %420 {offsets = [0, 0], sizes = [8, 32], strides = [1, 1]} : vector<8x384xf32> to vector<8x32xf32>
    %423 = arith.addf %421, %422 : vector<8x32xf32>
    %424 = arith.negf %423 : vector<8x32xf32>
    %425 = math.exp %424 : vector<8x32xf32>
    %cst_147 = arith.constant 1.000000e+00 : f32
    %426 = vector.broadcast %cst_147 : f32 to vector<8x32xf32>
    %427 = arith.addf %426, %425 : vector<8x32xf32>
    %428 = arith.divf %426, %427 : vector<8x32xf32>
    %429 = vector.extract_strided_slice %416 {offsets = [0, 128], sizes = [8, 32], strides = [1, 1]} : vector<8x384xf32> to vector<8x32xf32>
    %430 = vector.extract_strided_slice %420 {offsets = [0, 128], sizes = [8, 32], strides = [1, 1]} : vector<8x384xf32> to vector<8x32xf32>
    %431 = arith.addf %429, %430 : vector<8x32xf32>
    %432 = arith.negf %431 : vector<8x32xf32>
    %433 = math.exp %432 : vector<8x32xf32>
    %cst_148 = arith.constant 1.000000e+00 : f32
    %434 = vector.broadcast %cst_148 : f32 to vector<8x32xf32>
    %435 = arith.addf %434, %433 : vector<8x32xf32>
    %436 = arith.divf %434, %435 : vector<8x32xf32>
    %437 = vector.extract_strided_slice %416 {offsets = [0, 256], sizes = [8, 32], strides = [1, 1]} : vector<8x384xf32> to vector<8x32xf32>
    %438 = vector.extract_strided_slice %420 {offsets = [0, 256], sizes = [8, 32], strides = [1, 1]} : vector<8x384xf32> to vector<8x32xf32>
    %439 = arith.addf %438, %60 : vector<8x32xf32>
    %440 = arith.mulf %428, %439 : vector<8x32xf32>
    %441 = arith.addf %437, %440 : vector<8x32xf32>
    %442 = math.tanh %441 : vector<8x32xf32>
    %cst_149 = arith.constant 1.000000e+00 : f32
    %443 = vector.broadcast %cst_149 : f32 to vector<8x32xf32>
    %444 = arith.subf %443, %436 : vector<8x32xf32>
    %445 = arith.mulf %444, %442 : vector<8x32xf32>
    %446 = arith.mulf %436, %343 : vector<8x32xf32>
    %447 = arith.addf %445, %446 : vector<8x32xf32>
    %448 = arith.truncf %447 : vector<8x32xf32> to vector<8x32xbf16>
    %c2_150 = arith.constant 2 : index
    %c0_151 = arith.constant 0 : index
    %c0_152 = arith.constant 0 : index
    %449 = vector.load %arg8[%c2_150, %c0_151, %c0_152] : memref<3x32x384xbf16, #tpu.memory_space<vmem>>, vector<1x32x384xbf16>
    %450 = vector.shape_cast %449 : vector<1x32x384xbf16> to vector<32x384xbf16>
    %cst_153 = arith.constant dense<0.000000e+00> : vector<8x384xf32>
    %451 = tpu.matmul %448, %450, %cst_153 {dimension_numbers = #tpu.dot_dimension_numbers<[1], [0], [0], [1], [0, 0, 1, 1], [], []>} : vector<8x32xbf16>, vector<32x384xbf16>, vector<8x384xf32> -> vector<8x384xf32>
    %452 = arith.addf %451, %52 : vector<8x384xf32>
    %c2_154 = arith.constant 2 : index
    %c0_155 = arith.constant 0 : index
    %c0_156 = arith.constant 0 : index
    %453 = vector.load %arg9[%c2_154, %c0_155, %c0_156] : memref<3x32x384xbf16, #tpu.memory_space<vmem>>, vector<1x32x384xbf16>
    %454 = vector.shape_cast %453 : vector<1x32x384xbf16> to vector<32x384xbf16>
    %455 = arith.truncf %379 : vector<8x32xf32> to vector<8x32xbf16>
    %cst_157 = arith.constant dense<0.000000e+00> : vector<8x384xf32>
    %456 = tpu.matmul %455, %454, %cst_157 {dimension_numbers = #tpu.dot_dimension_numbers<[1], [0], [0], [1], [0, 0, 1, 1], [], []>} : vector<8x32xbf16>, vector<32x384xbf16>, vector<8x384xf32> -> vector<8x384xf32>
    %457 = vector.extract_strided_slice %452 {offsets = [0, 0], sizes = [8, 32], strides = [1, 1]} : vector<8x384xf32> to vector<8x32xf32>
    %458 = vector.extract_strided_slice %456 {offsets = [0, 0], sizes = [8, 32], strides = [1, 1]} : vector<8x384xf32> to vector<8x32xf32>
    %459 = arith.addf %457, %458 : vector<8x32xf32>
    %460 = arith.negf %459 : vector<8x32xf32>
    %461 = math.exp %460 : vector<8x32xf32>
    %cst_158 = arith.constant 1.000000e+00 : f32
    %462 = vector.broadcast %cst_158 : f32 to vector<8x32xf32>
    %463 = arith.addf %462, %461 : vector<8x32xf32>
    %464 = arith.divf %462, %463 : vector<8x32xf32>
    %465 = vector.extract_strided_slice %452 {offsets = [0, 128], sizes = [8, 32], strides = [1, 1]} : vector<8x384xf32> to vector<8x32xf32>
    %466 = vector.extract_strided_slice %456 {offsets = [0, 128], sizes = [8, 32], strides = [1, 1]} : vector<8x384xf32> to vector<8x32xf32>
    %467 = arith.addf %465, %466 : vector<8x32xf32>
    %468 = arith.negf %467 : vector<8x32xf32>
    %469 = math.exp %468 : vector<8x32xf32>
    %cst_159 = arith.constant 1.000000e+00 : f32
    %470 = vector.broadcast %cst_159 : f32 to vector<8x32xf32>
    %471 = arith.addf %470, %469 : vector<8x32xf32>
    %472 = arith.divf %470, %471 : vector<8x32xf32>
    %473 = vector.extract_strided_slice %452 {offsets = [0, 256], sizes = [8, 32], strides = [1, 1]} : vector<8x384xf32> to vector<8x32xf32>
    %474 = vector.extract_strided_slice %456 {offsets = [0, 256], sizes = [8, 32], strides = [1, 1]} : vector<8x384xf32> to vector<8x32xf32>
    %475 = arith.addf %474, %64 : vector<8x32xf32>
    %476 = arith.mulf %464, %475 : vector<8x32xf32>
    %477 = arith.addf %473, %476 : vector<8x32xf32>
    %478 = math.tanh %477 : vector<8x32xf32>
    %cst_160 = arith.constant 1.000000e+00 : f32
    %479 = vector.broadcast %cst_160 : f32 to vector<8x32xf32>
    %480 = arith.subf %479, %472 : vector<8x32xf32>
    %481 = arith.mulf %480, %478 : vector<8x32xf32>
    %482 = arith.mulf %472, %379 : vector<8x32xf32>
    %483 = arith.addf %481, %482 : vector<8x32xf32>
    %484 = vector.extract_strided_slice %44 {offsets = [32, 0], sizes = [8, 384], strides = [1, 1]} : vector<64x384xf32> to vector<8x384xf32>
    %c0_161 = arith.constant 0 : index
    %c0_162 = arith.constant 0 : index
    %c0_163 = arith.constant 0 : index
    %485 = vector.load %arg9[%c0_161, %c0_162, %c0_163] : memref<3x32x384xbf16, #tpu.memory_space<vmem>>, vector<1x32x384xbf16>
    %486 = vector.shape_cast %485 : vector<1x32x384xbf16> to vector<32x384xbf16>
    %487 = arith.truncf %411 : vector<8x32xf32> to vector<8x32xbf16>
    %cst_164 = arith.constant dense<0.000000e+00> : vector<8x384xf32>
    %488 = tpu.matmul %487, %486, %cst_164 {dimension_numbers = #tpu.dot_dimension_numbers<[1], [0], [0], [1], [0, 0, 1, 1], [], []>} : vector<8x32xbf16>, vector<32x384xbf16>, vector<8x384xf32> -> vector<8x384xf32>
    %489 = vector.extract_strided_slice %484 {offsets = [0, 0], sizes = [8, 32], strides = [1, 1]} : vector<8x384xf32> to vector<8x32xf32>
    %490 = vector.extract_strided_slice %488 {offsets = [0, 0], sizes = [8, 32], strides = [1, 1]} : vector<8x384xf32> to vector<8x32xf32>
    %491 = arith.addf %489, %490 : vector<8x32xf32>
    %492 = arith.negf %491 : vector<8x32xf32>
    %493 = math.exp %492 : vector<8x32xf32>
    %cst_165 = arith.constant 1.000000e+00 : f32
    %494 = vector.broadcast %cst_165 : f32 to vector<8x32xf32>
    %495 = arith.addf %494, %493 : vector<8x32xf32>
    %496 = arith.divf %494, %495 : vector<8x32xf32>
    %497 = vector.extract_strided_slice %484 {offsets = [0, 128], sizes = [8, 32], strides = [1, 1]} : vector<8x384xf32> to vector<8x32xf32>
    %498 = vector.extract_strided_slice %488 {offsets = [0, 128], sizes = [8, 32], strides = [1, 1]} : vector<8x384xf32> to vector<8x32xf32>
    %499 = arith.addf %497, %498 : vector<8x32xf32>
    %500 = arith.negf %499 : vector<8x32xf32>
    %501 = math.exp %500 : vector<8x32xf32>
    %cst_166 = arith.constant 1.000000e+00 : f32
    %502 = vector.broadcast %cst_166 : f32 to vector<8x32xf32>
    %503 = arith.addf %502, %501 : vector<8x32xf32>
    %504 = arith.divf %502, %503 : vector<8x32xf32>
    %505 = vector.extract_strided_slice %484 {offsets = [0, 256], sizes = [8, 32], strides = [1, 1]} : vector<8x384xf32> to vector<8x32xf32>
    %506 = vector.extract_strided_slice %488 {offsets = [0, 256], sizes = [8, 32], strides = [1, 1]} : vector<8x384xf32> to vector<8x32xf32>
    %507 = arith.addf %506, %56 : vector<8x32xf32>
    %508 = arith.mulf %496, %507 : vector<8x32xf32>
    %509 = arith.addf %505, %508 : vector<8x32xf32>
    %510 = math.tanh %509 : vector<8x32xf32>
    %cst_167 = arith.constant 1.000000e+00 : f32
    %511 = vector.broadcast %cst_167 : f32 to vector<8x32xf32>
    %512 = arith.subf %511, %504 : vector<8x32xf32>
    %513 = arith.mulf %512, %510 : vector<8x32xf32>
    %514 = arith.mulf %504, %411 : vector<8x32xf32>
    %515 = arith.addf %513, %514 : vector<8x32xf32>
    %516 = arith.truncf %515 : vector<8x32xf32> to vector<8x32xbf16>
    %c1_168 = arith.constant 1 : index
    %c0_169 = arith.constant 0 : index
    %c0_170 = arith.constant 0 : index
    %517 = vector.load %arg8[%c1_168, %c0_169, %c0_170] : memref<3x32x384xbf16, #tpu.memory_space<vmem>>, vector<1x32x384xbf16>
    %518 = vector.shape_cast %517 : vector<1x32x384xbf16> to vector<32x384xbf16>
    %cst_171 = arith.constant dense<0.000000e+00> : vector<8x384xf32>
    %519 = tpu.matmul %516, %518, %cst_171 {dimension_numbers = #tpu.dot_dimension_numbers<[1], [0], [0], [1], [0, 0, 1, 1], [], []>} : vector<8x32xbf16>, vector<32x384xbf16>, vector<8x384xf32> -> vector<8x384xf32>
    %520 = arith.addf %519, %48 : vector<8x384xf32>
    %c1_172 = arith.constant 1 : index
    %c0_173 = arith.constant 0 : index
    %c0_174 = arith.constant 0 : index
    %521 = vector.load %arg9[%c1_172, %c0_173, %c0_174] : memref<3x32x384xbf16, #tpu.memory_space<vmem>>, vector<1x32x384xbf16>
    %522 = vector.shape_cast %521 : vector<1x32x384xbf16> to vector<32x384xbf16>
    %523 = arith.truncf %447 : vector<8x32xf32> to vector<8x32xbf16>
    %cst_175 = arith.constant dense<0.000000e+00> : vector<8x384xf32>
    %524 = tpu.matmul %523, %522, %cst_175 {dimension_numbers = #tpu.dot_dimension_numbers<[1], [0], [0], [1], [0, 0, 1, 1], [], []>} : vector<8x32xbf16>, vector<32x384xbf16>, vector<8x384xf32> -> vector<8x384xf32>
    %525 = vector.extract_strided_slice %520 {offsets = [0, 0], sizes = [8, 32], strides = [1, 1]} : vector<8x384xf32> to vector<8x32xf32>
    %526 = vector.extract_strided_slice %524 {offsets = [0, 0], sizes = [8, 32], strides = [1, 1]} : vector<8x384xf32> to vector<8x32xf32>
    %527 = arith.addf %525, %526 : vector<8x32xf32>
    %528 = arith.negf %527 : vector<8x32xf32>
    %529 = math.exp %528 : vector<8x32xf32>
    %cst_176 = arith.constant 1.000000e+00 : f32
    %530 = vector.broadcast %cst_176 : f32 to vector<8x32xf32>
    %531 = arith.addf %530, %529 : vector<8x32xf32>
    %532 = arith.divf %530, %531 : vector<8x32xf32>
    %533 = vector.extract_strided_slice %520 {offsets = [0, 128], sizes = [8, 32], strides = [1, 1]} : vector<8x384xf32> to vector<8x32xf32>
    %534 = vector.extract_strided_slice %524 {offsets = [0, 128], sizes = [8, 32], strides = [1, 1]} : vector<8x384xf32> to vector<8x32xf32>
    %535 = arith.addf %533, %534 : vector<8x32xf32>
    %536 = arith.negf %535 : vector<8x32xf32>
    %537 = math.exp %536 : vector<8x32xf32>
    %cst_177 = arith.constant 1.000000e+00 : f32
    %538 = vector.broadcast %cst_177 : f32 to vector<8x32xf32>
    %539 = arith.addf %538, %537 : vector<8x32xf32>
    %540 = arith.divf %538, %539 : vector<8x32xf32>
    %541 = vector.extract_strided_slice %520 {offsets = [0, 256], sizes = [8, 32], strides = [1, 1]} : vector<8x384xf32> to vector<8x32xf32>
    %542 = vector.extract_strided_slice %524 {offsets = [0, 256], sizes = [8, 32], strides = [1, 1]} : vector<8x384xf32> to vector<8x32xf32>
    %543 = arith.addf %542, %60 : vector<8x32xf32>
    %544 = arith.mulf %532, %543 : vector<8x32xf32>
    %545 = arith.addf %541, %544 : vector<8x32xf32>
    %546 = math.tanh %545 : vector<8x32xf32>
    %cst_178 = arith.constant 1.000000e+00 : f32
    %547 = vector.broadcast %cst_178 : f32 to vector<8x32xf32>
    %548 = arith.subf %547, %540 : vector<8x32xf32>
    %549 = arith.mulf %548, %546 : vector<8x32xf32>
    %550 = arith.mulf %540, %447 : vector<8x32xf32>
    %551 = arith.addf %549, %550 : vector<8x32xf32>
    %552 = arith.truncf %551 : vector<8x32xf32> to vector<8x32xbf16>
    %c2_179 = arith.constant 2 : index
    %c0_180 = arith.constant 0 : index
    %c0_181 = arith.constant 0 : index
    %553 = vector.load %arg8[%c2_179, %c0_180, %c0_181] : memref<3x32x384xbf16, #tpu.memory_space<vmem>>, vector<1x32x384xbf16>
    %554 = vector.shape_cast %553 : vector<1x32x384xbf16> to vector<32x384xbf16>
    %cst_182 = arith.constant dense<0.000000e+00> : vector<8x384xf32>
    %555 = tpu.matmul %552, %554, %cst_182 {dimension_numbers = #tpu.dot_dimension_numbers<[1], [0], [0], [1], [0, 0, 1, 1], [], []>} : vector<8x32xbf16>, vector<32x384xbf16>, vector<8x384xf32> -> vector<8x384xf32>
    %556 = arith.addf %555, %52 : vector<8x384xf32>
    %c2_183 = arith.constant 2 : index
    %c0_184 = arith.constant 0 : index
    %c0_185 = arith.constant 0 : index
    %557 = vector.load %arg9[%c2_183, %c0_184, %c0_185] : memref<3x32x384xbf16, #tpu.memory_space<vmem>>, vector<1x32x384xbf16>
    %558 = vector.shape_cast %557 : vector<1x32x384xbf16> to vector<32x384xbf16>
    %559 = arith.truncf %483 : vector<8x32xf32> to vector<8x32xbf16>
    %cst_186 = arith.constant dense<0.000000e+00> : vector<8x384xf32>
    %560 = tpu.matmul %559, %558, %cst_186 {dimension_numbers = #tpu.dot_dimension_numbers<[1], [0], [0], [1], [0, 0, 1, 1], [], []>} : vector<8x32xbf16>, vector<32x384xbf16>, vector<8x384xf32> -> vector<8x384xf32>
    %561 = vector.extract_strided_slice %556 {offsets = [0, 0], sizes = [8, 32], strides = [1, 1]} : vector<8x384xf32> to vector<8x32xf32>
    %562 = vector.extract_strided_slice %560 {offsets = [0, 0], sizes = [8, 32], strides = [1, 1]} : vector<8x384xf32> to vector<8x32xf32>
    %563 = arith.addf %561, %562 : vector<8x32xf32>
    %564 = arith.negf %563 : vector<8x32xf32>
    %565 = math.exp %564 : vector<8x32xf32>
    %cst_187 = arith.constant 1.000000e+00 : f32
    %566 = vector.broadcast %cst_187 : f32 to vector<8x32xf32>
    %567 = arith.addf %566, %565 : vector<8x32xf32>
    %568 = arith.divf %566, %567 : vector<8x32xf32>
    %569 = vector.extract_strided_slice %556 {offsets = [0, 128], sizes = [8, 32], strides = [1, 1]} : vector<8x384xf32> to vector<8x32xf32>
    %570 = vector.extract_strided_slice %560 {offsets = [0, 128], sizes = [8, 32], strides = [1, 1]} : vector<8x384xf32> to vector<8x32xf32>
    %571 = arith.addf %569, %570 : vector<8x32xf32>
    %572 = arith.negf %571 : vector<8x32xf32>
    %573 = math.exp %572 : vector<8x32xf32>
    %cst_188 = arith.constant 1.000000e+00 : f32
    %574 = vector.broadcast %cst_188 : f32 to vector<8x32xf32>
    %575 = arith.addf %574, %573 : vector<8x32xf32>
    %576 = arith.divf %574, %575 : vector<8x32xf32>
    %577 = vector.extract_strided_slice %556 {offsets = [0, 256], sizes = [8, 32], strides = [1, 1]} : vector<8x384xf32> to vector<8x32xf32>
    %578 = vector.extract_strided_slice %560 {offsets = [0, 256], sizes = [8, 32], strides = [1, 1]} : vector<8x384xf32> to vector<8x32xf32>
    %579 = arith.addf %578, %64 : vector<8x32xf32>
    %580 = arith.mulf %568, %579 : vector<8x32xf32>
    %581 = arith.addf %577, %580 : vector<8x32xf32>
    %582 = math.tanh %581 : vector<8x32xf32>
    %cst_189 = arith.constant 1.000000e+00 : f32
    %583 = vector.broadcast %cst_189 : f32 to vector<8x32xf32>
    %584 = arith.subf %583, %576 : vector<8x32xf32>
    %585 = arith.mulf %584, %582 : vector<8x32xf32>
    %586 = arith.mulf %576, %483 : vector<8x32xf32>
    %587 = arith.addf %585, %586 : vector<8x32xf32>
    %588 = vector.extract_strided_slice %44 {offsets = [40, 0], sizes = [8, 384], strides = [1, 1]} : vector<64x384xf32> to vector<8x384xf32>
    %c0_190 = arith.constant 0 : index
    %c0_191 = arith.constant 0 : index
    %c0_192 = arith.constant 0 : index
    %589 = vector.load %arg9[%c0_190, %c0_191, %c0_192] : memref<3x32x384xbf16, #tpu.memory_space<vmem>>, vector<1x32x384xbf16>
    %590 = vector.shape_cast %589 : vector<1x32x384xbf16> to vector<32x384xbf16>
    %591 = arith.truncf %515 : vector<8x32xf32> to vector<8x32xbf16>
    %cst_193 = arith.constant dense<0.000000e+00> : vector<8x384xf32>
    %592 = tpu.matmul %591, %590, %cst_193 {dimension_numbers = #tpu.dot_dimension_numbers<[1], [0], [0], [1], [0, 0, 1, 1], [], []>} : vector<8x32xbf16>, vector<32x384xbf16>, vector<8x384xf32> -> vector<8x384xf32>
    %593 = vector.extract_strided_slice %588 {offsets = [0, 0], sizes = [8, 32], strides = [1, 1]} : vector<8x384xf32> to vector<8x32xf32>
    %594 = vector.extract_strided_slice %592 {offsets = [0, 0], sizes = [8, 32], strides = [1, 1]} : vector<8x384xf32> to vector<8x32xf32>
    %595 = arith.addf %593, %594 : vector<8x32xf32>
    %596 = arith.negf %595 : vector<8x32xf32>
    %597 = math.exp %596 : vector<8x32xf32>
    %cst_194 = arith.constant 1.000000e+00 : f32
    %598 = vector.broadcast %cst_194 : f32 to vector<8x32xf32>
    %599 = arith.addf %598, %597 : vector<8x32xf32>
    %600 = arith.divf %598, %599 : vector<8x32xf32>
    %601 = vector.extract_strided_slice %588 {offsets = [0, 128], sizes = [8, 32], strides = [1, 1]} : vector<8x384xf32> to vector<8x32xf32>
    %602 = vector.extract_strided_slice %592 {offsets = [0, 128], sizes = [8, 32], strides = [1, 1]} : vector<8x384xf32> to vector<8x32xf32>
    %603 = arith.addf %601, %602 : vector<8x32xf32>
    %604 = arith.negf %603 : vector<8x32xf32>
    %605 = math.exp %604 : vector<8x32xf32>
    %cst_195 = arith.constant 1.000000e+00 : f32
    %606 = vector.broadcast %cst_195 : f32 to vector<8x32xf32>
    %607 = arith.addf %606, %605 : vector<8x32xf32>
    %608 = arith.divf %606, %607 : vector<8x32xf32>
    %609 = vector.extract_strided_slice %588 {offsets = [0, 256], sizes = [8, 32], strides = [1, 1]} : vector<8x384xf32> to vector<8x32xf32>
    %610 = vector.extract_strided_slice %592 {offsets = [0, 256], sizes = [8, 32], strides = [1, 1]} : vector<8x384xf32> to vector<8x32xf32>
    %611 = arith.addf %610, %56 : vector<8x32xf32>
    %612 = arith.mulf %600, %611 : vector<8x32xf32>
    %613 = arith.addf %609, %612 : vector<8x32xf32>
    %614 = math.tanh %613 : vector<8x32xf32>
    %cst_196 = arith.constant 1.000000e+00 : f32
    %615 = vector.broadcast %cst_196 : f32 to vector<8x32xf32>
    %616 = arith.subf %615, %608 : vector<8x32xf32>
    %617 = arith.mulf %616, %614 : vector<8x32xf32>
    %618 = arith.mulf %608, %515 : vector<8x32xf32>
    %619 = arith.addf %617, %618 : vector<8x32xf32>
    %620 = arith.truncf %619 : vector<8x32xf32> to vector<8x32xbf16>
    %c1_197 = arith.constant 1 : index
    %c0_198 = arith.constant 0 : index
    %c0_199 = arith.constant 0 : index
    %621 = vector.load %arg8[%c1_197, %c0_198, %c0_199] : memref<3x32x384xbf16, #tpu.memory_space<vmem>>, vector<1x32x384xbf16>
    %622 = vector.shape_cast %621 : vector<1x32x384xbf16> to vector<32x384xbf16>
    %cst_200 = arith.constant dense<0.000000e+00> : vector<8x384xf32>
    %623 = tpu.matmul %620, %622, %cst_200 {dimension_numbers = #tpu.dot_dimension_numbers<[1], [0], [0], [1], [0, 0, 1, 1], [], []>} : vector<8x32xbf16>, vector<32x384xbf16>, vector<8x384xf32> -> vector<8x384xf32>
    %624 = arith.addf %623, %48 : vector<8x384xf32>
    %c1_201 = arith.constant 1 : index
    %c0_202 = arith.constant 0 : index
    %c0_203 = arith.constant 0 : index
    %625 = vector.load %arg9[%c1_201, %c0_202, %c0_203] : memref<3x32x384xbf16, #tpu.memory_space<vmem>>, vector<1x32x384xbf16>
    %626 = vector.shape_cast %625 : vector<1x32x384xbf16> to vector<32x384xbf16>
    %627 = arith.truncf %551 : vector<8x32xf32> to vector<8x32xbf16>
    %cst_204 = arith.constant dense<0.000000e+00> : vector<8x384xf32>
    %628 = tpu.matmul %627, %626, %cst_204 {dimension_numbers = #tpu.dot_dimension_numbers<[1], [0], [0], [1], [0, 0, 1, 1], [], []>} : vector<8x32xbf16>, vector<32x384xbf16>, vector<8x384xf32> -> vector<8x384xf32>
    %629 = vector.extract_strided_slice %624 {offsets = [0, 0], sizes = [8, 32], strides = [1, 1]} : vector<8x384xf32> to vector<8x32xf32>
    %630 = vector.extract_strided_slice %628 {offsets = [0, 0], sizes = [8, 32], strides = [1, 1]} : vector<8x384xf32> to vector<8x32xf32>
    %631 = arith.addf %629, %630 : vector<8x32xf32>
    %632 = arith.negf %631 : vector<8x32xf32>
    %633 = math.exp %632 : vector<8x32xf32>
    %cst_205 = arith.constant 1.000000e+00 : f32
    %634 = vector.broadcast %cst_205 : f32 to vector<8x32xf32>
    %635 = arith.addf %634, %633 : vector<8x32xf32>
    %636 = arith.divf %634, %635 : vector<8x32xf32>
    %637 = vector.extract_strided_slice %624 {offsets = [0, 128], sizes = [8, 32], strides = [1, 1]} : vector<8x384xf32> to vector<8x32xf32>
    %638 = vector.extract_strided_slice %628 {offsets = [0, 128], sizes = [8, 32], strides = [1, 1]} : vector<8x384xf32> to vector<8x32xf32>
    %639 = arith.addf %637, %638 : vector<8x32xf32>
    %640 = arith.negf %639 : vector<8x32xf32>
    %641 = math.exp %640 : vector<8x32xf32>
    %cst_206 = arith.constant 1.000000e+00 : f32
    %642 = vector.broadcast %cst_206 : f32 to vector<8x32xf32>
    %643 = arith.addf %642, %641 : vector<8x32xf32>
    %644 = arith.divf %642, %643 : vector<8x32xf32>
    %645 = vector.extract_strided_slice %624 {offsets = [0, 256], sizes = [8, 32], strides = [1, 1]} : vector<8x384xf32> to vector<8x32xf32>
    %646 = vector.extract_strided_slice %628 {offsets = [0, 256], sizes = [8, 32], strides = [1, 1]} : vector<8x384xf32> to vector<8x32xf32>
    %647 = arith.addf %646, %60 : vector<8x32xf32>
    %648 = arith.mulf %636, %647 : vector<8x32xf32>
    %649 = arith.addf %645, %648 : vector<8x32xf32>
    %650 = math.tanh %649 : vector<8x32xf32>
    %cst_207 = arith.constant 1.000000e+00 : f32
    %651 = vector.broadcast %cst_207 : f32 to vector<8x32xf32>
    %652 = arith.subf %651, %644 : vector<8x32xf32>
    %653 = arith.mulf %652, %650 : vector<8x32xf32>
    %654 = arith.mulf %644, %551 : vector<8x32xf32>
    %655 = arith.addf %653, %654 : vector<8x32xf32>
    %656 = arith.truncf %655 : vector<8x32xf32> to vector<8x32xbf16>
    %c2_208 = arith.constant 2 : index
    %c0_209 = arith.constant 0 : index
    %c0_210 = arith.constant 0 : index
    %657 = vector.load %arg8[%c2_208, %c0_209, %c0_210] : memref<3x32x384xbf16, #tpu.memory_space<vmem>>, vector<1x32x384xbf16>
    %658 = vector.shape_cast %657 : vector<1x32x384xbf16> to vector<32x384xbf16>
    %cst_211 = arith.constant dense<0.000000e+00> : vector<8x384xf32>
    %659 = tpu.matmul %656, %658, %cst_211 {dimension_numbers = #tpu.dot_dimension_numbers<[1], [0], [0], [1], [0, 0, 1, 1], [], []>} : vector<8x32xbf16>, vector<32x384xbf16>, vector<8x384xf32> -> vector<8x384xf32>
    %660 = arith.addf %659, %52 : vector<8x384xf32>
    %c2_212 = arith.constant 2 : index
    %c0_213 = arith.constant 0 : index
    %c0_214 = arith.constant 0 : index
    %661 = vector.load %arg9[%c2_212, %c0_213, %c0_214] : memref<3x32x384xbf16, #tpu.memory_space<vmem>>, vector<1x32x384xbf16>
    %662 = vector.shape_cast %661 : vector<1x32x384xbf16> to vector<32x384xbf16>
    %663 = arith.truncf %587 : vector<8x32xf32> to vector<8x32xbf16>
    %cst_215 = arith.constant dense<0.000000e+00> : vector<8x384xf32>
    %664 = tpu.matmul %663, %662, %cst_215 {dimension_numbers = #tpu.dot_dimension_numbers<[1], [0], [0], [1], [0, 0, 1, 1], [], []>} : vector<8x32xbf16>, vector<32x384xbf16>, vector<8x384xf32> -> vector<8x384xf32>
    %665 = vector.extract_strided_slice %660 {offsets = [0, 0], sizes = [8, 32], strides = [1, 1]} : vector<8x384xf32> to vector<8x32xf32>
    %666 = vector.extract_strided_slice %664 {offsets = [0, 0], sizes = [8, 32], strides = [1, 1]} : vector<8x384xf32> to vector<8x32xf32>
    %667 = arith.addf %665, %666 : vector<8x32xf32>
    %668 = arith.negf %667 : vector<8x32xf32>
    %669 = math.exp %668 : vector<8x32xf32>
    %cst_216 = arith.constant 1.000000e+00 : f32
    %670 = vector.broadcast %cst_216 : f32 to vector<8x32xf32>
    %671 = arith.addf %670, %669 : vector<8x32xf32>
    %672 = arith.divf %670, %671 : vector<8x32xf32>
    %673 = vector.extract_strided_slice %660 {offsets = [0, 128], sizes = [8, 32], strides = [1, 1]} : vector<8x384xf32> to vector<8x32xf32>
    %674 = vector.extract_strided_slice %664 {offsets = [0, 128], sizes = [8, 32], strides = [1, 1]} : vector<8x384xf32> to vector<8x32xf32>
    %675 = arith.addf %673, %674 : vector<8x32xf32>
    %676 = arith.negf %675 : vector<8x32xf32>
    %677 = math.exp %676 : vector<8x32xf32>
    %cst_217 = arith.constant 1.000000e+00 : f32
    %678 = vector.broadcast %cst_217 : f32 to vector<8x32xf32>
    %679 = arith.addf %678, %677 : vector<8x32xf32>
    %680 = arith.divf %678, %679 : vector<8x32xf32>
    %681 = vector.extract_strided_slice %660 {offsets = [0, 256], sizes = [8, 32], strides = [1, 1]} : vector<8x384xf32> to vector<8x32xf32>
    %682 = vector.extract_strided_slice %664 {offsets = [0, 256], sizes = [8, 32], strides = [1, 1]} : vector<8x384xf32> to vector<8x32xf32>
    %683 = arith.addf %682, %64 : vector<8x32xf32>
    %684 = arith.mulf %672, %683 : vector<8x32xf32>
    %685 = arith.addf %681, %684 : vector<8x32xf32>
    %686 = math.tanh %685 : vector<8x32xf32>
    %cst_218 = arith.constant 1.000000e+00 : f32
    %687 = vector.broadcast %cst_218 : f32 to vector<8x32xf32>
    %688 = arith.subf %687, %680 : vector<8x32xf32>
    %689 = arith.mulf %688, %686 : vector<8x32xf32>
    %690 = arith.mulf %680, %587 : vector<8x32xf32>
    %691 = arith.addf %689, %690 : vector<8x32xf32>
    %692 = vector.extract_strided_slice %44 {offsets = [48, 0], sizes = [8, 384], strides = [1, 1]} : vector<64x384xf32> to vector<8x384xf32>
    %c0_219 = arith.constant 0 : index
    %c0_220 = arith.constant 0 : index
    %c0_221 = arith.constant 0 : index
    %693 = vector.load %arg9[%c0_219, %c0_220, %c0_221] : memref<3x32x384xbf16, #tpu.memory_space<vmem>>, vector<1x32x384xbf16>
    %694 = vector.shape_cast %693 : vector<1x32x384xbf16> to vector<32x384xbf16>
    %695 = arith.truncf %619 : vector<8x32xf32> to vector<8x32xbf16>
    %cst_222 = arith.constant dense<0.000000e+00> : vector<8x384xf32>
    %696 = tpu.matmul %695, %694, %cst_222 {dimension_numbers = #tpu.dot_dimension_numbers<[1], [0], [0], [1], [0, 0, 1, 1], [], []>} : vector<8x32xbf16>, vector<32x384xbf16>, vector<8x384xf32> -> vector<8x384xf32>
    %697 = vector.extract_strided_slice %692 {offsets = [0, 0], sizes = [8, 32], strides = [1, 1]} : vector<8x384xf32> to vector<8x32xf32>
    %698 = vector.extract_strided_slice %696 {offsets = [0, 0], sizes = [8, 32], strides = [1, 1]} : vector<8x384xf32> to vector<8x32xf32>
    %699 = arith.addf %697, %698 : vector<8x32xf32>
    %700 = arith.negf %699 : vector<8x32xf32>
    %701 = math.exp %700 : vector<8x32xf32>
    %cst_223 = arith.constant 1.000000e+00 : f32
    %702 = vector.broadcast %cst_223 : f32 to vector<8x32xf32>
    %703 = arith.addf %702, %701 : vector<8x32xf32>
    %704 = arith.divf %702, %703 : vector<8x32xf32>
    %705 = vector.extract_strided_slice %692 {offsets = [0, 128], sizes = [8, 32], strides = [1, 1]} : vector<8x384xf32> to vector<8x32xf32>
    %706 = vector.extract_strided_slice %696 {offsets = [0, 128], sizes = [8, 32], strides = [1, 1]} : vector<8x384xf32> to vector<8x32xf32>
    %707 = arith.addf %705, %706 : vector<8x32xf32>
    %708 = arith.negf %707 : vector<8x32xf32>
    %709 = math.exp %708 : vector<8x32xf32>
    %cst_224 = arith.constant 1.000000e+00 : f32
    %710 = vector.broadcast %cst_224 : f32 to vector<8x32xf32>
    %711 = arith.addf %710, %709 : vector<8x32xf32>
    %712 = arith.divf %710, %711 : vector<8x32xf32>
    %713 = vector.extract_strided_slice %692 {offsets = [0, 256], sizes = [8, 32], strides = [1, 1]} : vector<8x384xf32> to vector<8x32xf32>
    %714 = vector.extract_strided_slice %696 {offsets = [0, 256], sizes = [8, 32], strides = [1, 1]} : vector<8x384xf32> to vector<8x32xf32>
    %715 = arith.addf %714, %56 : vector<8x32xf32>
    %716 = arith.mulf %704, %715 : vector<8x32xf32>
    %717 = arith.addf %713, %716 : vector<8x32xf32>
    %718 = math.tanh %717 : vector<8x32xf32>
    %cst_225 = arith.constant 1.000000e+00 : f32
    %719 = vector.broadcast %cst_225 : f32 to vector<8x32xf32>
    %720 = arith.subf %719, %712 : vector<8x32xf32>
    %721 = arith.mulf %720, %718 : vector<8x32xf32>
    %722 = arith.mulf %712, %619 : vector<8x32xf32>
    %723 = arith.addf %721, %722 : vector<8x32xf32>
    %724 = arith.truncf %723 : vector<8x32xf32> to vector<8x32xbf16>
    %c1_226 = arith.constant 1 : index
    %c0_227 = arith.constant 0 : index
    %c0_228 = arith.constant 0 : index
    %725 = vector.load %arg8[%c1_226, %c0_227, %c0_228] : memref<3x32x384xbf16, #tpu.memory_space<vmem>>, vector<1x32x384xbf16>
    %726 = vector.shape_cast %725 : vector<1x32x384xbf16> to vector<32x384xbf16>
    %cst_229 = arith.constant dense<0.000000e+00> : vector<8x384xf32>
    %727 = tpu.matmul %724, %726, %cst_229 {dimension_numbers = #tpu.dot_dimension_numbers<[1], [0], [0], [1], [0, 0, 1, 1], [], []>} : vector<8x32xbf16>, vector<32x384xbf16>, vector<8x384xf32> -> vector<8x384xf32>
    %728 = arith.addf %727, %48 : vector<8x384xf32>
    %c1_230 = arith.constant 1 : index
    %c0_231 = arith.constant 0 : index
    %c0_232 = arith.constant 0 : index
    %729 = vector.load %arg9[%c1_230, %c0_231, %c0_232] : memref<3x32x384xbf16, #tpu.memory_space<vmem>>, vector<1x32x384xbf16>
    %730 = vector.shape_cast %729 : vector<1x32x384xbf16> to vector<32x384xbf16>
    %731 = arith.truncf %655 : vector<8x32xf32> to vector<8x32xbf16>
    %cst_233 = arith.constant dense<0.000000e+00> : vector<8x384xf32>
    %732 = tpu.matmul %731, %730, %cst_233 {dimension_numbers = #tpu.dot_dimension_numbers<[1], [0], [0], [1], [0, 0, 1, 1], [], []>} : vector<8x32xbf16>, vector<32x384xbf16>, vector<8x384xf32> -> vector<8x384xf32>
    %733 = vector.extract_strided_slice %728 {offsets = [0, 0], sizes = [8, 32], strides = [1, 1]} : vector<8x384xf32> to vector<8x32xf32>
    %734 = vector.extract_strided_slice %732 {offsets = [0, 0], sizes = [8, 32], strides = [1, 1]} : vector<8x384xf32> to vector<8x32xf32>
    %735 = arith.addf %733, %734 : vector<8x32xf32>
    %736 = arith.negf %735 : vector<8x32xf32>
    %737 = math.exp %736 : vector<8x32xf32>
    %cst_234 = arith.constant 1.000000e+00 : f32
    %738 = vector.broadcast %cst_234 : f32 to vector<8x32xf32>
    %739 = arith.addf %738, %737 : vector<8x32xf32>
    %740 = arith.divf %738, %739 : vector<8x32xf32>
    %741 = vector.extract_strided_slice %728 {offsets = [0, 128], sizes = [8, 32], strides = [1, 1]} : vector<8x384xf32> to vector<8x32xf32>
    %742 = vector.extract_strided_slice %732 {offsets = [0, 128], sizes = [8, 32], strides = [1, 1]} : vector<8x384xf32> to vector<8x32xf32>
    %743 = arith.addf %741, %742 : vector<8x32xf32>
    %744 = arith.negf %743 : vector<8x32xf32>
    %745 = math.exp %744 : vector<8x32xf32>
    %cst_235 = arith.constant 1.000000e+00 : f32
    %746 = vector.broadcast %cst_235 : f32 to vector<8x32xf32>
    %747 = arith.addf %746, %745 : vector<8x32xf32>
    %748 = arith.divf %746, %747 : vector<8x32xf32>
    %749 = vector.extract_strided_slice %728 {offsets = [0, 256], sizes = [8, 32], strides = [1, 1]} : vector<8x384xf32> to vector<8x32xf32>
    %750 = vector.extract_strided_slice %732 {offsets = [0, 256], sizes = [8, 32], strides = [1, 1]} : vector<8x384xf32> to vector<8x32xf32>
    %751 = arith.addf %750, %60 : vector<8x32xf32>
    %752 = arith.mulf %740, %751 : vector<8x32xf32>
    %753 = arith.addf %749, %752 : vector<8x32xf32>
    %754 = math.tanh %753 : vector<8x32xf32>
    %cst_236 = arith.constant 1.000000e+00 : f32
    %755 = vector.broadcast %cst_236 : f32 to vector<8x32xf32>
    %756 = arith.subf %755, %748 : vector<8x32xf32>
    %757 = arith.mulf %756, %754 : vector<8x32xf32>
    %758 = arith.mulf %748, %655 : vector<8x32xf32>
    %759 = arith.addf %757, %758 : vector<8x32xf32>
    %760 = arith.truncf %759 : vector<8x32xf32> to vector<8x32xbf16>
    %c2_237 = arith.constant 2 : index
    %c0_238 = arith.constant 0 : index
    %c0_239 = arith.constant 0 : index
    %761 = vector.load %arg8[%c2_237, %c0_238, %c0_239] : memref<3x32x384xbf16, #tpu.memory_space<vmem>>, vector<1x32x384xbf16>
    %762 = vector.shape_cast %761 : vector<1x32x384xbf16> to vector<32x384xbf16>
    %cst_240 = arith.constant dense<0.000000e+00> : vector<8x384xf32>
    %763 = tpu.matmul %760, %762, %cst_240 {dimension_numbers = #tpu.dot_dimension_numbers<[1], [0], [0], [1], [0, 0, 1, 1], [], []>} : vector<8x32xbf16>, vector<32x384xbf16>, vector<8x384xf32> -> vector<8x384xf32>
    %764 = arith.addf %763, %52 : vector<8x384xf32>
    %c2_241 = arith.constant 2 : index
    %c0_242 = arith.constant 0 : index
    %c0_243 = arith.constant 0 : index
    %765 = vector.load %arg9[%c2_241, %c0_242, %c0_243] : memref<3x32x384xbf16, #tpu.memory_space<vmem>>, vector<1x32x384xbf16>
    %766 = vector.shape_cast %765 : vector<1x32x384xbf16> to vector<32x384xbf16>
    %767 = arith.truncf %691 : vector<8x32xf32> to vector<8x32xbf16>
    %cst_244 = arith.constant dense<0.000000e+00> : vector<8x384xf32>
    %768 = tpu.matmul %767, %766, %cst_244 {dimension_numbers = #tpu.dot_dimension_numbers<[1], [0], [0], [1], [0, 0, 1, 1], [], []>} : vector<8x32xbf16>, vector<32x384xbf16>, vector<8x384xf32> -> vector<8x384xf32>
    %769 = vector.extract_strided_slice %764 {offsets = [0, 0], sizes = [8, 32], strides = [1, 1]} : vector<8x384xf32> to vector<8x32xf32>
    %770 = vector.extract_strided_slice %768 {offsets = [0, 0], sizes = [8, 32], strides = [1, 1]} : vector<8x384xf32> to vector<8x32xf32>
    %771 = arith.addf %769, %770 : vector<8x32xf32>
    %772 = arith.negf %771 : vector<8x32xf32>
    %773 = math.exp %772 : vector<8x32xf32>
    %cst_245 = arith.constant 1.000000e+00 : f32
    %774 = vector.broadcast %cst_245 : f32 to vector<8x32xf32>
    %775 = arith.addf %774, %773 : vector<8x32xf32>
    %776 = arith.divf %774, %775 : vector<8x32xf32>
    %777 = vector.extract_strided_slice %764 {offsets = [0, 128], sizes = [8, 32], strides = [1, 1]} : vector<8x384xf32> to vector<8x32xf32>
    %778 = vector.extract_strided_slice %768 {offsets = [0, 128], sizes = [8, 32], strides = [1, 1]} : vector<8x384xf32> to vector<8x32xf32>
    %779 = arith.addf %777, %778 : vector<8x32xf32>
    %780 = arith.negf %779 : vector<8x32xf32>
    %781 = math.exp %780 : vector<8x32xf32>
    %cst_246 = arith.constant 1.000000e+00 : f32
    %782 = vector.broadcast %cst_246 : f32 to vector<8x32xf32>
    %783 = arith.addf %782, %781 : vector<8x32xf32>
    %784 = arith.divf %782, %783 : vector<8x32xf32>
    %785 = vector.extract_strided_slice %764 {offsets = [0, 256], sizes = [8, 32], strides = [1, 1]} : vector<8x384xf32> to vector<8x32xf32>
    %786 = vector.extract_strided_slice %768 {offsets = [0, 256], sizes = [8, 32], strides = [1, 1]} : vector<8x384xf32> to vector<8x32xf32>
    %787 = arith.addf %786, %64 : vector<8x32xf32>
    %788 = arith.mulf %776, %787 : vector<8x32xf32>
    %789 = arith.addf %785, %788 : vector<8x32xf32>
    %790 = math.tanh %789 : vector<8x32xf32>
    %cst_247 = arith.constant 1.000000e+00 : f32
    %791 = vector.broadcast %cst_247 : f32 to vector<8x32xf32>
    %792 = arith.subf %791, %784 : vector<8x32xf32>
    %793 = arith.mulf %792, %790 : vector<8x32xf32>
    %794 = arith.mulf %784, %691 : vector<8x32xf32>
    %795 = arith.addf %793, %794 : vector<8x32xf32>
    %796 = vector.extract_strided_slice %44 {offsets = [56, 0], sizes = [8, 384], strides = [1, 1]} : vector<64x384xf32> to vector<8x384xf32>
    %c0_248 = arith.constant 0 : index
    %c0_249 = arith.constant 0 : index
    %c0_250 = arith.constant 0 : index
    %797 = vector.load %arg9[%c0_248, %c0_249, %c0_250] : memref<3x32x384xbf16, #tpu.memory_space<vmem>>, vector<1x32x384xbf16>
    %798 = vector.shape_cast %797 : vector<1x32x384xbf16> to vector<32x384xbf16>
    %799 = arith.truncf %723 : vector<8x32xf32> to vector<8x32xbf16>
    %cst_251 = arith.constant dense<0.000000e+00> : vector<8x384xf32>
    %800 = tpu.matmul %799, %798, %cst_251 {dimension_numbers = #tpu.dot_dimension_numbers<[1], [0], [0], [1], [0, 0, 1, 1], [], []>} : vector<8x32xbf16>, vector<32x384xbf16>, vector<8x384xf32> -> vector<8x384xf32>
    %801 = vector.extract_strided_slice %796 {offsets = [0, 0], sizes = [8, 32], strides = [1, 1]} : vector<8x384xf32> to vector<8x32xf32>
    %802 = vector.extract_strided_slice %800 {offsets = [0, 0], sizes = [8, 32], strides = [1, 1]} : vector<8x384xf32> to vector<8x32xf32>
    %803 = arith.addf %801, %802 : vector<8x32xf32>
    %804 = arith.negf %803 : vector<8x32xf32>
    %805 = math.exp %804 : vector<8x32xf32>
    %cst_252 = arith.constant 1.000000e+00 : f32
    %806 = vector.broadcast %cst_252 : f32 to vector<8x32xf32>
    %807 = arith.addf %806, %805 : vector<8x32xf32>
    %808 = arith.divf %806, %807 : vector<8x32xf32>
    %809 = vector.extract_strided_slice %796 {offsets = [0, 128], sizes = [8, 32], strides = [1, 1]} : vector<8x384xf32> to vector<8x32xf32>
    %810 = vector.extract_strided_slice %800 {offsets = [0, 128], sizes = [8, 32], strides = [1, 1]} : vector<8x384xf32> to vector<8x32xf32>
    %811 = arith.addf %809, %810 : vector<8x32xf32>
    %812 = arith.negf %811 : vector<8x32xf32>
    %813 = math.exp %812 : vector<8x32xf32>
    %cst_253 = arith.constant 1.000000e+00 : f32
    %814 = vector.broadcast %cst_253 : f32 to vector<8x32xf32>
    %815 = arith.addf %814, %813 : vector<8x32xf32>
    %816 = arith.divf %814, %815 : vector<8x32xf32>
    %817 = vector.extract_strided_slice %796 {offsets = [0, 256], sizes = [8, 32], strides = [1, 1]} : vector<8x384xf32> to vector<8x32xf32>
    %818 = vector.extract_strided_slice %800 {offsets = [0, 256], sizes = [8, 32], strides = [1, 1]} : vector<8x384xf32> to vector<8x32xf32>
    %819 = arith.addf %818, %56 : vector<8x32xf32>
    %820 = arith.mulf %808, %819 : vector<8x32xf32>
    %821 = arith.addf %817, %820 : vector<8x32xf32>
    %822 = math.tanh %821 : vector<8x32xf32>
    %cst_254 = arith.constant 1.000000e+00 : f32
    %823 = vector.broadcast %cst_254 : f32 to vector<8x32xf32>
    %824 = arith.subf %823, %816 : vector<8x32xf32>
    %825 = arith.mulf %824, %822 : vector<8x32xf32>
    %826 = arith.mulf %816, %723 : vector<8x32xf32>
    %827 = arith.addf %825, %826 : vector<8x32xf32>
    %828 = arith.truncf %827 : vector<8x32xf32> to vector<8x32xbf16>
    %c1_255 = arith.constant 1 : index
    %c0_256 = arith.constant 0 : index
    %c0_257 = arith.constant 0 : index
    %829 = vector.load %arg8[%c1_255, %c0_256, %c0_257] : memref<3x32x384xbf16, #tpu.memory_space<vmem>>, vector<1x32x384xbf16>
    %830 = vector.shape_cast %829 : vector<1x32x384xbf16> to vector<32x384xbf16>
    %cst_258 = arith.constant dense<0.000000e+00> : vector<8x384xf32>
    %831 = tpu.matmul %828, %830, %cst_258 {dimension_numbers = #tpu.dot_dimension_numbers<[1], [0], [0], [1], [0, 0, 1, 1], [], []>} : vector<8x32xbf16>, vector<32x384xbf16>, vector<8x384xf32> -> vector<8x384xf32>
    %832 = arith.addf %831, %48 : vector<8x384xf32>
    %c1_259 = arith.constant 1 : index
    %c0_260 = arith.constant 0 : index
    %c0_261 = arith.constant 0 : index
    %833 = vector.load %arg9[%c1_259, %c0_260, %c0_261] : memref<3x32x384xbf16, #tpu.memory_space<vmem>>, vector<1x32x384xbf16>
    %834 = vector.shape_cast %833 : vector<1x32x384xbf16> to vector<32x384xbf16>
    %835 = arith.truncf %759 : vector<8x32xf32> to vector<8x32xbf16>
    %cst_262 = arith.constant dense<0.000000e+00> : vector<8x384xf32>
    %836 = tpu.matmul %835, %834, %cst_262 {dimension_numbers = #tpu.dot_dimension_numbers<[1], [0], [0], [1], [0, 0, 1, 1], [], []>} : vector<8x32xbf16>, vector<32x384xbf16>, vector<8x384xf32> -> vector<8x384xf32>
    %837 = vector.extract_strided_slice %832 {offsets = [0, 0], sizes = [8, 32], strides = [1, 1]} : vector<8x384xf32> to vector<8x32xf32>
    %838 = vector.extract_strided_slice %836 {offsets = [0, 0], sizes = [8, 32], strides = [1, 1]} : vector<8x384xf32> to vector<8x32xf32>
    %839 = arith.addf %837, %838 : vector<8x32xf32>
    %840 = arith.negf %839 : vector<8x32xf32>
    %841 = math.exp %840 : vector<8x32xf32>
    %cst_263 = arith.constant 1.000000e+00 : f32
    %842 = vector.broadcast %cst_263 : f32 to vector<8x32xf32>
    %843 = arith.addf %842, %841 : vector<8x32xf32>
    %844 = arith.divf %842, %843 : vector<8x32xf32>
    %845 = vector.extract_strided_slice %832 {offsets = [0, 128], sizes = [8, 32], strides = [1, 1]} : vector<8x384xf32> to vector<8x32xf32>
    %846 = vector.extract_strided_slice %836 {offsets = [0, 128], sizes = [8, 32], strides = [1, 1]} : vector<8x384xf32> to vector<8x32xf32>
    %847 = arith.addf %845, %846 : vector<8x32xf32>
    %848 = arith.negf %847 : vector<8x32xf32>
    %849 = math.exp %848 : vector<8x32xf32>
    %cst_264 = arith.constant 1.000000e+00 : f32
    %850 = vector.broadcast %cst_264 : f32 to vector<8x32xf32>
    %851 = arith.addf %850, %849 : vector<8x32xf32>
    %852 = arith.divf %850, %851 : vector<8x32xf32>
    %853 = vector.extract_strided_slice %832 {offsets = [0, 256], sizes = [8, 32], strides = [1, 1]} : vector<8x384xf32> to vector<8x32xf32>
    %854 = vector.extract_strided_slice %836 {offsets = [0, 256], sizes = [8, 32], strides = [1, 1]} : vector<8x384xf32> to vector<8x32xf32>
    %855 = arith.addf %854, %60 : vector<8x32xf32>
    %856 = arith.mulf %844, %855 : vector<8x32xf32>
    %857 = arith.addf %853, %856 : vector<8x32xf32>
    %858 = math.tanh %857 : vector<8x32xf32>
    %cst_265 = arith.constant 1.000000e+00 : f32
    %859 = vector.broadcast %cst_265 : f32 to vector<8x32xf32>
    %860 = arith.subf %859, %852 : vector<8x32xf32>
    %861 = arith.mulf %860, %858 : vector<8x32xf32>
    %862 = arith.mulf %852, %759 : vector<8x32xf32>
    %863 = arith.addf %861, %862 : vector<8x32xf32>
    %864 = arith.truncf %863 : vector<8x32xf32> to vector<8x32xbf16>
    %c2_266 = arith.constant 2 : index
    %c0_267 = arith.constant 0 : index
    %c0_268 = arith.constant 0 : index
    %865 = vector.load %arg8[%c2_266, %c0_267, %c0_268] : memref<3x32x384xbf16, #tpu.memory_space<vmem>>, vector<1x32x384xbf16>
    %866 = vector.shape_cast %865 : vector<1x32x384xbf16> to vector<32x384xbf16>
    %cst_269 = arith.constant dense<0.000000e+00> : vector<8x384xf32>
    %867 = tpu.matmul %864, %866, %cst_269 {dimension_numbers = #tpu.dot_dimension_numbers<[1], [0], [0], [1], [0, 0, 1, 1], [], []>} : vector<8x32xbf16>, vector<32x384xbf16>, vector<8x384xf32> -> vector<8x384xf32>
    %868 = arith.addf %867, %52 : vector<8x384xf32>
    %c2_270 = arith.constant 2 : index
    %c0_271 = arith.constant 0 : index
    %c0_272 = arith.constant 0 : index
    %869 = vector.load %arg9[%c2_270, %c0_271, %c0_272] : memref<3x32x384xbf16, #tpu.memory_space<vmem>>, vector<1x32x384xbf16>
    %870 = vector.shape_cast %869 : vector<1x32x384xbf16> to vector<32x384xbf16>
    %871 = arith.truncf %795 : vector<8x32xf32> to vector<8x32xbf16>
    %cst_273 = arith.constant dense<0.000000e+00> : vector<8x384xf32>
    %872 = tpu.matmul %871, %870, %cst_273 {dimension_numbers = #tpu.dot_dimension_numbers<[1], [0], [0], [1], [0, 0, 1, 1], [], []>} : vector<8x32xbf16>, vector<32x384xbf16>, vector<8x384xf32> -> vector<8x384xf32>
    %873 = vector.extract_strided_slice %868 {offsets = [0, 0], sizes = [8, 32], strides = [1, 1]} : vector<8x384xf32> to vector<8x32xf32>
    %874 = vector.extract_strided_slice %872 {offsets = [0, 0], sizes = [8, 32], strides = [1, 1]} : vector<8x384xf32> to vector<8x32xf32>
    %875 = arith.addf %873, %874 : vector<8x32xf32>
    %876 = arith.negf %875 : vector<8x32xf32>
    %877 = math.exp %876 : vector<8x32xf32>
    %cst_274 = arith.constant 1.000000e+00 : f32
    %878 = vector.broadcast %cst_274 : f32 to vector<8x32xf32>
    %879 = arith.addf %878, %877 : vector<8x32xf32>
    %880 = arith.divf %878, %879 : vector<8x32xf32>
    %881 = vector.extract_strided_slice %868 {offsets = [0, 128], sizes = [8, 32], strides = [1, 1]} : vector<8x384xf32> to vector<8x32xf32>
    %882 = vector.extract_strided_slice %872 {offsets = [0, 128], sizes = [8, 32], strides = [1, 1]} : vector<8x384xf32> to vector<8x32xf32>
    %883 = arith.addf %881, %882 : vector<8x32xf32>
    %884 = arith.negf %883 : vector<8x32xf32>
    %885 = math.exp %884 : vector<8x32xf32>
    %cst_275 = arith.constant 1.000000e+00 : f32
    %886 = vector.broadcast %cst_275 : f32 to vector<8x32xf32>
    %887 = arith.addf %886, %885 : vector<8x32xf32>
    %888 = arith.divf %886, %887 : vector<8x32xf32>
    %889 = vector.extract_strided_slice %868 {offsets = [0, 256], sizes = [8, 32], strides = [1, 1]} : vector<8x384xf32> to vector<8x32xf32>
    %890 = vector.extract_strided_slice %872 {offsets = [0, 256], sizes = [8, 32], strides = [1, 1]} : vector<8x384xf32> to vector<8x32xf32>
    %891 = arith.addf %890, %64 : vector<8x32xf32>
    %892 = arith.mulf %880, %891 : vector<8x32xf32>
    %893 = arith.addf %889, %892 : vector<8x32xf32>
    %894 = math.tanh %893 : vector<8x32xf32>
    %cst_276 = arith.constant 1.000000e+00 : f32
    %895 = vector.broadcast %cst_276 : f32 to vector<8x32xf32>
    %896 = arith.subf %895, %888 : vector<8x32xf32>
    %897 = arith.mulf %896, %894 : vector<8x32xf32>
    %898 = arith.mulf %888, %795 : vector<8x32xf32>
    %899 = arith.addf %897, %898 : vector<8x32xf32>
    %900 = tpu.concatenate %171, %275, %379, %483, %587, %691, %795, %899 in 0 : vector<8x32xf32>, vector<8x32xf32>, vector<8x32xf32>, vector<8x32xf32>, vector<8x32xf32>, vector<8x32xf32>, vector<8x32xf32>, vector<8x32xf32> -> vector<64x32xf32>
    %901 = arith.truncf %900 : vector<64x32xf32> to vector<64x32xbf16>
    %c0_277 = arith.constant 0 : index
    %c0_278 = arith.constant 0 : index
    %902 = vector.load %arg12[%c0_277, %c0_278] : memref<32x32xbf16, #tpu.memory_space<vmem>>, vector<32x32xbf16>
    %cst_279 = arith.constant dense<0.000000e+00> : vector<64x32xf32>
    %903 = tpu.matmul %901, %902, %cst_279 {dimension_numbers = #tpu.dot_dimension_numbers<[1], [0], [0], [1], [0, 0, 1, 1], [], []>} : vector<64x32xbf16>, vector<32x32xbf16>, vector<64x32xf32> -> vector<64x32xf32>
    %c0_280 = arith.constant 0 : index
    %c0_281 = arith.constant 0 : index
    %904 = vector.load %arg13[%c0_280, %c0_281] : memref<1x32xf32, #tpu.memory_space<vmem>>, vector<1x32xf32>
    %905 = vector.broadcast %904 : vector<1x32xf32> to vector<64x32xf32>
    %906 = arith.addf %903, %905 : vector<64x32xf32>
    %907 = vector.shape_cast %906 : vector<64x32xf32> to vector<8x8x32xf32>
    %908 = vector.shape_cast %900 : vector<64x32xf32> to vector<8x8x32xf32>
    %cst_282 = arith.constant dense<0xFF800000> : vector<8x32xf32>
    %909 = vector.multi_reduction <maximumf>, %907, %cst_282 [0] : vector<8x8x32xf32> to vector<8x32xf32>
    %910 = vector.shape_cast %909 : vector<8x32xf32> to vector<1x8x32xf32>
    %911 = vector.broadcast %910 : vector<1x8x32xf32> to vector<8x8x32xf32>
    %912 = arith.subf %907, %911 : vector<8x8x32xf32>
    %913 = math.exp %912 : vector<8x8x32xf32>
    %cst_283 = arith.constant dense<0.000000e+00> : vector<8x32xf32>
    %914 = vector.multi_reduction <add>, %913, %cst_283 [0] : vector<8x8x32xf32> to vector<8x32xf32>
    %915 = tpu.reciprocal %914 {approx = true} : vector<8x32xf32> -> vector<8x32xf32>
    %916 = arith.mulf %913, %908 : vector<8x8x32xf32>
    %cst_284 = arith.constant dense<0.000000e+00> : vector<8x32xf32>
    %917 = vector.multi_reduction <add>, %916, %cst_284 [0] : vector<8x8x32xf32> to vector<8x32xf32>
    %918 = arith.mulf %917, %915 : vector<8x32xf32>
    %cst_285 = arith.constant 1.250000e-01 : f32
    %919 = vector.broadcast %cst_285 : f32 to vector<8x32xf32>
    %920 = arith.mulf %918, %919 : vector<8x32xf32>
    %c0_286 = arith.constant 0 : index
    %c0_287 = arith.constant 0 : index
    %921 = vector.load %arg14[%c0_286, %c0_287] : memref<1x32xf32, #tpu.memory_space<vmem>>, vector<1x32xf32>
    %922 = vector.broadcast %921 : vector<1x32xf32> to vector<8x32xf32>
    %923 = arith.mulf %899, %922 : vector<8x32xf32>
    %c0_288 = arith.constant 0 : index
    %c0_289 = arith.constant 0 : index
    %924 = vector.load %arg15[%c0_288, %c0_289] : memref<1x32xf32, #tpu.memory_space<vmem>>, vector<1x32xf32>
    %925 = vector.broadcast %924 : vector<1x32xf32> to vector<8x32xf32>
    %926 = arith.mulf %920, %925 : vector<8x32xf32>
    %927 = arith.addf %923, %926 : vector<8x32xf32>
    %cst_290 = arith.constant dense<0.000000e+00> : vector<8xf32>
    %928 = vector.multi_reduction <add>, %927, %cst_290 [1] : vector<8x32xf32> to vector<8xf32>
    %929 = vector.shape_cast %928 : vector<8xf32> to vector<8x1xf32>
    %c0_291 = arith.constant 0 : index
    %c0_292 = arith.constant 0 : index
    %930 = vector.load %arg16[%c0_291, %c0_292] : memref<1x1xf32, #tpu.memory_space<vmem>>, vector<1x1xf32>
    %931 = vector.broadcast %930 : vector<1x1xf32> to vector<8x1xf32>
    %932 = arith.addf %929, %931 : vector<8x1xf32>
    %c0_293 = arith.constant 0 : index
    %c0_294 = arith.constant 0 : index
    %c0_295 = arith.constant 0 : index
    %933 = vector.load %arg17[%c0_293, %c0_294, %c0_295] : memref<1x8x1xf32, #tpu.memory_space<vmem>>, vector<1x8x1xf32>
    %934 = vector.shape_cast %933 : vector<1x8x1xf32> to vector<8x1xf32>
    %935 = vector.shape_cast %932 : vector<8x1xf32> to vector<1x8x1xf32>
    tpu.vector_store %arg17[%c0_293, %c0_294, %c0_295], %935 {strides = array<i32>} : memref<1x8x1xf32, #tpu.memory_space<vmem>>, vector<1x8x1xf32>,
    return
  }
  func.func @transform_0(%arg0: i32) -> (i32, i32, i32) {
    %c0_i32 = arith.constant 0 : i32
    %c0_i32_0 = arith.constant 0 : i32
    %c0_i32_1 = arith.constant 0 : i32
    return %arg0, %c0_i32, %c0_i32_0 : i32, i32, i32
  }
  func.func @transform_1(%arg0: i32) -> (i32, i32) {
    %c0_i32 = arith.constant 0 : i32
    %c0_i32_0 = arith.constant 0 : i32
    %c0_i32_1 = arith.constant 0 : i32
    return %c0_i32, %c0_i32_0 : i32, i32
  }
  func.func @transform_2(%arg0: i32) -> (i32, i32) {
    %c0_i32 = arith.constant 0 : i32
    %c0_i32_0 = arith.constant 0 : i32
    %c0_i32_1 = arith.constant 0 : i32
    return %c0_i32, %c0_i32_0 : i32, i32
  }
  func.func @transform_3(%arg0: i32) -> (i32, i32) {
    %c0_i32 = arith.constant 0 : i32
    %c0_i32_0 = arith.constant 0 : i32
    %c0_i32_1 = arith.constant 0 : i32
    return %c0_i32, %c0_i32_0 : i32, i32
  }
  func.func @transform_4(%arg0: i32) -> (i32, i32) {
    %c0_i32 = arith.constant 0 : i32
    %c0_i32_0 = arith.constant 0 : i32
    %c0_i32_1 = arith.constant 0 : i32
    return %c0_i32, %c0_i32_0 : i32, i32
  }
  func.func @transform_5(%arg0: i32) -> (i32, i32) {
    %c0_i32 = arith.constant 0 : i32
    %c0_i32_0 = arith.constant 0 : i32
    %c0_i32_1 = arith.constant 0 : i32
    return %c0_i32, %c0_i32_0 : i32, i32
  }
  func.func @transform_6(%arg0: i32) -> (i32, i32) {
    %c0_i32 = arith.constant 0 : i32
    %c0_i32_0 = arith.constant 0 : i32
    %c0_i32_1 = arith.constant 0 : i32
    return %c0_i32, %c0_i32_0 : i32, i32
  }
  func.func @transform_7(%arg0: i32) -> (i32, i32, i32) {
    %c0_i32 = arith.constant 0 : i32
    %c0_i32_0 = arith.constant 0 : i32
    %c0_i32_1 = arith.constant 0 : i32
    %c0_i32_2 = arith.constant 0 : i32
    return %c0_i32, %c0_i32_0, %c0_i32_1 : i32, i32, i32
  }
  func.func @transform_8(%arg0: i32) -> (i32, i32, i32) {
    %c0_i32 = arith.constant 0 : i32
    %c0_i32_0 = arith.constant 0 : i32
    %c0_i32_1 = arith.constant 0 : i32
    %c0_i32_2 = arith.constant 0 : i32
    return %c0_i32, %c0_i32_0, %c0_i32_1 : i32, i32, i32
  }
  func.func @transform_9(%arg0: i32) -> (i32, i32, i32) {
    %c0_i32 = arith.constant 0 : i32
    %c0_i32_0 = arith.constant 0 : i32
    %c0_i32_1 = arith.constant 0 : i32
    %c0_i32_2 = arith.constant 0 : i32
    return %c0_i32, %c0_i32_0, %c0_i32_1 : i32, i32, i32
  }
  func.func @transform_10(%arg0: i32) -> (i32, i32, i32) {
    %c0_i32 = arith.constant 0 : i32
    %c0_i32_0 = arith.constant 0 : i32
    %c0_i32_1 = arith.constant 0 : i32
    %c0_i32_2 = arith.constant 0 : i32
    return %c0_i32, %c0_i32_0, %c0_i32_1 : i32, i32, i32
  }
  func.func @transform_11(%arg0: i32) -> (i32, i32) {
    %c0_i32 = arith.constant 0 : i32
    %c0_i32_0 = arith.constant 0 : i32
    %c0_i32_1 = arith.constant 0 : i32
    return %c0_i32, %c0_i32_0 : i32, i32
  }
  func.func @transform_12(%arg0: i32) -> (i32, i32) {
    %c0_i32 = arith.constant 0 : i32
    %c0_i32_0 = arith.constant 0 : i32
    %c0_i32_1 = arith.constant 0 : i32
    return %c0_i32, %c0_i32_0 : i32, i32
  }
  func.func @transform_13(%arg0: i32) -> (i32, i32) {
    %c0_i32 = arith.constant 0 : i32
    %c0_i32_0 = arith.constant 0 : i32
    %c0_i32_1 = arith.constant 0 : i32
    return %c0_i32, %c0_i32_0 : i32, i32
  }
  func.func @transform_14(%arg0: i32) -> (i32, i32) {
    %c0_i32 = arith.constant 0 : i32
    %c0_i32_0 = arith.constant 0 : i32
    %c0_i32_1 = arith.constant 0 : i32
    return %c0_i32, %c0_i32_0 : i32, i32
  }
  func.func @transform_15(%arg0: i32) -> (i32, i32) {
    %c0_i32 = arith.constant 0 : i32
    %c0_i32_0 = arith.constant 0 : i32
    %c0_i32_1 = arith.constant 0 : i32
    return %c0_i32, %c0_i32_0 : i32, i32
  }
  func.func @transform_16(%arg0: i32) -> (i32, i32, i32) {
    %c0_i32 = arith.constant 0 : i32
    %c0_i32_0 = arith.constant 0 : i32
    %c0_i32_1 = arith.constant 0 : i32
    return %arg0, %c0_i32, %c0_i32_0 : i32, i32, i32
  }
}

</mosaic_0001>

<bundles_post_ra>
// kernel: alstm_forward.1
= control target key start
LH: loop header
LB: loop body
LE: loop exit
PB: predicated region body
PF: predicated region fallthrough
CT: control target
= control target key end

     0   :  { %s6846_s23 = smov 0   ;;  %s8398_s0 = inlined_call_operand.vmem [shape: f32[2,64,16], index: 0, kind: input, shape index: {}]   ;;  %s8399_s1 = inlined_call_operand.vmem [shape: bf16[16,32], index: 1, kind: input, shape index: {}]   ;;  %s8400_s2 = inlined_call_operand.vmem [shape: bf16[16,32], index: 2, kind: input, shape index: {}]   ;;  %s8401_s3 = inlined_call_operand.vmem [shape: bf16[16,32], index: 3, kind: input, shape index: {}]   ;;  %s8402_s4 = inlined_call_operand.vmem [shape: f32[1,32], index: 4, kind: input, shape index: {}]   ;;  %s8403_s5 = inlined_call_operand.vmem [shape: bf16[32,32], index: 5, kind: input, shape index: {}]   ;;  %s8404_s6 = inlined_call_operand.vmem [shape: f32[1,32], index: 6, kind: input, shape index: {}]   ;;  %s8405_s7 = inlined_call_operand.vmem [shape: bf16[3,32,384], index: 7, kind: input, shape index: {}]   ;;  %s8406_s8 = inlined_call_operand.vmem [shape: bf16[3,32,384], index: 8, kind: input, shape index: {}]   ;;  %s8407_s9 = inlined_call_operand.vmem [shape: f32[3,1,384], index: 9, kind: input, shape index: {}]   ;;  %s8408_s10 = inlined_call_operand.vmem [shape: f32[3,1,32], index: 10, kind: input, shape index: {}]   ;;  %s8409_s11 = inlined_call_operand.vmem [shape: bf16[32,32], index: 11, kind: input, shape index: {}]   ;;  %s8410_s12 = inlined_call_operand.vmem [shape: f32[1,32], index: 12, kind: input, shape index: {}]   ;;  %s8411_s13 = inlined_call_operand.vmem [shape: f32[1,32], index: 13, kind: input, shape index: {}]   ;;  %s8412_s14 = inlined_call_operand.vmem [shape: f32[1,32], index: 14, kind: input, shape index: {}]   ;;  %s8413_s15 = inlined_call_operand.<no memory space> [shape: f32[1,1], index: 15, kind: input, shape index: {}]   ;;  %s8414_s16 = inlined_call_operand.vmem [shape: f32[2,8,1], index: 16, kind: output, shape index: {}]  }
   0x1   :  { %8439 = sst [smem:[#allocation32_spill]] %s8398_s0  ;;  %v21_v0 = vstv %s8413_s15 }
   0x2   :  { %22 = vst [vmem:[#allocation2] sm:$0x1] %v21_v0 }
   0x3 LB: > { %s5567_s24 = sadd.s32 4294967295, %s6753_s23   ;;  %p5571_p0 = scmp.ge.s32.totalorder %s6753_s23, 1  ;;  %s6753_s23 = sphi %s6846_s23, %s28_s23  }
   0x4   : > { %p464_p1 = scmp.lt.s32.totalorder %s6753_s23, 3 }
   0x6   : > { %p465_p2 = pnand %p5571_p0, %p464_p1 }
   0x8   : > { %468 = sbr.rel (%p465_p2) target bundleno = 5324 (0x14cc), region = 84 }
   0xd   : > { %v6368_v1 = vld [vmem:[%s8400_s2] sm:$0xff]   ;;  %p513_p3 = scmp.lt.s32.totalorder %s5567_s24, 1  ;;  %s8440_s18 = sld [smem:[#allocation32_spill]]  ;;  %vm550_vm0 = vcmask 130048   ;;  %v8417_v11 = vmov 0.0   ;;  %v6371_v22 = vld [vmem:[%s8403_s5 + $0x8] sm:$0xff]  }
   0xe   : > { %6355 = vmatprep.subr.bf16.mxu1 %v6368_v1  ;;  %5969 = vmatprep.subr.bf16.mxu0 %v6368_v1  ;;  %v6369_v2 = vld [vmem:[%s8399_s1] sm:$0xff]   ;;  %vm861_vm5 = vcmask 261120  }
   0xf   : > { %s8511_s24 = smov (!%p513_p3, %s5567_s24), 1  ;;  %6356 = vmatpush3.bf16.msra.mxu1 %v6368_v1  ;;  %5970 = vmatpush3.bf16.msra.mxu0 %v6368_v1  ;;  %v6370_v3 = vld [vmem:[%s8401_s3] sm:$0xff]  }
  0x10   : > { %s5815_s30 = sshll.u32 %s8511_s24, 6  ;;  %5979 = vmatprep.subr.bf16.mxu1 %v6369_v2  ;;  %5989 = vmatprep.subr.bf16.mxu0 %v6370_v3  ;;  %v6372_v23 = vld [vmem:[%s8403_s5] sm:$0xff]   ;;  %s5574_s0 = sshll.u32 %s8511_s24, 3 }
  0x11   : > { %v6892_v24 = vld [vmem:[%s8405_s7 + $0x20] ss:$12 sps:$4 sm:$0xff]  }
  0x12   : > { %v5590_v42 = vld [vmem:[%s8402_s4] ss:$0 sm:$0xff] }
  0x13   : > { %s517_s19 = scalar_lea.vmem %s8440_s18, %s5815_s30 }
  0x14   : > { %v523_v4 = vld [vmem:[%s517_s19] sm:$0xff]  ;;  %v524_v5 = vld [vmem:[%s517_s19 + $0x8] sm:$0xff]  ;;  %v525_v6 = vld [vmem:[%s517_s19 + $0x10] sm:$0xff] }
  0x15   : > { %v535_v7 = vpack.c.bf16 %v524_v5, %v523_v4  ;;  %v526_v8 = vld [vmem:[%s517_s19 + $0x18] sm:$0xff]  ;;  %v527_v9 = vld [vmem:[%s517_s19 + $0x20] sm:$0xff]  ;;  %v528_v10 = vld [vmem:[%s517_s19 + $0x28] sm:$0xff]  ;;  %v531_v12 = vpack.c.bf16 %v523_v4, %v8417_v11  ;;  %v532_v17 = vpack.c.bf16 %v525_v6, %v524_v5 }
  0x16   : > { %v529_v13 = vld [vmem:[%s517_s19 + $0x30] sm:$0xff]  ;;  %v530_v14 = vld [vmem:[%s517_s19 + $0x38] sm:$0xff]  ;;  %v536_v15 = vpack.c.bf16 %v526_v8, %v525_v6  ;;  %v537_v16 = vpack.c.bf16 %v528_v10, %v527_v9  ;;  %v533_v19 = vpack.c.bf16 %v527_v9, %v526_v8  ;;  %s521_s19 = scalar_lea.vmem %s8414_s16, %s5574_s0 }
  0x17   : > { %5971 = vmatprep.mubr.msk.bf16.mxu0 %vm550_vm0, %v535_v7  ;;  %v538_v18 = vpack.c.bf16 %v530_v14, %v529_v13  ;;  %v534_v20 = vpack.c.bf16 %v529_v13, %v528_v10  ;;  %v539_v21 = vpack.c.bf16 %v8417_v11, %v530_v14 }
  0x18   : > { %5975 = vmatprep.mubr.msk.bf16.mxu1 %vm550_vm0, %v537_v16  ;;  %5972 = vmatmul.mubr.msk.bf16.vlgmr.msra.gmra.mxu0 %vm550_vm0, %v536_v15 }
  0x19   : > { %5976 = vmatmul.mubr.msk.bf16.vlgmr.msra.gmra.mxu1 %vm550_vm0, %v538_v18  ;;  %5990 = vmatpush3.bf16.msra.mxu0 %v6370_v3 }
  0x1a   : > { %5980 = vmatpush3.bf16.msra.mxu1 %v6369_v2  ;;  %5981 = vmatprep.mubr.msk.bf16.mxu1 %vm550_vm0, %v531_v12 }
  0x1b   : > { %5991 = vmatprep.mubr.msk.bf16.mxu0 %vm550_vm0, %v532_v17  ;;  %5999 = vmatprep.subr.bf16.mxu1 %v6371_v22 }
  0x20   : > { %5992 = vmatmul.mubr.msk.bf16.vlgmr.msra.gmra.mxu0 %vm550_vm0, %v533_v19 }
  0x21   : > { %5982 = vmatmul.mubr.msk.bf16.vlgmr.msra.gmra.mxu1 %vm550_vm0, %v532_v17  ;;  %5995 = vmatprep.mubr.msk.bf16.mxu0 %vm550_vm0, %v534_v20 }
  0x22   : > { %5985 = vmatprep.mubr.msk.bf16.mxu1 %vm550_vm0, %v533_v19  ;;  %6000 = vmatpush3.bf16.msra.mxu1 %v6371_v22 }
  0x23   : > { %6001 = vmatprep.subr.bf16.mxu1 %v6372_v23 }
  0x26   : > { %6002 = vmatpush3.bf16.msra.mxu1 %v6372_v23 }
  0x27   : > { %6011 = vmatprep.subr.bf16.mxu1 %v6892_v24 }
  0x28   : > { %5996 = vmatmul.mubr.msk.bf16.gmra.mxu0 %vm550_vm0, %v539_v21 }
  0x29   : > { %5986 = vmatmul.mubr.msk.bf16.gmra.mxu1 %vm550_vm0, %v534_v20 }
  0xd8   : > { %v5973_v25 = vpop.f32.mrf.mxu0 }
  0xd9   : > { %v5977_v26 = vpop.f32.mrf.mxu1 }
  0xda   : > { %v597_v27 = vpop.f32.mrf.mxu0 }
  0xdb   : > { %v613_v28 = vpop.f32.mrf.mxu1 }
  0xdc   : > { %v5974_v29 = vpop.f32.mrf.mxu0 }
  0xdd   : > { %v5978_v30 = vpop.f32.mrf.mxu1 }
  0xde   : > { %v600_v31 = vpop.f32.mrf.mxu0 }
  0xdf   : > { %v616_v32 = vpop.f32.mrf.mxu1 }
  0xe0   : > { %v5993_v33 = vpop.f32.mrf.mxu0 }
  0xe1   : > { %v5983_v34 = vpop.f32.mrf.mxu1 }
  0xe2   : > { %v689_v35 = vadd.f32 %v5983_v34, %v5973_v25  ;;  %v756_v36 = vpop.f32.mrf.mxu0  ;;  %v6377_v34 = vld [vmem:[%s8405_s7 + $0x8] ss:$12 sps:$4 sm:$0xff]  }
  0xe3   : > { %v680_v37 = vpop.f32.mrf.mxu1 }
  0xe4   : > { %v681_v38 = vadd.f32 %v680_v37, %v597_v27  ;;  %v5994_v39 = vpop.f32.mrf.mxu0  ;;  %v789_v40 = vadd.f32 %v5993_v33, %v689_v35  ;;  %v6374_v33 = vld [vmem:[%s8405_s7 + $0x18] ss:$12 sps:$4 sm:$0xff]   ;;  %v6378_v35 = vld [vmem:[%s8405_s7] ss:$12 sps:$4 sm:$0xff]   ;;  %v6922_v37 = vld [vmem:[%s8406_s8 + $0x1c] ss:$12 sps:$4 sm:$0xff]  }
  0xe5   : > { %v5984_v41 = vpop.f32.mrf.mxu1 }
  0xe6   : > { %v787_v43 = vadd.f32 %v756_v36, %v681_v38  ;;  %v692_v44 = vadd.f32 %v5984_v41, %v5974_v29  ;;  %v759_v45 = vpop.f32.mrf.mxu0  ;;  %v804_v49 = vadd.f32 %v5590_v42, %v789_v40  ;;  %v8415_v36 = vmov 0  }
  0xe7   : > { %v683_v46 = vpop.f32.mrf.mxu1  ;;  %1068 = vmatprep.mubr.bf16.mxu0 %v8415_v36 }
  0xe8   : > { %v790_v47 = vadd.f32 %v5994_v39, %v692_v44  ;;  %v5997_v48 = vpop.f32.mrf.mxu0  ;;  %v684_v50 = vadd.f32 %v683_v46, %v600_v31  ;;  %v802_v52 = vadd.f32 %v5590_v42, %v787_v43  ;;  %v820_v59 = vmul.f32 0.01, %v804_v49  ;;  %v5591_v39 = vld [vmem:[%s8404_s6] ss:$0 sm:$0xff] }
  0xe9   : > { %v5987_v51 = vpop.f32.mrf.mxu1  ;;  %vm812_vm4 = vcmp.gt.f32.partialorder %v804_v49, 0.0 }
  0xea   : > { %v805_v53 = vadd.f32 %v5590_v42, %v790_v47  ;;  %v772_v54 = vpop.f32.mrf.mxu0  ;;  %v788_v55 = vadd.f32 %v759_v45, %v684_v50  ;;  %v705_v56 = vadd.f32 %v5987_v51, %v5977_v26  ;;  %v818_v0 = vmul.f32 0.01, %v802_v52 }
  0xeb   : > { %v696_v57 = vpop.f32.mrf.mxu1  ;;  %vm810_vm2 = vcmp.gt.f32.partialorder %v802_v52, 0.0  ;;  %v828_v16 = vsel %vm812_vm4, %v804_v49, %v820_v59 }
  0xec   : > { %v697_v58 = vadd.f32 %v696_v57, %v613_v28  ;;  %v821_v60 = vmul.f32 0.01, %v805_v53  ;;  %v803_v61 = vadd.f32 %v5590_v42, %v788_v55  ;;  %v5998_v63 = vpop.f32.mrf.mxu0  ;;  %vm813_vm1 = vcmp.gt.f32.partialorder %v805_v53, 0.0 }
  0xed   : > { %v5988_v62 = vpop.f32.mrf.mxu1  ;;  %v793_v4 = vadd.f32 %v5997_v48, %v705_v56  ;;  %v826_v13 = vsel %vm810_vm2, %v802_v52, %v818_v0  ;;  %v6936_v0 = vld [vmem:[%s8406_s8 + $0x4] ss:$12 sps:$4 sm:$0xff]   ;;  %vm6757_vm2 = vmmov 0  }
  0xee   : > { %v791_v1 = vadd.f32 %v772_v54, %v697_v58  ;;  %v708_v2 = vadd.f32 %v5988_v62, %v5978_v30  ;;  %vm811_vm3 = vcmp.gt.f32.partialorder %v803_v61, 0.0  ;;  %v819_v3 = vmul.f32 0.01, %v803_v61  ;;  %v775_v12 = vpop.f32.mrf.mxu0 }
  0xef   : > { %v699_v5 = vpop.f32.mrf.mxu1  ;;  %v829_v9 = vsel %vm813_vm1, %v805_v53, %v821_v60  ;;  %v808_v17 = vadd.f32 %v5590_v42, %v793_v4 }
  0xf0   : > { %v806_v6 = vadd.f32 %v5590_v42, %v791_v1  ;;  %v794_v7 = vadd.f32 %v5998_v63, %v708_v2  ;;  %v700_v8 = vadd.f32 %v699_v5, %v616_v32  ;;  %v827_v10 = vsel %vm811_vm3, %v803_v61, %v819_v3  ;;  %v6376_v32 = vld [vmem:[%s8405_s7 + $0x1c] ss:$12 sps:$4 sm:$0xff]   ;;  %v6931_v61 = vld [vmem:[%s8406_s8 + $0x18] ss:$12 sps:$4 sm:$0xff]  }
  0xf1   : > { %v834_v18 = vpack.c.bf16 %v827_v10, %v826_v13  ;;  %v835_v19 = vpack.c.bf16 %v829_v9, %v828_v16  ;;  %v824_v25 = vmul.f32 0.01, %v808_v17  ;;  %vm816_vm9 = vcmp.gt.f32.partialorder %v808_v17, 0.0  ;;  %1048 = vmatprep.subr.bf16.mxu0 %v6376_v32  ;;  %v6968_v16 = vld [vmem:[%s8406_s8 + $0x8] ss:$12 sps:$4 sm:$0xff]  }
  0xf2   : > { %v809_v14 = vadd.f32 %v5590_v42, %v794_v7  ;;  %v792_v15 = vadd.f32 %v775_v12, %v700_v8  ;;  %v822_v20 = vmul.f32 0.01, %v806_v6  ;;  %vm814_vm6 = vcmp.gt.f32.partialorder %v806_v6, 0.0  ;;  %1049 = vmatpush1.bf16.msra.mxu0 %v6374_v33 }
  0xf3   : > { %6003 = vmatprep.mubr.msk.bf16.mxu1 %vm861_vm5, %v834_v18  ;;  %v832_v30 = vsel %vm816_vm9, %v808_v17, %v824_v25  ;;  %v6983_v17 = vld [vmem:[%s8405_s7 + $0x4c] ss:$12 sps:$4 sm:$0xff]   ;;  %v6988_v18 = vld [vmem:[%s8405_s7 + $0x48] ss:$12 sps:$4 sm:$0xff]   ;;  %v977_v25 = vlaneseq  ;;  %vm5512_vm3 = vcmask 7168  }
  0xf4   : > { %v807_v21 = vadd.f32 %v5590_v42, %v792_v15  ;;  %v825_v22 = vmul.f32 0.01, %v809_v14  ;;  %vm817_vm7 = vcmp.gt.f32.partialorder %v809_v14, 0.0  ;;  %6004 = vmatmul.mubr.msk.bf16.vlgmr.msra.gmra.mxu1 %vm861_vm5, %v835_v19  ;;  %v830_v26 = vsel %vm814_vm6, %v806_v6, %v822_v20  ;;  %v6946_v6 = vld [vmem:[%s8406_s8] ss:$12 sps:$4 sm:$0xff]   ;;  %8441 = vst [vmem:[#allocation3_spill] sm:$0xff] %v6983_v17 }
  0xf5   : > { %6012 = vmatpush3.bf16.msra.mxu1 %v6892_v24  ;;  %v6380_v24 = vld [vmem:[%s8405_s7 + $0x4] ss:$12 sps:$4 sm:$0xff]   ;;  %v6959_v15 = vld [vmem:[%s8406_s8 + $0x20] ss:$12 sps:$4 sm:$0xff]   ;;  %8442 = vst [vmem:[#allocation4_spill] sm:$0xff] %v6988_v18 }
  0xf6   : > { %vm815_vm8 = vcmp.gt.f32.partialorder %v807_v21, 0.0  ;;  %v823_v23 = vmul.f32 0.01, %v807_v21  ;;  %v833_v28 = vsel %vm817_vm7, %v809_v14, %v825_v22  ;;  %1050 = vmatprep.subr.bf16.mxu0 %v6380_v24  ;;  %6013 = vmatprep.subr.bf16.mxu1 %v6377_v34  ;;  %v6993_v19 = vld [vmem:[%s8405_s7 + $0x50] ss:$12 sps:$4 sm:$0xff]  }
  0xf7   : > { %v837_v31 = vpack.c.bf16 %v833_v28, %v832_v30  ;;  %1051 = vmatpush1.bf16.msra.mxu0 %v6378_v35  ;;  %8443 = vst [vmem:[#allocation5_spill] sm:$0xff] %v6993_v19  ;;  %v7001_v20 = vld [vmem:[%s8405_s7 + $0x34] ss:$12 sps:$4 sm:$0xff]   ;;  %v7012_v22 = vld [vmem:[%s8405_s7 + $0x38] ss:$12 sps:$4 sm:$0xff]  }
  0xf8   : > { %v831_v27 = vsel %vm815_vm8, %v807_v21, %v823_v23  ;;  %1436 = vmatprep.subr.bf16.mxu0 %v6983_v17  ;;  %8444 = vst [vmem:[#allocation6_spill] sm:$0xff] %v7001_v20  ;;  %v7006_v21 = vld [vmem:[%s8405_s7 + $0x30] ss:$12 sps:$4 sm:$0xff]   ;;  %8446 = vst [vmem:[#allocation8_spill] sm:$0xff] %v7012_v22  ;;  %v7017_v23 = vld [vmem:[%s8406_s8 + $0x4c] ss:$12 sps:$4 sm:$0xff]  }
  0xf9   : > { %v836_v29 = vpack.c.bf16 %v831_v27, %v830_v26  ;;  %6014 = vmatpush3.bf16.msra.mxu1 %v6377_v34  ;;  %8445 = vst [vmem:[#allocation7_spill] sm:$0xff] %v7006_v21  ;;  %8447 = vst [vmem:[#allocation9_spill] sm:$0xff] %v7017_v23  ;;  %v978_v26 = vshrl.u32 %v977_v25, 7  ;;  %v975_v28 = vld [vmem:[%s8407_s9] sm:$0x7] }
  0xfa   : > { %1288 = vmatprep.subr.bf16.mxu1 %v6922_v37 }
  0xfb   : > { %6007 = vmatprep.mubr.msk.bf16.mxu1 %vm861_vm5, %v836_v29  ;;  %v7024_v27 = vsub.s32 2, %v978_v26  ;;  %v7032_v30 = vsub.s32 0, %v978_v26 }
  0xfc   : > { %6008 = vmatmul.mubr.msk.bf16.gmra.mxu1 %vm861_vm5, %v837_v31 }
  0xfd   : > { %v7030_v29 = vrot.slane %v975_v28, %v7024_v27  ;;  %v980_v34 = vrot.slane %v975_v28, %v7032_v30 }
  0xff   : > { %8448 = vst [vmem:[#allocation10_spill] sm:$0xff] %v7030_v29 }
 0x1b4   : > { %v6005_v38 = vpop.f32.mrf.mxu1 }
 0x1b5   : > { %v917_v42 = vadd.f32 %v6005_v38, %v5591_v39 }
 0x1b6   : > { %v908_v40 = vpop.f32.mrf.mxu1 }
 0x1b7   : > { %v909_v41 = vadd.f32 %v5591_v39, %v908_v40  ;;  %v949_v49 = vmul.f32 0.01, %v917_v42  ;;  %vm941_vm12 = vcmp.gt.f32.partialorder %v917_v42, 0.0 }
 0x1b8   : > { %v6006_v43 = vpop.f32.mrf.mxu1 }
 0x1b9   : > { %v920_v44 = vadd.f32 %v6006_v43, %v5591_v39  ;;  %v947_v46 = vmul.f32 0.01, %v909_v41  ;;  %vm939_vm11 = vcmp.gt.f32.partialorder %v909_v41, 0.0  ;;  %v957_v57 = vsel %vm941_vm12, %v917_v42, %v949_v49 }
 0x1ba   : > { %v911_v45 = vpop.f32.mrf.mxu1 }
 0x1bb   : > { %vm942_vm10 = vcmp.gt.f32.partialorder %v920_v44, 0.0  ;;  %v950_v47 = vmul.f32 0.01, %v920_v44  ;;  %v912_v48 = vadd.f32 %v5591_v39, %v911_v45  ;;  %v955_v54 = vsel %vm939_vm11, %v909_v41, %v947_v46 }
 0x1bc   : > { %v6009_v50 = vpop.f32.mrf.mxu1 }
 0x1bd   : > { %vm940_vm13 = vcmp.gt.f32.partialorder %v912_v48, 0.0  ;;  %v948_v51 = vmul.f32 0.01, %v912_v48  ;;  %v958_v52 = vsel %vm942_vm10, %v920_v44, %v950_v47  ;;  %v933_v59 = vadd.f32 %v6009_v50, %v5591_v39 }
 0x1be   : > { %v924_v53 = vpop.f32.mrf.mxu1  ;;  %v964_v62 = vpack.c.bf16 %v958_v52, %v957_v57 }
 0x1bf   : > { %v956_v55 = vsel %vm940_vm13, %v912_v48, %v948_v51  ;;  %v925_v56 = vadd.f32 %v5591_v39, %v924_v53  ;;  %v953_v5 = vmul.f32 0.01, %v933_v59  ;;  %vm945_vm0 = vcmp.gt.f32.partialorder %v933_v59, 0.0 }
 0x1c0   : > { %v963_v58 = vpack.c.bf16 %v956_v55, %v955_v54  ;;  %v6010_v60 = vpop.f32.mrf.mxu1 }
 0x1c1   : > { %v936_v63 = vadd.f32 %v6010_v60, %v5591_v39  ;;  %v951_v2 = vmul.f32 0.01, %v925_v56  ;;  %vm943_vm15 = vcmp.gt.f32.partialorder %v925_v56, 0.0  ;;  %v961_v12 = vsel %vm945_vm0, %v933_v59, %v953_v5 }
 0x1c2   : > { %v927_v1 = vpop.f32.mrf.mxu1  ;;  %5604 = vmatmul.mubr.msk.bf16.vlgmr.msra.gmra.mxu0 %vm861_vm5, %v963_v58  ;;  %6015 = vmatprep.mubr.msk.bf16.mxu1 %vm861_vm5, %v963_v58 }
 0x1c3   : > { %vm946_vm14 = vcmp.gt.f32.partialorder %v936_v63, 0.0  ;;  %v954_v3 = vmul.f32 0.01, %v936_v63  ;;  %v928_v4 = vadd.f32 %v5591_v39, %v927_v1  ;;  %6016 = vmatmul.mubr.msk.bf16.vlgmr.msra.gmra.mxu1 %vm861_vm5, %v964_v62  ;;  %1078 = vmatprep.mubr.bf16.mxu0 %v8415_v36  ;;  %v959_v9 = vsel %vm943_vm15, %v925_v56, %v951_v2 }
 0x1c4   : > { %1289 = vmatpush1.bf16.msra.mxu1 %v6931_v61  ;;  %1437 = vmatpush1.bf16.msra.mxu0 %v6988_v18  ;;  %v7038_v39 = vsub.s32 1, %v978_v26 }
 0x1c5   : > { %vm944_vm1 = vcmp.gt.f32.partialorder %v928_v4, 0.0  ;;  %v952_v7 = vmul.f32 0.01, %v928_v4  ;;  %1290 = vmatprep.subr.bf16.mxu1 %v6936_v0  ;;  %v962_v8 = vsel %vm946_vm14, %v936_v63, %v954_v3  ;;  %1438 = vmatprep.subr.bf16.mxu0 %v7001_v20 }
 0x1c6   : > { %v966_v14 = vpack.c.bf16 %v962_v8, %v961_v12  ;;  %v7050_v46 = vrot.slane %v975_v28, %v7038_v39 }
 0x1c7   : > { %v960_v10 = vsel %vm944_vm1, %v928_v4, %v952_v7 }
 0x1c8   : > { %v965_v13 = vpack.c.bf16 %v960_v10, %v959_v9  ;;  %1291 = vmatpush1.bf16.msra.mxu1 %v6946_v6  ;;  %1439 = vmatpush1.bf16.msra.mxu0 %v7006_v21  ;;  %8451 = vst [vmem:[#allocation13_spill] sm:$0xff] %v7050_v46 }
 0x1c9   : > { %6023 = vmatprep.subr.bf16.mxu1 %v8417_v11  ;;  %1558 = vmatprep.subr.bf16.mxu0 %v7017_v23 }
 0x1ca   : > { %5605 = vmatmul.mubr.msk.bf16.gmra.mxu0 %vm861_vm5, %v964_v62  ;;  %6019 = vmatprep.mubr.msk.bf16.mxu1 %vm861_vm5, %v965_v13 }
 0x1cb   : > { %6020 = vmatmul.mubr.msk.bf16.gmra.mxu1 %vm861_vm5, %v966_v14  ;;  %1088 = vmatprep.mubr.bf16.mxu0 %v8415_v36 }
 0x1cc   : > { %1308 = vmatprep.mubr.bf16.mxu1 %v8415_v36 }
 0x1d2   : > { %5606 = vmatmul.mubr.msk.bf16.gmra.mxu0 %vm861_vm5, %v965_v13 }
 0x1d3   : > { %1309 = vmatmul.mubr.bf16.vlgmr.msra.gmra.mxu1 %v8415_v36  ;;  %1098 = vmatprep.mubr.bf16.mxu0 %v8415_v36 }
 0x1d4   : > { %6024 = vmatpush3.bf16.msra.mxu1 %v6959_v15  ;;  %6027 = vmatprep.mubr.msk.bf16.mxu1 %vm6757_vm2, %v8417_v11 }
 0x1d5   : > { %6025 = vmatprep.subr.bf16.mxu1 %v8417_v11 }
 0x1d8   : > { %6026 = vmatpush3.bf16.msra.mxu1 %v6968_v16 }
 0x1d9   : > { %6031 = vmatprep.subr.bf16.mxu1 %v8417_v11 }
 0x1da   : > { %5607 = vmatmul.mubr.msk.bf16.gmra.mxu0 %vm861_vm5, %v966_v14 }
 0x1db   : > { %6028 = vmatmul.mubr.bf16.vlgmr.msra.gmra.mxu1 %v8415_v36  ;;  %1456 = vmatprep.mubr.bf16.mxu0 %v8415_v36 }
 0x1dc   : > { %6035 = vmatprep.mubr.msk.bf16.mxu1 %vm6757_vm2, %v8417_v11  ;;  %6032 = vmatpush3.bf16.msra.mxu1 %v6993_v19 }
 0x1dd   : > { %6033 = vmatprep.subr.bf16.mxu1 %v8417_v11 }
 0x1e0   : > { %6034 = vmatpush3.bf16.msra.mxu1 %v7012_v22 }
 0x1e1   : > { %6039 = vmatprep.subr.bf16.mxu1 %v8417_v11 }
 0x282   : > { %v1070_v31 = vpop.f32.mrf.mxu0 }
 0x283   : > { %v6017_v32 = vpop.f32.mrf.mxu1  ;;  %v1071_v60 = vadd.f32 %v1070_v31, %v980_v34 }
 0x284   : > { %v7035_v33 = vadd.f32 %v6017_v32, %v7030_v29  ;;  %v1072_v24 = vpop.f32.mrf.mxu0 }
 0x285   : > { %v1143_v35 = vpop.f32.mrf.mxu1  ;;  %v1073_v12 = vadd.f32 %v1072_v24, %v7050_v46 }
 0x286   : > { %8449 = vst [vmem:[#allocation11_spill] sm:$0xff] %v7035_v33  ;;  %v1074_v38 = vpop.f32.mrf.mxu0 }
 0x287   : > { %v7040_v40 = vadd.f32 %v1074_v38, %v980_v34  ;;  %v6018_v41 = vpop.f32.mrf.mxu1 }
 0x288   : > { %v7043_v42 = vadd.f32 %v6018_v41, %v7030_v29  ;;  %v7045_v43 = vpop.f32.mrf.mxu0 }
 0x289   : > { %v7047_v44 = vpop.f32.mrf.mxu1 }
 0x28a   : > { %8450 = vst [vmem:[#allocation12_spill] sm:$0xff] %v7043_v42  ;;  %v1080_v45 = vpop.f32.mrf.mxu0 }
 0x28b   : > { %v7052_v47 = vadd.f32 %v1080_v45, %v980_v34  ;;  %v6021_v48 = vpop.f32.mrf.mxu1 }
 0x28c   : > { %v7055_v49 = vadd.f32 %v6021_v48, %v7030_v29  ;;  %v1082_v50 = vpop.f32.mrf.mxu0 }
 0x28d   : > { %8452 = vst [vmem:[#allocation14_spill] sm:$0xff] %v7052_v47  ;;  %v7058_v51 = vadd.f32 %v1082_v50, %v7050_v46  ;;  %v1159_v52 = vpop.f32.mrf.mxu1 }
 0x28e   : > { %8453 = vst [vmem:[#allocation15_spill] sm:$0xff] %v7055_v49  ;;  %v7061_v53 = vadd.f32 %v1159_v52, %v7030_v29  ;;  %v1084_v54 = vpop.f32.mrf.mxu0 }
 0x28f   : > { %8454 = vst [vmem:[#allocation16_spill] sm:$0xff] %v7058_v51  ;;  %v7063_v55 = vadd.f32 %v1084_v54, %v980_v34  ;;  %v6022_v56 = vpop.f32.mrf.mxu1 }
 0x290   : > { %8455 = vst [vmem:[#allocation17_spill] sm:$0xff] %v7061_v53  ;;  %v7066_v57 = vadd.f32 %v6022_v56, %v7030_v29  ;;  %v7068_v58 = vpop.f32.mrf.mxu0 }
 0x291   : > { %8456 = vst [vmem:[#allocation18_spill] sm:$0xff] %v7063_v55  ;;  %8458 = vst [vmem:[#allocation20_spill] sm:$0xff] %v7068_v58  ;;  %v7070_v59 = vpop.f32.mrf.mxu1 }
 0x292   : > { %8457 = vst [vmem:[#allocation19_spill] sm:$0xff] %v7066_v57  ;;  %8459 = vst [vmem:[#allocation21_spill] sm:$0xff] %v7070_v59  ;;  %v1090_v62 = vpop.f32.mrf.mxu0 }
 0x293   : > { %v7072_v63 = vadd.f32 %v1090_v62, %v980_v34  ;;  %v1310_v1 = vpop.f32.mrf.mxu1  ;;  %v7092_v62 = vld [vmem:[%s8408_s10] ss:$0 sm:$0xff] }
 0x294   : > { %v1357_v2 = vadd.f32 %v1310_v1, %v1071_v60  ;;  %v1092_v3 = vpop.f32.mrf.mxu0 }
 0x295   : > { %8460 = vst [vmem:[#allocation22_spill] sm:$0xff] %v7072_v63  ;;  %v7075_v4 = vadd.f32 %v1092_v3, %v7050_v46  ;;  %v1312_v5 = vpop.f32.mrf.mxu1 }
 0x296   : > { %v5625_v7 = vmul.f32 -1.442695, %v1357_v2  ;;  %v1094_v8 = vpop.f32.mrf.mxu0  ;;  %v1364_v25 = vadd.f32 %v1312_v5, %v1073_v12  ;;  %v1144_v5 = vadd.f32 %v1143_v35, %v7030_v29  ;;  %v7110_v35 = vld [vmem:[%s8406_s8 + $0x34] ss:$12 sps:$4 sm:$0xff]  }
 0x297   : > { %8461 = vst [vmem:[#allocation23_spill] sm:$0xff] %v7075_v4  ;;  %v7077_v9 = vadd.f32 %v1094_v8, %v980_v34  ;;  %v1314_v10 = vpop.f32.mrf.mxu1 }
 0x298   : > { %6423 = vpow2.f32 %v5625_v7  ;;  %v7080_v13 = vpop.f32.mrf.mxu0  ;;  %v5626_v45 = vmul.f32 -1.442695, %v1364_v25 }
 0x299   : > { %8462 = vst [vmem:[#allocation24_spill] sm:$0xff] %v7077_v9  ;;  %8463 = vst [vmem:[#allocation25_spill] sm:$0xff] %v7080_v13  ;;  %v1315_v14 = vpop.f32.mrf.mxu1 }
 0x29a   : > { %v1100_v26 = vpop.f32.mrf.mxu0  ;;  %6425 = vpow2.f32 %v5626_v45  ;;  %v7125_v45 = vld [vmem:[%s8406_s8 + $0x30] ss:$12 sps:$4 sm:$0xff]  }
 0x29b   : > { %v7082_v28 = vadd.f32 %v1100_v26, %v980_v34  ;;  %v1351_v31 = vpop.f32.mrf.mxu1 }
 0x29c   : > { %v1102_v32 = vpop.f32.mrf.mxu0  ;;  %v1371_v2 = vadd.f32 %v7092_v62, %v1351_v31 }
 0x29d   : > { %8464 = vst [vmem:[#allocation26_spill] sm:$0xff] %v7082_v28  ;;  %v7085_v38 = vadd.f32 %v1102_v32, %v7050_v46  ;;  %v6029_v41 = vpop.f32.mrf.mxu1  ;;  %v7101_v32 = vld [vmem:[%s8406_s8 + $0x48] ss:$12 sps:$4 sm:$0xff]  }
 0x29e   : > { %v1104_v48 = vpop.f32.mrf.mxu0  ;;  %v7115_v41 = vld [vmem:[%s8406_s8 + $0x50] ss:$12 sps:$4 sm:$0xff]  }
 0x29f   : > { %8465 = vst [vmem:[#allocation27_spill] sm:$0xff] %v7085_v38  ;;  %v7087_v50 = vadd.f32 %v1104_v48, %v980_v34  ;;  %v1354_v52 = vpop.f32.mrf.mxu1  ;;  %v7133_v48 = vld [vmem:[%s8406_s8 + $0x38] ss:$12 sps:$4 sm:$0xff]  }
 0x2a0   : > { %v7149_v52 = vld [vmem:[%s8405_s7 + $0x7c] ss:$12 sps:$4 sm:$0xff]  }
 0x2a1   : > { %8466 = vst [vmem:[#allocation28_spill] sm:$0xff] %v7087_v50  ;;  %v6030_v24 = vpop.f32.mrf.mxu1 }
 0x2a2   : > { %v7154_v24 = vld [vmem:[%s8405_s7 + $0x78] ss:$12 sps:$4 sm:$0xff]  }
 0x2a5   : > { %v6424_v54 = vpop.eup %6423 }
 0x2a6   : > { %v1361_v56 = vadd.f32 1.0, %v6424_v54  ;;  %v7159_v54 = vld [vmem:[%s8405_s7 + $0x80] ss:$12 sps:$4 sm:$0xff]  }
 0x2a7   : > { %v6426_v60 = vpop.eup %6425 }
 0x2a8   : > { %6427 = vrcp.f32 %v1361_v56  ;;  %v1368_v1 = vadd.f32 1.0, %v6426_v60  ;;  %v7164_v56 = vld [vmem:[%s8405_s7 + $0x64] ss:$12 sps:$4 sm:$0xff]   ;;  %v7171_v60 = vld [vmem:[%s8405_s7 + $0x68] ss:$12 sps:$4 sm:$0xff]  }
 0x2aa   : > { %6429 = vrcp.f32 %v1368_v1  ;;  %v7177_v1 = vld [vmem:[%s8405_s7 + $0x60] ss:$12 sps:$4 sm:$0xff]  }
 0x2b5   : > { %v6428_v3 = vpop.eup %6427 }
 0x2b6   : > { %v1372_v34 = vmul.f32 %v6428_v3, %v1371_v2  ;;  %v7184_v2 = vld [vmem:[%s8406_s8 + $0x7c] ss:$12 sps:$4 sm:$0xff]   ;;  %v7190_v3 = vpop.f32.mrf.mxu0 }
 0x2b7   : > { %v6430_v8 = vpop.eup %6429  ;;  %8467 = vst [vmem:[#allocation29_spill] sm:$0xff] %v7190_v3 }
 0x2b8   : > { %v1373_v7 = vadd.f32 %v1372_v34, %v1144_v5  ;;  %v1375_v10 = vsub.f32 1.0, %v6430_v8  ;;  %v1377_v14 = vmul.f32 0.0, %v6430_v8  ;;  %v5612_v5 = vld [vmem:[%s8407_s9 + $0x3] sm:$0x7] }
 0x2b9   : > { %v7200_v3 = vrot.slane %v5612_v5, %v7038_v39 }
 0x2ba   : > { %6431 = vtanh.f32 %v1373_v7 }
 0x2c7   : > { %v6432_v12 = vpop.eup %6431 }
 0x2c8   : > { %v1376_v25 = vmul.f32 %v6432_v12, %v1375_v10  ;;  %v7196_v12 = vrot.slane %v5612_v5, %v7032_v30 }
 0x2ca   : > { %v7096_v26 = vadd.f32 %v1377_v14, %v1376_v25 }
 0x2cc   : > { %v7105_v31 = vpack.c.bf16 %v7096_v26, %v7096_v26 }
 0x2ce   : > { %5641 = vmatmul.mubr.msk.bf16.vlgmr.msra.gmra.mxu0 %vm861_vm5, %v7105_v31  ;;  %6036 = vmatmul.mubr.msk.bf16.vlgmr.msra.gmra.mxu1 %vm861_vm5, %v7105_v31 }
 0x2cf   : > { %1559 = vmatpush1.bf16.msra.mxu0 %v7101_v32  ;;  %1578 = vmatprep.mubr.bf16.mxu0 %v8415_v36 }
 0x2d0   : > { %1560 = vmatprep.subr.bf16.mxu0 %v7110_v35  ;;  %6040 = vmatpush3.bf16.msra.mxu1 %v7115_v41 }
 0x2d1   : > { %6041 = vmatprep.subr.bf16.mxu1 %v8417_v11  ;;  %6043 = vmatprep.mubr.msk.bf16.mxu1 %vm6757_vm2, %v8417_v11 }
 0x2d3   : > { %1561 = vmatpush1.bf16.msra.mxu0 %v7125_v45 }
 0x2d4   : > { %6042 = vmatpush3.bf16.msra.mxu1 %v7133_v48  ;;  %1706 = vmatprep.subr.bf16.mxu0 %v7149_v52 }
 0x2d5   : > { %6047 = vmatprep.subr.bf16.mxu1 %v8417_v11 }
 0x2d6   : > { %1579 = vmatmul.mubr.bf16.vlgmr.msra.gmra.mxu0 %v8415_v36 }
 0x2d7   : > { %6044 = vmatmul.mubr.bf16.vlgmr.msra.gmra.mxu1 %v8415_v36  ;;  %1726 = vmatprep.mubr.bf16.mxu0 %v8415_v36 }
 0x2d8   : > { %6051 = vmatprep.mubr.msk.bf16.mxu1 %vm6757_vm2, %v8417_v11  ;;  %6048 = vmatpush3.bf16.msra.mxu1 %v7159_v54 }
 0x2d9   : > { %1707 = vmatpush1.bf16.msra.mxu0 %v7154_v24  ;;  %6049 = vmatprep.subr.bf16.mxu1 %v8417_v11 }
 0x2da   : > { %1708 = vmatprep.subr.bf16.mxu0 %v7164_v56 }
 0x2dc   : > { %6050 = vmatpush3.bf16.msra.mxu1 %v7171_v60 }
 0x2dd   : > { %1709 = vmatpush1.bf16.msra.mxu0 %v7177_v1  ;;  %6055 = vmatprep.subr.bf16.mxu1 %v8417_v11 }
 0x2de   : > { %1828 = vmatprep.subr.bf16.mxu0 %v7184_v2 }
 0x38e   : > { %v1458_v34 = vpop.f32.mrf.mxu0  ;;  %v1499_v7 = vpop.f32.mrf.mxu1 }
 0x38f   : > { %v1459_v11 = vadd.f32 %v1458_v34, %v7196_v12 }
 0x390   : > { %v1460_v8 = vpop.f32.mrf.mxu0  ;;  %v6037_v10 = vpop.f32.mrf.mxu1 }
 0x391   : > { %v1461_v10 = vadd.f32 %v1460_v8, %v7200_v3 }
 0x392   : > { %v1462_v14 = vpop.f32.mrf.mxu0  ;;  %v1502_v25 = vpop.f32.mrf.mxu1 }
 0x394   : > { %v1463_v36 = vpop.f32.mrf.mxu0  ;;  %v6038_v57 = vpop.f32.mrf.mxu1 }
 0x396   : > { %v1580_v50 = vpop.f32.mrf.mxu0 }
 0x397   : > { %v1627_v49 = vadd.f32 %v1580_v50, %v1459_v11  ;;  %v1621_v38 = vpop.f32.mrf.mxu1  ;;  %v7206_v11 = vld [vmem:[%s8408_s10 + $0x1] ss:$0 sm:$0xff] }
 0x398   : > { %v1582_v28 = vpop.f32.mrf.mxu0 }
 0x399   : > { %v5657_v59 = vmul.f32 -1.442695, %v1627_v49  ;;  %v6045_v13 = vpop.f32.mrf.mxu1  ;;  %v1634_v25 = vadd.f32 %v1582_v28, %v1461_v10  ;;  %v7209_v49 = vrot.slane %v5612_v5, %v7024_v27 }
 0x39a   : > { %v1584_v9 = vpop.f32.mrf.mxu0 }
 0x39b   : > { %6433 = vpow2.f32 %v5657_v59  ;;  %v1624_v53 = vpop.f32.mrf.mxu1  ;;  %v5658_v57 = vmul.f32 -1.442695, %v1634_v25  ;;  %v1500_v13 = vadd.f32 %v1499_v7, %v7209_v49  ;;  %v7232_v7 = vld [vmem:[%s8406_s8 + $0x64] ss:$12 sps:$4 sm:$0xff]  }
 0x39c   : > { %v1585_v14 = vpop.f32.mrf.mxu0  ;;  %v1641_v53 = vadd.f32 %v7206_v11, %v1621_v38  ;;  %v7223_v38 = vld [vmem:[%s8406_s8 + $0x80] ss:$12 sps:$4 sm:$0xff]  }
 0x39d   : > { %v6046_v36 = vpop.f32.mrf.mxu1  ;;  %6435 = vpow2.f32 %v5658_v57  ;;  %v7243_v57 = vld [vmem:[%s8406_s8 + $0x60] ss:$12 sps:$4 sm:$0xff]  }
 0x3a8   : > { %v6434_v34 = vpop.eup %6433 }
 0x3a9   : > { %v1631_v4 = vadd.f32 1.0, %v6434_v34  ;;  %v7248_v34 = vld [vmem:[%s8406_s8 + $0x68] ss:$12 sps:$4 sm:$0xff]  }
 0x3aa   : > { %v6436_v63 = vpop.eup %6435 }
 0x3ab   : > { %6437 = vrcp.f32 %v1631_v4  ;;  %v1638_v9 = vadd.f32 1.0, %v6436_v63  ;;  %v7218_v63 = vld [vmem:[%s8406_s8 + $0x78] ss:$12 sps:$4 sm:$0xff]  }
 0x3ad   : > { %6439 = vrcp.f32 %v1638_v9  ;;  %v8468_v9 = vmov 0.0  }
 0x3b8   : > { %v6438_v59 = vpop.eup %6437 }
 0x3b9   : > { %v1642_v28 = vmul.f32 %v6438_v59, %v1641_v53  ;;  %v8469_v53 = vmov 0  }
 0x3ba   : > { %v6440_v4 = vpop.eup %6439 }
 0x3bb   : > { %v1643_v50 = vadd.f32 %v1642_v28, %v1500_v13  ;;  %v1645_v8 = vsub.f32 1.0, %v6440_v4  ;;  %v1647_v25 = vmul.f32 0.0, %v6440_v4 }
 0x3bd   : > { %6441 = vtanh.f32 %v1643_v50 }
 0x3ca   : > { %v6442_v10 = vpop.eup %6441 }
 0x3cb   : > { %v1646_v14 = vmul.f32 %v6442_v10, %v1645_v8 }
 0x3cd   : > { %v7213_v36 = vadd.f32 %v1647_v25, %v1646_v14 }
 0x3cf   : > { %v7227_v5 = vpack.c.bf16 %v7213_v36, %v7213_v36 }
 0x3d1   : > { %5673 = vmatmul.mubr.msk.bf16.vlgmr.msra.gmra.mxu0 %vm861_vm5, %v7227_v5  ;;  %6052 = vmatmul.mubr.msk.bf16.vlgmr.msra.gmra.mxu1 %vm861_vm5, %v7227_v5 }
 0x3d2   : > { %1829 = vmatpush1.bf16.msra.mxu0 %v7218_v63  ;;  %6056 = vmatpush3.bf16.msra.mxu1 %v7223_v38 }
 0x3d3   : > { %1830 = vmatprep.subr.bf16.mxu0 %v7232_v7  ;;  %6057 = vmatprep.subr.bf16.mxu1 %v8468_v9 }
 0x3d4   : > { %1848 = vmatprep.mubr.bf16.mxu0 %v8469_v53  ;;  %6059 = vmatprep.mubr.msk.bf16.mxu1 %vm6757_vm2, %v8468_v9 }
 0x3d6   : > { %1831 = vmatpush1.bf16.msra.mxu0 %v7243_v57  ;;  %6058 = vmatpush3.bf16.msra.mxu1 %v7248_v34 }
 0x3d7   : > { %1931 = vmatprep.subr.bf16.mxu0 %v6922_v37  ;;  %6063 = vmatprep.subr.bf16.mxu1 %v8468_v9 }
 0x3d9   : > { %1849 = vmatmul.mubr.bf16.vlgmr.msra.gmra.mxu0 %v8469_v53  ;;  %6060 = vmatmul.mubr.bf16.vlgmr.msra.gmra.mxu1 %v8469_v53 }
 0x3da   : > { %1932 = vmatpush1.bf16.msra.mxu0 %v6931_v61  ;;  %6064 = vmatpush3.bf16.msra.mxu1 %v6959_v15 }
 0x3db   : > { %1933 = vmatprep.subr.bf16.mxu0 %v6936_v0  ;;  %6065 = vmatprep.subr.bf16.mxu1 %v8468_v9 }
 0x3dc   : > { %1951 = vmatprep.mubr.bf16.mxu0 %v8469_v53  ;;  %6067 = vmatprep.mubr.msk.bf16.mxu1 %vm6757_vm2, %v8468_v9 }
 0x3de   : > { %1934 = vmatpush1.bf16.msra.mxu0 %v6946_v6  ;;  %6066 = vmatpush3.bf16.msra.mxu1 %v6968_v16 }
 0x3df   : > { %2038 = vmatprep.subr.bf16.mxu0 %v6983_v17  ;;  %6071 = vmatprep.subr.bf16.mxu1 %v8468_v9 }
 0x3e1   : > { %5691 = vmatmul.mubr.msk.bf16.vlgmr.msra.gmra.mxu0 %vm861_vm5, %v7105_v31  ;;  %6068 = vmatmul.mubr.msk.bf16.vlgmr.msra.gmra.mxu1 %vm861_vm5, %v7105_v31  ;;  %v5613_v31 = vld [vmem:[%s8407_s9 + $0x6] sm:$0x7] }
 0x3e2   : > { %2039 = vmatpush1.bf16.msra.mxu0 %v6988_v18  ;;  %6072 = vmatpush3.bf16.msra.mxu1 %v6993_v19  ;;  %v7291_v4 = vrot.slane %v5613_v31, %v7032_v30  ;;  %v7294_v14 = vrot.slane %v5613_v31, %v7038_v39 }
 0x3e3   : > { %2040 = vmatprep.subr.bf16.mxu0 %v7001_v20  ;;  %6073 = vmatprep.subr.bf16.mxu1 %v8468_v9 }
 0x3e4   : > { %2058 = vmatprep.mubr.bf16.mxu0 %v8469_v53  ;;  %6075 = vmatprep.mubr.msk.bf16.mxu1 %vm6757_vm2, %v8468_v9  ;;  %8470 = vst [vmem:[#allocation30_spill] sm:$0xff] %v7291_v4 }
 0x3e6   : > { %2041 = vmatpush1.bf16.msra.mxu0 %v7006_v21  ;;  %6074 = vmatpush3.bf16.msra.mxu1 %v7012_v22 }
 0x3e7   : > { %2119 = vmatprep.subr.bf16.mxu0 %v7017_v23  ;;  %6079 = vmatprep.subr.bf16.mxu1 %v8468_v9 }
 0x491   : > { %v1728_v59 = vpop.f32.mrf.mxu0  ;;  %v1769_v13 = vpop.f32.mrf.mxu1 }
 0x492   : > { %v1729_v58 = vadd.f32 %v1728_v59, %v7291_v4 }
 0x493   : > { %v1730_v28 = vpop.f32.mrf.mxu0  ;;  %v6053_v50 = vpop.f32.mrf.mxu1 }
 0x494   : > { %v1731_v51 = vadd.f32 %v1730_v28, %v7294_v14 }
 0x495   : > { %v1732_v8 = vpop.f32.mrf.mxu0  ;;  %v1772_v10 = vpop.f32.mrf.mxu1 }
 0x497   : > { %v1733_v25 = vpop.f32.mrf.mxu0  ;;  %v6054_v42 = vpop.f32.mrf.mxu1 }
 0x499   : > { %v1850_v55 = vpop.f32.mrf.mxu0  ;;  %v1891_v33 = vpop.f32.mrf.mxu1 }
 0x49a   : > { %v1897_v47 = vadd.f32 %v1850_v55, %v1729_v58 }
 0x49b   : > { %v1852_v23 = vpop.f32.mrf.mxu0  ;;  %v6061_v22 = vpop.f32.mrf.mxu1 }
 0x49c   : > { %v5689_v50 = vmul.f32 -1.442695, %v1897_v47  ;;  %v1904_v21 = vadd.f32 %v1852_v23, %v1731_v51  ;;  %v1077_v22 = vadd.f32 %v7045_v43, %v7050_v46 }
 0x49d   : > { %v1854_v30 = vpop.f32.mrf.mxu0  ;;  %v1894_v20 = vpop.f32.mrf.mxu1 }
 0x49e   : > { %6443 = vpow2.f32 %v5689_v50  ;;  %v5690_v4 = vmul.f32 -1.442695, %v1904_v21 }
 0x49f   : > { %v1855_v8 = vpop.f32.mrf.mxu0  ;;  %v6062_v10 = vpop.f32.mrf.mxu1 }
 0x4a1   : > { %v1953_v39 = vpop.f32.mrf.mxu0  ;;  %v1994_v19 = vpop.f32.mrf.mxu1 }
 0x4a2   : > { %v2000_v42 = vadd.f32 %v1953_v39, %v7040_v40 }
 0x4a3   : > { %v1955_v25 = vpop.f32.mrf.mxu0  ;;  %v6069_v59 = vpop.f32.mrf.mxu1 }
 0x4a4   : > { %v5693_v18 = vmul.f32 -1.442695, %v2000_v42  ;;  %v2007_v20 = vadd.f32 %v1955_v25, %v1077_v22  ;;  %v2014_v59 = vadd.f32 %v7092_v62, %v1994_v19  ;;  %v1147_v22 = vadd.f32 %v7047_v44, %v7030_v29 }
 0x4a5   : > { %v1957_v17 = vpop.f32.mrf.mxu0  ;;  %v1997_v28 = vpop.f32.mrf.mxu1 }
 0x4a6   : > { %6445 = vpow2.f32 %v5693_v18  ;;  %v5694_v58 = vmul.f32 -1.442695, %v2007_v20  ;;  %v7304_v17 = vld [vmem:[%s8408_s10 + $0x2] ss:$0 sm:$0xff]  ;;  %v7307_v18 = vrot.slane %v5613_v31, %v7024_v27 }
 0x4a7   : > { %v1958_v23 = vpop.f32.mrf.mxu0  ;;  %v6070_v47 = vpop.f32.mrf.mxu1  ;;  %6447 = vpow2.f32 %v5690_v4  ;;  %v1911_v21 = vadd.f32 %v7304_v17, %v1891_v33 }
 0x4a8   : > { %v1770_v8 = vadd.f32 %v1769_v13, %v7307_v18 }
 0x4ab   : > { %v6444_v51 = vpop.eup %6443 }
 0x4ac   : > { %v1901_v55 = vadd.f32 1.0, %v6444_v51 }
 0x4ae   : > { %6449 = vrcp.f32 %v1901_v55 }
 0x4af   : > { %6451 = vpow2.f32 %v5694_v58 }
 0x4b3   : > { %v6446_v40 = vpop.eup %6445 }
 0x4b4   : > { %v2004_v50 = vadd.f32 1.0, %v6446_v40  ;;  %v6448_v30 = vpop.eup %6447 }
 0x4b5   : > { %v1908_v43 = vadd.f32 1.0, %v6448_v30 }
 0x4b6   : > { %6453 = vrcp.f32 %v2004_v50 }
 0x4b7   : > { %6455 = vrcp.f32 %v1908_v43 }
 0x4bb   : > { %v6450_v4 = vpop.eup %6449 }
 0x4bc   : > { %v1912_v10 = vmul.f32 %v6450_v4, %v1911_v21  ;;  %v6452_v39 = vpop.eup %6451 }
 0x4bd   : > { %v2011_v25 = vadd.f32 1.0, %v6452_v39 }
 0x4be   : > { %v1913_v42 = vadd.f32 %v1912_v10, %v1770_v8 }
 0x4c0   : > { %6457 = vtanh.f32 %v1913_v42 }
 0x4c1   : > { %6459 = vrcp.f32 %v2011_v25 }
 0x4c3   : > { %v6454_v28 = vpop.eup %6453 }
 0x4c4   : > { %v2015_v27 = vmul.f32 %v6454_v28, %v2014_v59  ;;  %v6456_v33 = vpop.eup %6455 }
 0x4c5   : > { %v1915_v23 = vsub.f32 1.0, %v6456_v33  ;;  %v1917_v20 = vmul.f32 0.0, %v6456_v33 }
 0x4c6   : > { %v2016_v31 = vadd.f32 %v2015_v27, %v1147_v22 }
 0x4c8   : > { %6461 = vtanh.f32 %v2016_v31 }
 0x4cd   : > { %v6458_v47 = vpop.eup %6457 }
 0x4ce   : > { %v1916_v13 = vmul.f32 %v6458_v47, %v1915_v23  ;;  %v6460_v55 = vpop.eup %6459 }
 0x4cf   : > { %v2018_v58 = vsub.f32 1.0, %v6460_v55  ;;  %v2020_v19 = vmul.f32 %v6460_v55, %v7096_v26 }
 0x4d0   : > { %v7314_v51 = vadd.f32 %v1917_v20, %v1916_v13 }
 0x4d2   : > { %8471 = vst [vmem:[#allocation31_spill] sm:$0xff] %v7314_v51 }
 0x4d5   : > { %v6462_v40 = vpop.eup %6461 }
 0x4d6   : > { %v2019_v50 = vmul.f32 %v6462_v40, %v2018_v58 }
 0x4d8   : > { %v7317_v30 = vadd.f32 %v2020_v19, %v2019_v50 }
 0x4da   : > { %v7321_v44 = vpack.c.bf16 %v7317_v30, %v7317_v30 }
 0x4dc   : > { %5695 = vmatmul.mubr.msk.bf16.vlgmr.msra.gmra.mxu0 %vm861_vm5, %v7321_v44  ;;  %6076 = vmatmul.mubr.msk.bf16.vlgmr.msra.gmra.mxu1 %vm861_vm5, %v7321_v44 }
 0x4dd   : > { %2120 = vmatpush1.bf16.msra.mxu0 %v7101_v32  ;;  %6080 = vmatpush3.bf16.msra.mxu1 %v7115_v41 }
 0x4de   : > { %2121 = vmatprep.subr.bf16.mxu0 %v7110_v35  ;;  %6081 = vmatprep.subr.bf16.mxu1 %v8468_v9 }
 0x4df   : > { %2139 = vmatprep.mubr.bf16.mxu0 %v8469_v53  ;;  %6083 = vmatprep.mubr.msk.bf16.mxu1 %vm6757_vm2, %v8468_v9 }
 0x4e1   : > { %2122 = vmatpush1.bf16.msra.mxu0 %v7125_v45  ;;  %6082 = vmatpush3.bf16.msra.mxu1 %v7133_v48 }
 0x4e2   : > { %2226 = vmatprep.subr.bf16.mxu0 %v7149_v52  ;;  %6087 = vmatprep.subr.bf16.mxu1 %v8468_v9 }
 0x4e4   : > { %5697 = vmatmul.mubr.msk.bf16.vlgmr.msra.gmra.mxu0 %vm861_vm5, %v7227_v5  ;;  %6084 = vmatmul.mubr.msk.bf16.vlgmr.msra.gmra.mxu1 %vm861_vm5, %v7227_v5 }
 0x4e5   : > { %2227 = vmatpush1.bf16.msra.mxu0 %v7154_v24  ;;  %6088 = vmatpush3.bf16.msra.mxu1 %v7159_v54 }
 0x4e6   : > { %2228 = vmatprep.subr.bf16.mxu0 %v7164_v56  ;;  %6089 = vmatprep.subr.bf16.mxu1 %v8468_v9 }
 0x4e7   : > { %2246 = vmatprep.mubr.bf16.mxu0 %v8469_v53  ;;  %6091 = vmatprep.mubr.msk.bf16.mxu1 %vm6757_vm2, %v8468_v9 }
 0x4e9   : > { %2229 = vmatpush1.bf16.msra.mxu0 %v7177_v1  ;;  %6090 = vmatpush3.bf16.msra.mxu1 %v7171_v60 }
 0x4ea   : > { %2311 = vmatprep.subr.bf16.mxu0 %v7184_v2  ;;  %6095 = vmatprep.subr.bf16.mxu1 %v8468_v9 }
 0x59c   : > { %v2060_v26 = vpop.f32.mrf.mxu0  ;;  %v2101_v5 = vpop.f32.mrf.mxu1 }
 0x59d   : > { %v2061_v42 = vadd.f32 %v2060_v26, %v7196_v12 }
 0x59e   : > { %v2062_v21 = vpop.f32.mrf.mxu0  ;;  %v6077_v43 = vpop.f32.mrf.mxu1 }
 0x59f   : > { %v2063_v47 = vadd.f32 %v2062_v21, %v7200_v3 }
 0x5a0   : > { %v2064_v4 = vpop.f32.mrf.mxu0  ;;  %v2104_v8 = vpop.f32.mrf.mxu1 }
 0x5a1   : > { %v2102_v8 = vadd.f32 %v2101_v5, %v7209_v49  ;;  %v8478_v5 = vld [vmem:[#allocation9_spill] sm:$0xff] }
 0x5a2   : > { %v2065_v10 = vpop.f32.mrf.mxu0  ;;  %v6078_v39 = vpop.f32.mrf.mxu1 }
 0x5a4   : > { %v2141_v25 = vpop.f32.mrf.mxu0  ;;  %v2182_v59 = vpop.f32.mrf.mxu1 }
 0x5a5   : > { %v2188_v28 = vadd.f32 %v2141_v25, %v2061_v42  ;;  %v2202_v43 = vadd.f32 %v7206_v11, %v2182_v59 }
 0x5a6   : > { %v2143_v22 = vpop.f32.mrf.mxu0  ;;  %v6085_v27 = vpop.f32.mrf.mxu1 }
 0x5a7   : > { %v5699_v31 = vmul.f32 -1.442695, %v2188_v28  ;;  %v2195_v55 = vadd.f32 %v2143_v22, %v2063_v47 }
 0x5a8   : > { %v2145_v33 = vpop.f32.mrf.mxu0  ;;  %v2185_v23 = vpop.f32.mrf.mxu1 }
 0x5a9   : > { %6463 = vpow2.f32 %v5699_v31  ;;  %v5700_v58 = vmul.f32 -1.442695, %v2195_v55 }
 0x5aa   : > { %v2146_v13 = vpop.f32.mrf.mxu0  ;;  %v6086_v20 = vpop.f32.mrf.mxu1 }
 0x5ab   : > { %6465 = vpow2.f32 %v5700_v58  ;;  %v8479_v58 = vld [vmem:[#allocation30_spill] sm:$0xff] }
 0x5b6   : > { %v6464_v40 = vpop.eup %6463 }
 0x5b7   : > { %v2192_v50 = vadd.f32 1.0, %v6464_v40 }
 0x5b8   : > { %v6466_v19 = vpop.eup %6465 }
 0x5b9   : > { %6467 = vrcp.f32 %v2192_v50  ;;  %v2199_v26 = vadd.f32 1.0, %v6466_v19 }
 0x5bb   : > { %6469 = vrcp.f32 %v2199_v26 }
 0x5c6   : > { %v6468_v4 = vpop.eup %6467 }
 0x5c7   : > { %v2203_v10 = vmul.f32 %v6468_v4, %v2202_v43 }
 0x5c8   : > { %v6470_v21 = vpop.eup %6469 }
 0x5c9   : > { %v2204_v39 = vadd.f32 %v2203_v10, %v2102_v8  ;;  %v2206_v42 = vsub.f32 1.0, %v6470_v21  ;;  %v2208_v22 = vmul.f32 %v6470_v21, %v7213_v36  ;;  %v2295_v36 = vpack.c.bf16 %v7314_v51, %v7314_v51 }
 0x5cb   : > { %6471 = vtanh.f32 %v2204_v39 }
 0x5d8   : > { %v6472_v25 = vpop.eup %6471 }
 0x5d9   : > { %v2207_v28 = vmul.f32 %v6472_v25, %v2206_v42 }
 0x5db   : > { %v7358_v27 = vadd.f32 %v2208_v22, %v2207_v28 }
 0x5dd   : > { %v7362_v31 = vpack.c.bf16 %v7358_v27, %v7358_v27 }
 0x5df   : > { %5701 = vmatmul.mubr.msk.bf16.vlgmr.msra.gmra.mxu0 %vm861_vm5, %v7362_v31  ;;  %6092 = vmatmul.mubr.msk.bf16.vlgmr.msra.gmra.mxu1 %vm861_vm5, %v7362_v31 }
 0x5e0   : > { %2312 = vmatpush1.bf16.msra.mxu0 %v7218_v63  ;;  %6096 = vmatpush3.bf16.msra.mxu1 %v7223_v38 }
 0x5e1   : > { %2313 = vmatprep.subr.bf16.mxu0 %v7232_v7  ;;  %6097 = vmatprep.subr.bf16.mxu1 %v8468_v9 }
 0x5e2   : > { %2331 = vmatprep.mubr.bf16.mxu0 %v8469_v53  ;;  %6099 = vmatprep.mubr.msk.bf16.mxu1 %vm6757_vm2, %v8468_v9 }
 0x5e4   : > { %2314 = vmatpush1.bf16.msra.mxu0 %v7243_v57  ;;  %6098 = vmatpush3.bf16.msra.mxu1 %v7248_v34 }
 0x5e5   : > { %2414 = vmatprep.subr.bf16.mxu0 %v6922_v37  ;;  %6103 = vmatprep.subr.bf16.mxu1 %v8468_v9  ;;  %v8472_v37 = vld [vmem:[#allocation3_spill] sm:$0xff] }
 0x5e7   : > { %5703 = vmatmul.mubr.msk.bf16.vlgmr.msra.gmra.mxu0 %vm861_vm5, %v2295_v36  ;;  %6100 = vmatmul.mubr.msk.bf16.vlgmr.msra.gmra.mxu1 %vm861_vm5, %v2295_v36 }
 0x5e8   : > { %2415 = vmatpush1.bf16.msra.mxu0 %v6931_v61  ;;  %6104 = vmatpush3.bf16.msra.mxu1 %v6959_v15  ;;  %v8473_v61 = vld [vmem:[#allocation4_spill] sm:$0xff]  ;;  %v8475_v15 = vld [vmem:[#allocation6_spill] sm:$0xff] }
 0x5e9   : > { %2416 = vmatprep.subr.bf16.mxu0 %v6936_v0  ;;  %6105 = vmatprep.subr.bf16.mxu1 %v8468_v9  ;;  %v8474_v0 = vld [vmem:[#allocation5_spill] sm:$0xff] }
 0x5ea   : > { %2434 = vmatprep.mubr.bf16.mxu0 %v8469_v53  ;;  %6107 = vmatprep.mubr.msk.bf16.mxu1 %vm6757_vm2, %v8468_v9 }
 0x5ec   : > { %2417 = vmatpush1.bf16.msra.mxu0 %v6946_v6  ;;  %6106 = vmatpush3.bf16.msra.mxu1 %v6968_v16  ;;  %v8476_v6 = vld [vmem:[#allocation7_spill] sm:$0xff]  ;;  %v8477_v16 = vld [vmem:[#allocation8_spill] sm:$0xff] }
 0x5ed   : > { %2521 = vmatprep.subr.bf16.mxu0 %v8472_v37  ;;  %6111 = vmatprep.subr.bf16.mxu1 %v8468_v9  ;;  %v8480_v37 = vld [vmem:[#allocation14_spill] sm:$0xff] }
 0x5ef   : > { %5707 = vmatmul.mubr.msk.bf16.vlgmr.msra.gmra.mxu0 %vm861_vm5, %v7321_v44  ;;  %6108 = vmatmul.mubr.msk.bf16.vlgmr.msra.gmra.mxu1 %vm861_vm5, %v7321_v44 }
 0x5f0   : > { %2522 = vmatpush1.bf16.msra.mxu0 %v8473_v61  ;;  %6112 = vmatpush3.bf16.msra.mxu1 %v8474_v0 }
 0x5f1   : > { %2523 = vmatprep.subr.bf16.mxu0 %v8475_v15  ;;  %6113 = vmatprep.subr.bf16.mxu1 %v8468_v9 }
 0x5f2   : > { %2541 = vmatprep.mubr.bf16.mxu0 %v8469_v53  ;;  %6115 = vmatprep.mubr.msk.bf16.mxu1 %vm6757_vm2, %v8468_v9 }
 0x5f4   : > { %2524 = vmatpush1.bf16.msra.mxu0 %v8476_v6  ;;  %6114 = vmatpush3.bf16.msra.mxu1 %v8477_v16 }
 0x5f5   : > { %2602 = vmatprep.subr.bf16.mxu0 %v8478_v5  ;;  %6119 = vmatprep.subr.bf16.mxu1 %v8468_v9 }
 0x69f   : > { %v2248_v44 = vpop.f32.mrf.mxu0  ;;  %v2289_v59 = vpop.f32.mrf.mxu1 }
 0x6a0   : > { %v2249_v40 = vadd.f32 %v2248_v44, %v8479_v58 }
 0x6a1   : > { %v2250_v33 = vpop.f32.mrf.mxu0  ;;  %v6093_v23 = vpop.f32.mrf.mxu1 }
 0x6a2   : > { %v2251_v26 = vadd.f32 %v2250_v33, %v7294_v14 }
 0x6a3   : > { %v2252_v47 = vpop.f32.mrf.mxu0  ;;  %v2292_v13 = vpop.f32.mrf.mxu1 }
 0x6a4   : > { %v8481_v47 = vld [vmem:[#allocation16_spill] sm:$0xff] }
 0x6a5   : > { %v2253_v20 = vpop.f32.mrf.mxu0  ;;  %v6094_v55 = vpop.f32.mrf.mxu1 }
 0x6a7   : > { %v2333_v50 = vpop.f32.mrf.mxu0  ;;  %v2374_v19 = vpop.f32.mrf.mxu1 }
 0x6a8   : > { %v2380_v43 = vadd.f32 %v2333_v50, %v2249_v40 }
 0x6a9   : > { %v2335_v4 = vpop.f32.mrf.mxu0  ;;  %v6101_v8 = vpop.f32.mrf.mxu1 }
 0x6aa   : > { %v5705_v10 = vmul.f32 -1.442695, %v2380_v43  ;;  %v2387_v39 = vadd.f32 %v2335_v4, %v2251_v26  ;;  %v2394_v8 = vadd.f32 %v7304_v17, %v2374_v19 }
 0x6ab   : > { %v2337_v21 = vpop.f32.mrf.mxu0  ;;  %v2377_v42 = vpop.f32.mrf.mxu1 }
 0x6ac   : > { %6473 = vpow2.f32 %v5705_v10  ;;  %v5706_v6 = vmul.f32 -1.442695, %v2387_v39  ;;  %v2290_v39 = vadd.f32 %v2289_v59, %v7307_v18 }
 0x6ad   : > { %v2338_v25 = vpop.f32.mrf.mxu0  ;;  %v6102_v28 = vpop.f32.mrf.mxu1 }
 0x6af   : > { %v2436_v22 = vpop.f32.mrf.mxu0  ;;  %v2477_v36 = vpop.f32.mrf.mxu1 }
 0x6b0   : > { %v2483_v61 = vadd.f32 %v2436_v22, %v8480_v37  ;;  %v2497_v22 = vadd.f32 %v7092_v62, %v2477_v36 }
 0x6b1   : > { %v2438_v0 = vpop.f32.mrf.mxu0  ;;  %v6109_v15 = vpop.f32.mrf.mxu1 }
 0x6b2   : > { %v5709_v16 = vmul.f32 -1.442695, %v2483_v61  ;;  %v2490_v13 = vadd.f32 %v2438_v0, %v8481_v47  ;;  %v8482_v0 = vld [vmem:[#allocation11_spill] sm:$0xff] }
 0x6b3   : > { %v2440_v5 = vpop.f32.mrf.mxu0  ;;  %v2480_v44 = vpop.f32.mrf.mxu1 }
 0x6b4   : > { %6475 = vpow2.f32 %v5709_v16  ;;  %v5710_v40 = vmul.f32 -1.442695, %v2490_v13 }
 0x6b5   : > { %v2441_v33 = vpop.f32.mrf.mxu0  ;;  %v6110_v23 = vpop.f32.mrf.mxu1  ;;  %6477 = vpow2.f32 %v5706_v6 }
 0x6b9   : > { %v6474_v20 = vpop.eup %6473 }
 0x6ba   : > { %v2384_v55 = vadd.f32 1.0, %v6474_v20 }
 0x6bc   : > { %6479 = vrcp.f32 %v2384_v55 }
 0x6bd   : > { %6481 = vpow2.f32 %v5710_v40 }
 0x6c1   : > { %v6476_v50 = vpop.eup %6475 }
 0x6c2   : > { %v2487_v26 = vadd.f32 1.0, %v6476_v50  ;;  %v6478_v43 = vpop.eup %6477 }
 0x6c3   : > { %v2391_v4 = vadd.f32 1.0, %v6478_v43 }
 0x6c4   : > { %6483 = vrcp.f32 %v2487_v26 }
 0x6c5   : > { %6485 = vrcp.f32 %v2391_v4 }
 0x6c9   : > { %v6480_v10 = vpop.eup %6479 }
 0x6ca   : > { %v2395_v21 = vmul.f32 %v6480_v10, %v2394_v8  ;;  %v6482_v42 = vpop.eup %6481 }
 0x6cb   : > { %v2494_v28 = vadd.f32 1.0, %v6482_v42 }
 0x6cc   : > { %v2396_v25 = vadd.f32 %v2395_v21, %v2290_v39 }
 0x6ce   : > { %6487 = vtanh.f32 %v2396_v25 }
 0x6cf   : > { %6489 = vrcp.f32 %v2494_v28 }
 0x6d1   : > { %v6484_v37 = vpop.eup %6483 }
 0x6d2   : > { %v2498_v61 = vmul.f32 %v6484_v37, %v2497_v22  ;;  %v6486_v6 = vpop.eup %6485 }
 0x6d3   : > { %v2398_v16 = vsub.f32 1.0, %v6486_v6  ;;  %v2400_v59 = vmul.f32 %v6486_v6, %v7314_v51 }
 0x6d4   : > { %v2499_v15 = vadd.f32 %v2498_v61, %v8482_v0 }
 0x6d6   : > { %6491 = vtanh.f32 %v2499_v15 }
 0x6db   : > { %v6488_v19 = vpop.eup %6487 }
 0x6dc   : > { %v2399_v5 = vmul.f32 %v6488_v19, %v2398_v16  ;;  %v6490_v33 = vpop.eup %6489 }
 0x6dd   : > { %v2501_v23 = vsub.f32 1.0, %v6490_v33  ;;  %v2503_v62 = vmul.f32 %v6490_v33, %v7317_v30 }
 0x6de   : > { %v7418_v44 = vadd.f32 %v2400_v59, %v2399_v5 }
 0x6e0   : > { %8483 = vst [vmem:[#allocation3_spill] sm:$0xff] %v7418_v44 }
 0x6e3   : > { %v6492_v47 = vpop.eup %6491 }
 0x6e4   : > { %v2502_v13 = vmul.f32 %v6492_v47, %v2501_v23  ;;  %v7529_v23 = vld [vmem:[%s8405_s7 + $0x4c] ss:$12 sps:$4 sm:$0xff]   ;;  %v7540_v47 = vld [vmem:[%s8405_s7 + $0x48] ss:$12 sps:$4 sm:$0xff]  }
 0x6e6   : > { %v7421_v36 = vadd.f32 %v2503_v62, %v2502_v13  ;;  %v7546_v13 = vld [vmem:[%s8405_s7 + $0x50] ss:$12 sps:$4 sm:$0xff]   ;;  %v7552_v62 = vld [vmem:[%s8405_s7 + $0x34] ss:$12 sps:$4 sm:$0xff]  }
 0x6e8   : > { %v7425_v20 = vpack.c.bf16 %v7421_v36, %v7421_v36 }
 0x6ea   : > { %5711 = vmatmul.mubr.msk.bf16.vlgmr.msra.gmra.mxu0 %vm861_vm5, %v7425_v20  ;;  %6116 = vmatmul.mubr.msk.bf16.vlgmr.msra.gmra.mxu1 %vm861_vm5, %v7425_v20 }
 0x6eb   : > { %2603 = vmatpush1.bf16.msra.mxu0 %v7101_v32  ;;  %6120 = vmatpush3.bf16.msra.mxu1 %v7115_v41 }
 0x6ec   : > { %2604 = vmatprep.subr.bf16.mxu0 %v7110_v35  ;;  %6121 = vmatprep.subr.bf16.mxu1 %v8468_v9 }
 0x6ed   : > { %2622 = vmatprep.mubr.bf16.mxu0 %v8469_v53  ;;  %6123 = vmatprep.mubr.msk.bf16.mxu1 %vm6757_vm2, %v8468_v9 }
 0x6ef   : > { %2605 = vmatpush1.bf16.msra.mxu0 %v7125_v45  ;;  %6122 = vmatpush3.bf16.msra.mxu1 %v7133_v48 }
 0x6f0   : > { %2709 = vmatprep.subr.bf16.mxu0 %v7149_v52  ;;  %6127 = vmatprep.subr.bf16.mxu1 %v8468_v9 }
 0x6f2   : > { %5713 = vmatmul.mubr.msk.bf16.vlgmr.msra.gmra.mxu0 %vm861_vm5, %v7362_v31  ;;  %6124 = vmatmul.mubr.msk.bf16.vlgmr.msra.gmra.mxu1 %vm861_vm5, %v7362_v31 }
 0x6f3   : > { %2710 = vmatpush1.bf16.msra.mxu0 %v7154_v24  ;;  %6128 = vmatpush3.bf16.msra.mxu1 %v7159_v54 }
 0x6f4   : > { %2711 = vmatprep.subr.bf16.mxu0 %v7164_v56  ;;  %6129 = vmatprep.subr.bf16.mxu1 %v8468_v9 }
 0x6f5   : > { %2729 = vmatprep.mubr.bf16.mxu0 %v8469_v53  ;;  %6131 = vmatprep.mubr.msk.bf16.mxu1 %vm6757_vm2, %v8468_v9 }
 0x6f7   : > { %2712 = vmatpush1.bf16.msra.mxu0 %v7177_v1  ;;  %6130 = vmatpush3.bf16.msra.mxu1 %v7171_v60 }
 0x6f8   : > { %2794 = vmatprep.subr.bf16.mxu0 %v7184_v2  ;;  %6135 = vmatprep.subr.bf16.mxu1 %v8468_v9 }
 0x7aa   : > { %v2543_v32 = vpop.f32.mrf.mxu0  ;;  %v2584_v35 = vpop.f32.mrf.mxu1 }
 0x7ab   : > { %v2544_v56 = vadd.f32 %v2543_v32, %v7196_v12  ;;  %v2585_v37 = vadd.f32 %v2584_v35, %v7209_v49  ;;  %v7568_v32 = vld [vmem:[%s8405_s7 + $0x38] ss:$12 sps:$4 sm:$0xff]  }
 0x7ac   : > { %v2545_v41 = vpop.f32.mrf.mxu0  ;;  %v6117_v45 = vpop.f32.mrf.mxu1  ;;  %8485 = vst [vmem:[#allocation5_spill] sm:$0xff] %v7568_v32  ;;  %v7574_v35 = vld [vmem:[%s8406_s8 + $0x4c] ss:$12 sps:$4 sm:$0xff]  }
 0x7ad   : > { %v2546_v26 = vadd.f32 %v2545_v41, %v7200_v3  ;;  %8486 = vst [vmem:[#allocation6_spill] sm:$0xff] %v7574_v35 }
 0x7ae   : > { %v2547_v48 = vpop.f32.mrf.mxu0  ;;  %v2587_v52 = vpop.f32.mrf.mxu1 }
 0x7b0   : > { %v2548_v24 = vpop.f32.mrf.mxu0  ;;  %v6118_v54 = vpop.f32.mrf.mxu1 }
 0x7b2   : > { %v2624_v30 = vpop.f32.mrf.mxu0  ;;  %v2665_v31 = vpop.f32.mrf.mxu1 }
 0x7b3   : > { %v2671_v55 = vadd.f32 %v2624_v30, %v2544_v56  ;;  %v2685_v28 = vadd.f32 %v7206_v11, %v2665_v31  ;;  %v7484_v11 = vld [vmem:[%s8406_s8 + $0x1c] ss:$12 sps:$4 sm:$0xff]  }
 0x7b4   : > { %v2626_v1 = vpop.f32.mrf.mxu0  ;;  %v6125_v40 = vpop.f32.mrf.mxu1 }
 0x7b5   : > { %v5715_v60 = vmul.f32 -1.442695, %v2671_v55  ;;  %v2678_v8 = vadd.f32 %v2626_v1, %v2546_v26 }
 0x7b6   : > { %v2628_v50 = vpop.f32.mrf.mxu0  ;;  %v2668_v2 = vpop.f32.mrf.mxu1 }
 0x7b7   : > { %6493 = vpow2.f32 %v5715_v60  ;;  %v5716_v10 = vmul.f32 -1.442695, %v2678_v8 }
 0x7b8   : > { %v2629_v43 = vpop.f32.mrf.mxu0  ;;  %v6126_v4 = vpop.f32.mrf.mxu1 }
 0x7b9   : > { %6495 = vpow2.f32 %v5716_v10 }
 0x7c4   : > { %v6494_v39 = vpop.eup %6493 }
 0x7c5   : > { %v2675_v21 = vadd.f32 1.0, %v6494_v39 }
 0x7c6   : > { %v6496_v42 = vpop.eup %6495 }
 0x7c7   : > { %6497 = vrcp.f32 %v2675_v21  ;;  %v2682_v25 = vadd.f32 1.0, %v6496_v42 }
 0x7c9   : > { %6499 = vrcp.f32 %v2682_v25  ;;  %v8487_v25 = vld [vmem:[#allocation18_spill] sm:$0xff] }
 0x7d4   : > { %v6498_v22 = vpop.eup %6497 }
 0x7d5   : > { %v2686_v61 = vmul.f32 %v6498_v22, %v2685_v28 }
 0x7d6   : > { %v6500_v15 = vpop.eup %6499 }
 0x7d7   : > { %v2687_v0 = vadd.f32 %v2686_v61, %v2585_v37  ;;  %v2689_v6 = vsub.f32 1.0, %v6500_v15  ;;  %v2691_v5 = vmul.f32 %v6500_v15, %v7358_v27  ;;  %v7523_v27 = vld [vmem:[%s8406_s8 + $0x8] ss:$12 sps:$4 sm:$0xff]  }
 0x7d9   : > { %6501 = vtanh.f32 %v2687_v0 }
 0x7e6   : > { %v6502_v16 = vpop.eup %6501 }
 0x7e7   : > { %v2690_v19 = vmul.f32 %v6502_v16, %v2689_v6  ;;  %v8488_v16 = vld [vmem:[#allocation20_spill] sm:$0xff] }
 0x7e9   : > { %v7462_v59 = vadd.f32 %v2691_v5, %v2690_v19  ;;  %v1087_v19 = vadd.f32 %v8488_v16, %v7050_v46 }
 0x7eb   : > { %v7466_v33 = vpack.c.bf16 %v7462_v59, %v7462_v59 }
 0x7ed   : > { %5717 = vmatmul.mubr.msk.bf16.vlgmr.msra.gmra.mxu0 %vm861_vm5, %v7466_v33  ;;  %6132 = vmatmul.mubr.msk.bf16.vlgmr.msra.gmra.mxu1 %vm861_vm5, %v7466_v33 }
 0x7ee   : > { %2795 = vmatpush1.bf16.msra.mxu0 %v7218_v63  ;;  %6136 = vmatpush3.bf16.msra.mxu1 %v7223_v38  ;;  %v2778_v63 = vpack.c.bf16 %v7418_v44, %v7418_v44  ;;  %v7495_v38 = vld [vmem:[%s8406_s8 + $0x18] ss:$12 sps:$4 sm:$0xff]  }
 0x7ef   : > { %2796 = vmatprep.subr.bf16.mxu0 %v7232_v7  ;;  %6137 = vmatprep.subr.bf16.mxu1 %v8468_v9  ;;  %v7501_v7 = vld [vmem:[%s8406_s8 + $0x20] ss:$12 sps:$4 sm:$0xff]  }
 0x7f0   : > { %2814 = vmatprep.mubr.bf16.mxu0 %v8469_v53  ;;  %6139 = vmatprep.mubr.msk.bf16.mxu1 %vm6757_vm2, %v8468_v9 }
 0x7f2   : > { %2797 = vmatpush1.bf16.msra.mxu0 %v7243_v57  ;;  %6138 = vmatpush3.bf16.msra.mxu1 %v7248_v34  ;;  %v7507_v57 = vld [vmem:[%s8406_s8 + $0x4] ss:$12 sps:$4 sm:$0xff]   ;;  %v7517_v34 = vld [vmem:[%s8406_s8] ss:$12 sps:$4 sm:$0xff]  }
 0x7f3   : > { %2897 = vmatprep.subr.bf16.mxu0 %v7484_v11  ;;  %6143 = vmatprep.subr.bf16.mxu1 %v8468_v9 }
 0x7f5   : > { %5719 = vmatmul.mubr.msk.bf16.vlgmr.msra.gmra.mxu0 %vm861_vm5, %v2778_v63  ;;  %6140 = vmatmul.mubr.msk.bf16.vlgmr.msra.gmra.mxu1 %vm861_vm5, %v2778_v63 }
 0x7f6   : > { %2898 = vmatpush1.bf16.msra.mxu0 %v7495_v38  ;;  %6144 = vmatpush3.bf16.msra.mxu1 %v7501_v7 }
 0x7f7   : > { %2899 = vmatprep.subr.bf16.mxu0 %v7507_v57  ;;  %6145 = vmatprep.subr.bf16.mxu1 %v8468_v9 }
 0x7f8   : > { %2917 = vmatprep.mubr.bf16.mxu0 %v8469_v53  ;;  %6147 = vmatprep.mubr.msk.bf16.mxu1 %vm6757_vm2, %v8468_v9 }
 0x7fa   : > { %2900 = vmatpush1.bf16.msra.mxu0 %v7517_v34  ;;  %6146 = vmatpush3.bf16.msra.mxu1 %v7523_v27 }
 0x7fb   : > { %3004 = vmatprep.subr.bf16.mxu0 %v7529_v23  ;;  %6151 = vmatprep.subr.bf16.mxu1 %v8468_v9 }
 0x7fd   : > { %5723 = vmatmul.mubr.msk.bf16.vlgmr.msra.gmra.mxu0 %vm861_vm5, %v7425_v20  ;;  %6148 = vmatmul.mubr.msk.bf16.vlgmr.msra.gmra.mxu1 %vm861_vm5, %v7425_v20  ;;  %v7562_v20 = vld [vmem:[%s8405_s7 + $0x30] ss:$12 sps:$4 sm:$0xff]  }
 0x7fe   : > { %3005 = vmatpush1.bf16.msra.mxu0 %v7540_v47  ;;  %6152 = vmatpush3.bf16.msra.mxu1 %v7546_v13  ;;  %8484 = vst [vmem:[#allocation4_spill] sm:$0xff] %v7562_v20 }
 0x7ff   : > { %3006 = vmatprep.subr.bf16.mxu0 %v7552_v62  ;;  %6153 = vmatprep.subr.bf16.mxu1 %v8468_v9 }
 0x800   : > { %3024 = vmatprep.mubr.bf16.mxu0 %v8469_v53  ;;  %6155 = vmatprep.mubr.msk.bf16.mxu1 %vm6757_vm2, %v8468_v9 }
 0x802   : > { %3007 = vmatpush1.bf16.msra.mxu0 %v7562_v20  ;;  %6154 = vmatpush3.bf16.msra.mxu1 %v7568_v32 }
 0x803   : > { %3085 = vmatprep.subr.bf16.mxu0 %v7574_v35  ;;  %6159 = vmatprep.subr.bf16.mxu1 %v8468_v9 }
 0x8ad   : > { %v2731_v41 = vpop.f32.mrf.mxu0  ;;  %v2772_v45 = vpop.f32.mrf.mxu1 }
 0x8ae   : > { %v2732_v31 = vadd.f32 %v2731_v41, %v8479_v58 }
 0x8af   : > { %v2733_v48 = vpop.f32.mrf.mxu0  ;;  %v6133_v52 = vpop.f32.mrf.mxu1 }
 0x8b0   : > { %v2734_v40 = vadd.f32 %v2733_v48, %v7294_v14 }
 0x8b1   : > { %v2735_v24 = vpop.f32.mrf.mxu0  ;;  %v2775_v54 = vpop.f32.mrf.mxu1 }
 0x8b3   : > { %v2736_v56 = vpop.f32.mrf.mxu0  ;;  %v6134_v30 = vpop.f32.mrf.mxu1 }
 0x8b5   : > { %v2816_v55 = vpop.f32.mrf.mxu0  ;;  %v2857_v1 = vpop.f32.mrf.mxu1 }
 0x8b6   : > { %v2863_v60 = vadd.f32 %v2816_v55, %v2732_v31  ;;  %v2877_v55 = vadd.f32 %v7304_v17, %v2857_v1  ;;  %v8489_v17 = vld [vmem:[#allocation12_spill] sm:$0xff] }
 0x8b7   : > { %v2818_v50 = vpop.f32.mrf.mxu0  ;;  %v6141_v2 = vpop.f32.mrf.mxu1 }
 0x8b8   : > { %v5721_v26 = vmul.f32 -1.442695, %v2863_v60  ;;  %v2870_v43 = vadd.f32 %v2818_v50, %v2734_v40  ;;  %v2773_v60 = vadd.f32 %v2772_v45, %v7307_v18 }
 0x8b9   : > { %v2820_v4 = vpop.f32.mrf.mxu0  ;;  %v2860_v8 = vpop.f32.mrf.mxu1 }
 0x8ba   : > { %6503 = vpow2.f32 %v5721_v26  ;;  %v5722_v61 = vmul.f32 -1.442695, %v2870_v43  ;;  %v7588_v4 = vld [vmem:[%s8408_s10] ss:$0 sm:$0xff] }
 0x8bb   : > { %v2821_v10 = vpop.f32.mrf.mxu0  ;;  %v6142_v39 = vpop.f32.mrf.mxu1 }
 0x8bd   : > { %v2919_v21 = vpop.f32.mrf.mxu0  ;;  %v2960_v42 = vpop.f32.mrf.mxu1 }
 0x8be   : > { %v2966_v28 = vadd.f32 %v2919_v21, %v8487_v25  ;;  %v2980_v8 = vadd.f32 %v7588_v4, %v2960_v42 }
 0x8bf   : > { %v2921_v22 = vpop.f32.mrf.mxu0  ;;  %v6149_v37 = vpop.f32.mrf.mxu1 }
 0x8c0   : > { %v5725_v0 = vmul.f32 -1.442695, %v2966_v28  ;;  %v2973_v41 = vadd.f32 %v2921_v22, %v1087_v19 }
 0x8c1   : > { %v2923_v15 = vpop.f32.mrf.mxu0  ;;  %v2963_v6 = vpop.f32.mrf.mxu1 }
 0x8c2   : > { %6505 = vpow2.f32 %v5725_v0  ;;  %v5726_v24 = vmul.f32 -1.442695, %v2973_v41  ;;  %v7631_v41 = vld [vmem:[%s8406_s8 + $0x30] ss:$12 sps:$4 sm:$0xff]  }
 0x8c3   : > { %v2924_v5 = vpop.f32.mrf.mxu0  ;;  %v6150_v63 = vpop.f32.mrf.mxu1  ;;  %6507 = vpow2.f32 %v5722_v61 }
 0x8c4   : > { %v7609_v5 = vld [vmem:[%s8406_s8 + $0x48] ss:$12 sps:$4 sm:$0xff]  }
 0x8c5   : > { %v7621_v63 = vld [vmem:[%s8406_s8 + $0x34] ss:$12 sps:$4 sm:$0xff]  }
 0x8c7   : > { %v6504_v48 = vpop.eup %6503 }
 0x8c8   : > { %v2867_v52 = vadd.f32 1.0, %v6504_v48  ;;  %v7637_v48 = vld [vmem:[%s8406_s8 + $0x38] ss:$12 sps:$4 sm:$0xff]  }
 0x8ca   : > { %6509 = vrcp.f32 %v2867_v52  ;;  %v7643_v52 = vld [vmem:[%s8405_s7 + $0x7c] ss:$12 sps:$4 sm:$0xff]  }
 0x8cb   : > { %6511 = vpow2.f32 %v5726_v24  ;;  %v7654_v24 = vld [vmem:[%s8405_s7 + $0x78] ss:$12 sps:$4 sm:$0xff]  }
 0x8cf   : > { %v6506_v54 = vpop.eup %6505 }
 0x8d0   : > { %v2970_v56 = vadd.f32 1.0, %v6506_v54  ;;  %v6508_v30 = vpop.eup %6507  ;;  %v7660_v54 = vld [vmem:[%s8405_s7 + $0x80] ss:$12 sps:$4 sm:$0xff]  }
 0x8d1   : > { %v2874_v31 = vadd.f32 1.0, %v6508_v30  ;;  %v7682_v30 = vld [vmem:[%s8405_s7 + $0x68] ss:$12 sps:$4 sm:$0xff]  }
 0x8d2   : > { %6513 = vrcp.f32 %v2970_v56  ;;  %v7666_v56 = vld [vmem:[%s8405_s7 + $0x64] ss:$12 sps:$4 sm:$0xff]  }
 0x8d3   : > { %6515 = vrcp.f32 %v2874_v31  ;;  %v7688_v31 = vld [vmem:[%s8406_s8 + $0x7c] ss:$12 sps:$4 sm:$0xff]  }
 0x8d7   : > { %v6510_v40 = vpop.eup %6509 }
 0x8d8   : > { %v2878_v50 = vmul.f32 %v6510_v40, %v2877_v55  ;;  %v6512_v2 = vpop.eup %6511 }
 0x8d9   : > { %v2977_v43 = vadd.f32 1.0, %v6512_v2 }
 0x8da   : > { %v2879_v26 = vadd.f32 %v2878_v50, %v2773_v60 }
 0x8dc   : > { %6517 = vtanh.f32 %v2879_v26 }
 0x8dd   : > { %6519 = vrcp.f32 %v2977_v43 }
 0x8df   : > { %v6514_v10 = vpop.eup %6513 }
 0x8e0   : > { %v2981_v39 = vmul.f32 %v6514_v10, %v2980_v8  ;;  %v6516_v45 = vpop.eup %6515 }
 0x8e1   : > { %v2881_v21 = vsub.f32 1.0, %v6516_v45  ;;  %v2883_v22 = vmul.f32 %v6516_v45, %v7418_v44 }
 0x8e2   : > { %v2982_v1 = vadd.f32 %v2981_v39, %v8489_v17 }
 0x8e4   : > { %6521 = vtanh.f32 %v2982_v1 }
 0x8e9   : > { %v6518_v25 = vpop.eup %6517 }
 0x8ea   : > { %v2882_v28 = vmul.f32 %v6518_v25, %v2881_v21  ;;  %v6520_v61 = vpop.eup %6519 }
 0x8eb   : > { %v2984_v0 = vsub.f32 1.0, %v6520_v61  ;;  %v2986_v42 = vmul.f32 %v6520_v61, %v7421_v36  ;;  %v7615_v36 = vld [vmem:[%s8406_s8 + $0x50] ss:$12 sps:$4 sm:$0xff]  }
 0x8ec   : > { %v7593_v37 = vadd.f32 %v2883_v22, %v2882_v28 }
 0x8f1   : > { %v6522_v15 = vpop.eup %6521 }
 0x8f2   : > { %v2985_v6 = vmul.f32 %v6522_v15, %v2984_v0 }
 0x8f4   : > { %v7596_v16 = vadd.f32 %v2986_v42, %v2985_v6 }
 0x8f6   : > { %v7600_v19 = vpack.c.bf16 %v7596_v16, %v7596_v16 }
 0x8f8   : > { %5727 = vmatmul.mubr.msk.bf16.vlgmr.msra.gmra.mxu0 %vm861_vm5, %v7600_v19  ;;  %6156 = vmatmul.mubr.msk.bf16.vlgmr.msra.gmra.mxu1 %vm861_vm5, %v7600_v19 }
 0x8f9   : > { %3086 = vmatpush1.bf16.msra.mxu0 %v7609_v5  ;;  %6160 = vmatpush3.bf16.msra.mxu1 %v7615_v36 }
 0x8fa   : > { %3087 = vmatprep.subr.bf16.mxu0 %v7621_v63  ;;  %6161 = vmatprep.subr.bf16.mxu1 %v8468_v9 }
 0x8fb   : > { %3105 = vmatprep.mubr.bf16.mxu0 %v8469_v53  ;;  %6163 = vmatprep.mubr.msk.bf16.mxu1 %vm6757_vm2, %v8468_v9 }
 0x8fd   : > { %3088 = vmatpush1.bf16.msra.mxu0 %v7631_v41  ;;  %6162 = vmatpush3.bf16.msra.mxu1 %v7637_v48 }
 0x8fe   : > { %3192 = vmatprep.subr.bf16.mxu0 %v7643_v52  ;;  %6167 = vmatprep.subr.bf16.mxu1 %v8468_v9 }
 0x900   : > { %5729 = vmatmul.mubr.msk.bf16.vlgmr.msra.gmra.mxu0 %vm861_vm5, %v7466_v33  ;;  %6164 = vmatmul.mubr.msk.bf16.vlgmr.msra.gmra.mxu1 %vm861_vm5, %v7466_v33  ;;  %v7676_v33 = vld [vmem:[%s8405_s7 + $0x60] ss:$12 sps:$4 sm:$0xff]  }
 0x901   : > { %3193 = vmatpush1.bf16.msra.mxu0 %v7654_v24  ;;  %6168 = vmatpush3.bf16.msra.mxu1 %v7660_v54 }
 0x902   : > { %3194 = vmatprep.subr.bf16.mxu0 %v7666_v56  ;;  %6169 = vmatprep.subr.bf16.mxu1 %v8468_v9 }
 0x903   : > { %3212 = vmatprep.mubr.bf16.mxu0 %v8469_v53  ;;  %6171 = vmatprep.mubr.msk.bf16.mxu1 %vm6757_vm2, %v8468_v9 }
 0x905   : > { %3195 = vmatpush1.bf16.msra.mxu0 %v7676_v33  ;;  %6170 = vmatpush3.bf16.msra.mxu1 %v7682_v30 }
 0x906   : > { %3277 = vmatprep.subr.bf16.mxu0 %v7688_v31  ;;  %6175 = vmatprep.subr.bf16.mxu1 %v8468_v9 }
 0x9b8   : > { %v3026_v55 = vpop.f32.mrf.mxu0  ;;  %v3067_v40 = vpop.f32.mrf.mxu1 }
 0x9b9   : > { %v3027_v10 = vadd.f32 %v3026_v55, %v7196_v12 }
 0x9ba   : > { %v3028_v60 = vpop.f32.mrf.mxu0  ;;  %v6157_v50 = vpop.f32.mrf.mxu1 }
 0x9bb   : > { %v3029_v61 = vadd.f32 %v3028_v60, %v7200_v3  ;;  %v3068_v60 = vadd.f32 %v3067_v40, %v7209_v49  ;;  %v7715_v40 = vld [vmem:[%s8406_s8 + $0x78] ss:$12 sps:$4 sm:$0xff]  }
 0x9bc   : > { %v3030_v2 = vpop.f32.mrf.mxu0  ;;  %v3070_v26 = vpop.f32.mrf.mxu1 }
 0x9be   : > { %v3031_v43 = vpop.f32.mrf.mxu0  ;;  %v6158_v8 = vpop.f32.mrf.mxu1 }
 0x9bf   : > { %v7697_v43 = vld [vmem:[%s8408_s10 + $0x1] ss:$0 sm:$0xff] }
 0x9c0   : > { %v3107_v39 = vpop.f32.mrf.mxu0  ;;  %v3148_v17 = vpop.f32.mrf.mxu1 }
 0x9c1   : > { %v3154_v1 = vadd.f32 %v3107_v39, %v3027_v10  ;;  %v3168_v8 = vadd.f32 %v7697_v43, %v3148_v17  ;;  %v7727_v17 = vld [vmem:[%s8406_s8 + $0x64] ss:$12 sps:$4 sm:$0xff]  }
 0x9c2   : > { %v3109_v45 = vpop.f32.mrf.mxu0  ;;  %v6165_v21 = vpop.f32.mrf.mxu1 }
 0x9c3   : > { %v5731_v25 = vmul.f32 -1.442695, %v3154_v1  ;;  %v3161_v6 = vadd.f32 %v3109_v45, %v3029_v61 }
 0x9c4   : > { %v3111_v28 = vpop.f32.mrf.mxu0  ;;  %v3151_v22 = vpop.f32.mrf.mxu1 }
 0x9c5   : > { %6523 = vpow2.f32 %v5731_v25  ;;  %v5732_v42 = vmul.f32 -1.442695, %v3161_v6  ;;  %v7743_v6 = vld [vmem:[%s8406_s8 + $0x68] ss:$12 sps:$4 sm:$0xff]  }
 0x9c6   : > { %v3112_v0 = vpop.f32.mrf.mxu0  ;;  %v6166_v15 = vpop.f32.mrf.mxu1 }
 0x9c7   : > { %6525 = vpow2.f32 %v5732_v42  ;;  %v7737_v15 = vld [vmem:[%s8406_s8 + $0x60] ss:$12 sps:$4 sm:$0xff]   ;;  %v3261_v42 = vpack.c.bf16 %v7593_v37, %v7593_v37 }
 0x9d2   : > { %v6524_v50 = vpop.eup %6523 }
 0x9d3   : > { %v3158_v2 = vadd.f32 1.0, %v6524_v50 }
 0x9d4   : > { %v6526_v55 = vpop.eup %6525 }
 0x9d5   : > { %6527 = vrcp.f32 %v3158_v2  ;;  %v3165_v26 = vadd.f32 1.0, %v6526_v55 }
 0x9d7   : > { %6529 = vrcp.f32 %v3165_v26 }
 0x9e2   : > { %v6528_v10 = vpop.eup %6527 }
 0x9e3   : > { %v3169_v39 = vmul.f32 %v6528_v10, %v3168_v8 }
 0x9e4   : > { %v6530_v45 = vpop.eup %6529 }
 0x9e5   : > { %v3170_v1 = vadd.f32 %v3169_v39, %v3068_v60  ;;  %v3172_v21 = vsub.f32 1.0, %v6530_v45  ;;  %v3174_v22 = vmul.f32 %v6530_v45, %v7462_v59  ;;  %v7721_v59 = vld [vmem:[%s8406_s8 + $0x80] ss:$12 sps:$4 sm:$0xff]  }
 0x9e7   : > { %6531 = vtanh.f32 %v3170_v1 }
 0x9f4   : > { %v6532_v25 = vpop.eup %6531 }
 0x9f5   : > { %v3173_v28 = vmul.f32 %v6532_v25, %v3172_v21 }
 0x9f7   : > { %v7702_v61 = vadd.f32 %v3174_v22, %v3173_v28 }
 0x9f9   : > { %v7706_v0 = vpack.c.bf16 %v7702_v61, %v7702_v61 }
 0x9fb   : > { %5733 = vmatmul.mubr.msk.bf16.vlgmr.msra.gmra.mxu0 %vm861_vm5, %v7706_v0  ;;  %6172 = vmatmul.mubr.msk.bf16.vlgmr.msra.gmra.mxu1 %vm861_vm5, %v7706_v0 }
 0x9fc   : > { %3278 = vmatpush1.bf16.msra.mxu0 %v7715_v40  ;;  %6176 = vmatpush3.bf16.msra.mxu1 %v7721_v59 }
 0x9fd   : > { %3279 = vmatprep.subr.bf16.mxu0 %v7727_v17  ;;  %6177 = vmatprep.subr.bf16.mxu1 %v8468_v9 }
 0x9fe   : > { %3297 = vmatprep.mubr.bf16.mxu0 %v8469_v53  ;;  %6179 = vmatprep.mubr.msk.bf16.mxu1 %vm6757_vm2, %v8468_v9 }
 0xa00   : > { %3280 = vmatpush1.bf16.msra.mxu0 %v7737_v15  ;;  %6178 = vmatpush3.bf16.msra.mxu1 %v7743_v6 }
 0xa01   : > { %3380 = vmatprep.subr.bf16.mxu0 %v7484_v11  ;;  %6183 = vmatprep.subr.bf16.mxu1 %v8468_v9 }
 0xa03   : > { %5735 = vmatmul.mubr.msk.bf16.vlgmr.msra.gmra.mxu0 %vm861_vm5, %v3261_v42  ;;  %6180 = vmatmul.mubr.msk.bf16.vlgmr.msra.gmra.mxu1 %vm861_vm5, %v3261_v42 }
 0xa04   : > { %3381 = vmatpush1.bf16.msra.mxu0 %v7495_v38  ;;  %6184 = vmatpush3.bf16.msra.mxu1 %v7501_v7 }
 0xa05   : > { %3382 = vmatprep.subr.bf16.mxu0 %v7507_v57  ;;  %6185 = vmatprep.subr.bf16.mxu1 %v8468_v9 }
 0xa06   : > { %3400 = vmatprep.mubr.bf16.mxu0 %v8469_v53  ;;  %6187 = vmatprep.mubr.msk.bf16.mxu1 %vm6757_vm2, %v8468_v9 }
 0xa08   : > { %3383 = vmatpush1.bf16.msra.mxu0 %v7517_v34  ;;  %6186 = vmatpush3.bf16.msra.mxu1 %v7523_v27 }
 0xa09   : > { %3487 = vmatprep.subr.bf16.mxu0 %v7529_v23  ;;  %6191 = vmatprep.subr.bf16.mxu1 %v8468_v9 }
 0xa0b   : > { %5739 = vmatmul.mubr.msk.bf16.vlgmr.msra.gmra.mxu0 %vm861_vm5, %v7600_v19  ;;  %6188 = vmatmul.mubr.msk.bf16.vlgmr.msra.gmra.mxu1 %vm861_vm5, %v7600_v19 }
 0xa0c   : > { %3488 = vmatpush1.bf16.msra.mxu0 %v7540_v47  ;;  %6192 = vmatpush3.bf16.msra.mxu1 %v7546_v13 }
 0xa0d   : > { %3489 = vmatprep.subr.bf16.mxu0 %v7552_v62  ;;  %6193 = vmatprep.subr.bf16.mxu1 %v8468_v9 }
 0xa0e   : > { %3507 = vmatprep.mubr.bf16.mxu0 %v8469_v53  ;;  %6195 = vmatprep.mubr.msk.bf16.mxu1 %vm6757_vm2, %v8468_v9 }
 0xa10   : > { %3490 = vmatpush1.bf16.msra.mxu0 %v7562_v20  ;;  %6194 = vmatpush3.bf16.msra.mxu1 %v7568_v32 }
 0xa11   : > { %3568 = vmatprep.subr.bf16.mxu0 %v7574_v35  ;;  %6199 = vmatprep.subr.bf16.mxu1 %v8468_v9 }
 0xabb   : > { %v3214_v19 = vpop.f32.mrf.mxu0  ;;  %v3255_v50 = vpop.f32.mrf.mxu1 }
 0xabc   : > { %v3215_v39 = vadd.f32 %v3214_v19, %v8479_v58 }
 0xabd   : > { %v3216_v2 = vpop.f32.mrf.mxu0  ;;  %v6173_v55 = vpop.f32.mrf.mxu1 }
 0xabe   : > { %v3217_v21 = vadd.f32 %v3216_v2, %v7294_v14 }
 0xabf   : > { %v3218_v26 = vpop.f32.mrf.mxu0  ;;  %v3258_v8 = vpop.f32.mrf.mxu1 }
 0xac1   : > { %v3219_v10 = vpop.f32.mrf.mxu0  ;;  %v6174_v60 = vpop.f32.mrf.mxu1 }
 0xac2   : > { %v8490_v10 = vld [vmem:[#allocation22_spill] sm:$0xff] }
 0xac3   : > { %v3299_v1 = vpop.f32.mrf.mxu0  ;;  %v3340_v45 = vpop.f32.mrf.mxu1 }
 0xac4   : > { %v3346_v25 = vadd.f32 %v3299_v1, %v3215_v39 }
 0xac5   : > { %v3301_v28 = vpop.f32.mrf.mxu0  ;;  %v6181_v22 = vpop.f32.mrf.mxu1 }
 0xac6   : > { %v5737_v42 = vmul.f32 -1.442695, %v3346_v25  ;;  %v3353_v44 = vadd.f32 %v3301_v28, %v3217_v21  ;;  %v8491_v21 = vld [vmem:[#allocation23_spill] sm:$0xff] }
 0xac7   : > { %v3303_v51 = vpop.f32.mrf.mxu0  ;;  %v3343_v29 = vpop.f32.mrf.mxu1 }
 0xac8   : > { %6533 = vpow2.f32 %v5737_v42  ;;  %v5738_v58 = vmul.f32 -1.442695, %v3353_v44  ;;  %v7785_v44 = vld [vmem:[%s8408_s10 + $0x2] ss:$0 sm:$0xff] }
 0xac9   : > { %v3304_v46 = vpop.f32.mrf.mxu0  ;;  %v6182_v55 = vpop.f32.mrf.mxu1 }
 0xacb   : > { %v3402_v26 = vpop.f32.mrf.mxu0  ;;  %v3443_v8 = vpop.f32.mrf.mxu1 }
 0xacc   : > { %v3449_v60 = vadd.f32 %v3402_v26, %v8490_v10 }
 0xacd   : > { %v3404_v35 = vpop.f32.mrf.mxu0  ;;  %v6189_v19 = vpop.f32.mrf.mxu1 }
 0xace   : > { %v5741_v32 = vmul.f32 -1.442695, %v3449_v60  ;;  %v3456_v51 = vadd.f32 %v3404_v35, %v8491_v21  ;;  %v3463_v19 = vadd.f32 %v7588_v4, %v3443_v8 }
 0xacf   : > { %v3406_v20 = vpop.f32.mrf.mxu0  ;;  %v3446_v2 = vpop.f32.mrf.mxu1 }
 0xad0   : > { %6535 = vpow2.f32 %v5741_v32  ;;  %v5742_v46 = vmul.f32 -1.442695, %v3456_v51  ;;  %v3360_v20 = vadd.f32 %v7785_v44, %v3340_v45  ;;  %v3256_v32 = vadd.f32 %v3255_v50, %v7307_v18 }
 0xad1   : > { %v3407_v39 = vpop.f32.mrf.mxu0  ;;  %v6190_v1 = vpop.f32.mrf.mxu1  ;;  %6537 = vpow2.f32 %v5738_v58 }
 0xad2   : > { %v8492_v1 = vld [vmem:[#allocation17_spill] sm:$0xff] }
 0xad5   : > { %v6534_v29 = vpop.eup %6533 }
 0xad6   : > { %v3350_v25 = vadd.f32 1.0, %v6534_v29 }
 0xad8   : > { %6539 = vrcp.f32 %v3350_v25 }
 0xad9   : > { %6541 = vpow2.f32 %v5742_v46 }
 0xadd   : > { %v6536_v28 = vpop.eup %6535 }
 0xade   : > { %v3453_v22 = vadd.f32 1.0, %v6536_v28  ;;  %v6538_v42 = vpop.eup %6537 }
 0xadf   : > { %v3357_v55 = vadd.f32 1.0, %v6538_v42 }
 0xae0   : > { %6543 = vrcp.f32 %v3453_v22 }
 0xae1   : > { %6545 = vrcp.f32 %v3357_v55 }
 0xae5   : > { %v6540_v58 = vpop.eup %6539 }
 0xae6   : > { %v3361_v35 = vmul.f32 %v6540_v58, %v3360_v20  ;;  %v6542_v26 = vpop.eup %6541 }
 0xae7   : > { %v3460_v60 = vadd.f32 1.0, %v6542_v26 }
 0xae8   : > { %v3362_v10 = vadd.f32 %v3361_v35, %v3256_v32 }
 0xaea   : > { %6547 = vtanh.f32 %v3362_v10 }
 0xaeb   : > { %6549 = vrcp.f32 %v3460_v60 }
 0xaed   : > { %v6544_v2 = vpop.eup %6543 }
 0xaee   : > { %v3464_v39 = vmul.f32 %v6544_v2, %v3463_v19  ;;  %v6546_v51 = vpop.eup %6545 }
 0xaef   : > { %v3364_v29 = vsub.f32 1.0, %v6546_v51  ;;  %v3366_v50 = vmul.f32 %v6546_v51, %v7593_v37 }
 0xaf0   : > { %v3465_v21 = vadd.f32 %v3464_v39, %v8492_v1 }
 0xaf2   : > { %6551 = vtanh.f32 %v3465_v21 }
 0xaf7   : > { %v6548_v45 = vpop.eup %6547 }
 0xaf8   : > { %v3365_v25 = vmul.f32 %v6548_v45, %v3364_v29  ;;  %v6550_v28 = vpop.eup %6549 }
 0xaf9   : > { %v3467_v22 = vsub.f32 1.0, %v6550_v28  ;;  %v3469_v8 = vmul.f32 %v6550_v28, %v7596_v16 }
 0xafa   : > { %v7792_v46 = vadd.f32 %v3366_v50, %v3365_v25 }
 0xaff   : > { %v6552_v42 = vpop.eup %6551 }
 0xb00   : > { %v3468_v55 = vmul.f32 %v6552_v42, %v3467_v22 }
 0xb02   : > { %v7795_v20 = vadd.f32 %v3469_v8, %v3468_v55 }
 0xb04   : > { %v7799_v58 = vpack.c.bf16 %v7795_v20, %v7795_v20 }
 0xb06   : > { %5743 = vmatmul.mubr.msk.bf16.vlgmr.msra.gmra.mxu0 %vm861_vm5, %v7799_v58  ;;  %6196 = vmatmul.mubr.msk.bf16.vlgmr.msra.gmra.mxu1 %vm861_vm5, %v7799_v58 }
 0xb07   : > { %3569 = vmatpush1.bf16.msra.mxu0 %v7609_v5  ;;  %6200 = vmatpush3.bf16.msra.mxu1 %v7615_v36 }
 0xb08   : > { %3570 = vmatprep.subr.bf16.mxu0 %v7621_v63  ;;  %6201 = vmatprep.subr.bf16.mxu1 %v8468_v9 }
 0xb09   : > { %3588 = vmatprep.mubr.bf16.mxu0 %v8469_v53  ;;  %6203 = vmatprep.mubr.msk.bf16.mxu1 %vm6757_vm2, %v8468_v9 }
 0xb0b   : > { %3571 = vmatpush1.bf16.msra.mxu0 %v7631_v41  ;;  %6202 = vmatpush3.bf16.msra.mxu1 %v7637_v48 }
 0xb0c   : > { %3675 = vmatprep.subr.bf16.mxu0 %v7643_v52  ;;  %6207 = vmatprep.subr.bf16.mxu1 %v8468_v9 }
 0xb0e   : > { %5745 = vmatmul.mubr.msk.bf16.vlgmr.msra.gmra.mxu0 %vm861_vm5, %v7706_v0  ;;  %6204 = vmatmul.mubr.msk.bf16.vlgmr.msra.gmra.mxu1 %vm861_vm5, %v7706_v0 }
 0xb0f   : > { %3676 = vmatpush1.bf16.msra.mxu0 %v7654_v24  ;;  %6208 = vmatpush3.bf16.msra.mxu1 %v7660_v54 }
 0xb10   : > { %3677 = vmatprep.subr.bf16.mxu0 %v7666_v56  ;;  %6209 = vmatprep.subr.bf16.mxu1 %v8468_v9 }
 0xb11   : > { %3695 = vmatprep.mubr.bf16.mxu0 %v8469_v53  ;;  %6211 = vmatprep.mubr.msk.bf16.mxu1 %vm6757_vm2, %v8468_v9 }
 0xb13   : > { %3678 = vmatpush1.bf16.msra.mxu0 %v7676_v33  ;;  %6210 = vmatpush3.bf16.msra.mxu1 %v7682_v30 }
 0xb14   : > { %3760 = vmatprep.subr.bf16.mxu0 %v7688_v31  ;;  %6215 = vmatprep.subr.bf16.mxu1 %v8468_v9 }
 0xbc6   : > { %v3509_v16 = vpop.f32.mrf.mxu0  ;;  %v3550_v0 = vpop.f32.mrf.mxu1 }
 0xbc7   : > { %v3510_v2 = vadd.f32 %v3509_v16, %v7196_v12 }
 0xbc8   : > { %v3511_v32 = vpop.f32.mrf.mxu0  ;;  %v6197_v35 = vpop.f32.mrf.mxu1 }
 0xbc9   : > { %v3512_v28 = vadd.f32 %v3511_v32, %v7200_v3 }
 0xbca   : > { %v3513_v26 = vpop.f32.mrf.mxu0  ;;  %v3553_v10 = vpop.f32.mrf.mxu1 }
 0xbcc   : > { %v3514_v60 = vpop.f32.mrf.mxu0  ;;  %v6198_v19 = vpop.f32.mrf.mxu1 }
 0xbce   : > { %v3590_v39 = vpop.f32.mrf.mxu0  ;;  %v3631_v1 = vpop.f32.mrf.mxu1 }
 0xbcf   : > { %v3637_v21 = vadd.f32 %v3590_v39, %v3510_v2  ;;  %v3651_v60 = vadd.f32 %v7697_v43, %v3631_v1  ;;  %v3551_v2 = vadd.f32 %v3550_v0, %v7209_v49  ;;  %v8496_v0 = vld [vmem:[#allocation30_spill] sm:$0xff] }
 0xbd0   : > { %v3592_v51 = vpop.f32.mrf.mxu0  ;;  %v6205_v29 = vpop.f32.mrf.mxu1 }
 0xbd1   : > { %v5747_v45 = vmul.f32 -1.442695, %v3637_v21  ;;  %v3644_v55 = vadd.f32 %v3592_v51, %v3512_v28 }
 0xbd2   : > { %v3594_v25 = vpop.f32.mrf.mxu0  ;;  %v3634_v50 = vpop.f32.mrf.mxu1 }
 0xbd3   : > { %6553 = vpow2.f32 %v5747_v45  ;;  %v5748_v8 = vmul.f32 -1.442695, %v3644_v55 }
 0xbd4   : > { %v3595_v22 = vpop.f32.mrf.mxu0  ;;  %v6206_v42 = vpop.f32.mrf.mxu1 }
 0xbd5   : > { %6555 = vpow2.f32 %v5748_v8 }
 0xbe0   : > { %v6554_v35 = vpop.eup %6553 }
 0xbe1   : > { %v3641_v26 = vadd.f32 1.0, %v6554_v35 }
 0xbe2   : > { %v6556_v16 = vpop.eup %6555 }
 0xbe3   : > { %6557 = vrcp.f32 %v3641_v26  ;;  %v3648_v10 = vadd.f32 1.0, %v6556_v16 }
 0xbe5   : > { %6559 = vrcp.f32 %v3648_v10 }
 0xbf0   : > { %v6558_v19 = vpop.eup %6557 }
 0xbf1   : > { %v3652_v39 = vmul.f32 %v6558_v19, %v3651_v60 }
 0xbf2   : > { %v6560_v32 = vpop.eup %6559 }
 0xbf3   : > { %v3653_v21 = vadd.f32 %v3652_v39, %v3551_v2  ;;  %v3655_v29 = vsub.f32 1.0, %v6560_v32  ;;  %v3657_v51 = vmul.f32 %v6560_v32, %v7702_v61  ;;  %v3744_v61 = vpack.c.bf16 %v7792_v46, %v7792_v46 }
 0xbf5   : > { %6561 = vtanh.f32 %v3653_v21 }
 0xc02   : > { %v6562_v45 = vpop.eup %6561 }
 0xc03   : > { %v3656_v25 = vmul.f32 %v6562_v45, %v3655_v29  ;;  %v8497_v29 = vld [vmem:[#allocation24_spill] sm:$0xff] }
 0xc05   : > { %v7836_v50 = vadd.f32 %v3657_v51, %v3656_v25 }
 0xc07   : > { %v7840_v28 = vpack.c.bf16 %v7836_v50, %v7836_v50 }
 0xc09   : > { %5749 = vmatmul.mubr.msk.bf16.vlgmr.msra.gmra.mxu0 %vm861_vm5, %v7840_v28  ;;  %6212 = vmatmul.mubr.msk.bf16.vlgmr.msra.gmra.mxu1 %vm861_vm5, %v7840_v28 }
 0xc0a   : > { %3761 = vmatpush1.bf16.msra.mxu0 %v7715_v40  ;;  %6216 = vmatpush3.bf16.msra.mxu1 %v7721_v59 }
 0xc0b   : > { %3762 = vmatprep.subr.bf16.mxu0 %v7727_v17  ;;  %6217 = vmatprep.subr.bf16.mxu1 %v8468_v9 }
 0xc0c   : > { %3780 = vmatprep.mubr.bf16.mxu0 %v8469_v53  ;;  %6219 = vmatprep.mubr.msk.bf16.mxu1 %vm6757_vm2, %v8468_v9 }
 0xc0e   : > { %3763 = vmatpush1.bf16.msra.mxu0 %v7737_v15  ;;  %6218 = vmatpush3.bf16.msra.mxu1 %v7743_v6 }
 0xc0f   : > { %3863 = vmatprep.subr.bf16.mxu0 %v7484_v11  ;;  %6223 = vmatprep.subr.bf16.mxu1 %v8468_v9  ;;  %v8493_v11 = vld [vmem:[#allocation4_spill] sm:$0xff] }
 0xc11   : > { %5751 = vmatmul.mubr.msk.bf16.vlgmr.msra.gmra.mxu0 %vm861_vm5, %v3744_v61  ;;  %6220 = vmatmul.mubr.msk.bf16.vlgmr.msra.gmra.mxu1 %vm861_vm5, %v3744_v61 }
 0xc12   : > { %3864 = vmatpush1.bf16.msra.mxu0 %v7495_v38  ;;  %6224 = vmatpush3.bf16.msra.mxu1 %v7501_v7  ;;  %v8494_v38 = vld [vmem:[#allocation5_spill] sm:$0xff]  ;;  %v8495_v7 = vld [vmem:[#allocation6_spill] sm:$0xff] }
 0xc13   : > { %3865 = vmatprep.subr.bf16.mxu0 %v7507_v57  ;;  %6225 = vmatprep.subr.bf16.mxu1 %v8468_v9 }
 0xc14   : > { %3883 = vmatprep.mubr.bf16.mxu0 %v8469_v53  ;;  %6227 = vmatprep.mubr.msk.bf16.mxu1 %vm6757_vm2, %v8468_v9 }
 0xc16   : > { %3866 = vmatpush1.bf16.msra.mxu0 %v7517_v34  ;;  %6226 = vmatpush3.bf16.msra.mxu1 %v7523_v27 }
 0xc17   : > { %3970 = vmatprep.subr.bf16.mxu0 %v7529_v23  ;;  %6231 = vmatprep.subr.bf16.mxu1 %v8468_v9 }
 0xc19   : > { %5755 = vmatmul.mubr.msk.bf16.vlgmr.msra.gmra.mxu0 %vm861_vm5, %v7799_v58  ;;  %6228 = vmatmul.mubr.msk.bf16.vlgmr.msra.gmra.mxu1 %vm861_vm5, %v7799_v58 }
 0xc1a   : > { %3971 = vmatpush1.bf16.msra.mxu0 %v7540_v47  ;;  %6232 = vmatpush3.bf16.msra.mxu1 %v7546_v13 }
 0xc1b   : > { %3972 = vmatprep.subr.bf16.mxu0 %v7552_v62  ;;  %6233 = vmatprep.subr.bf16.mxu1 %v8468_v9 }
 0xc1c   : > { %3990 = vmatprep.mubr.bf16.mxu0 %v8469_v53  ;;  %6235 = vmatprep.mubr.msk.bf16.mxu1 %vm6757_vm2, %v8468_v9 }
 0xc1e   : > { %3973 = vmatpush1.bf16.msra.mxu0 %v8493_v11  ;;  %6234 = vmatpush3.bf16.msra.mxu1 %v8494_v38 }
 0xc1f   : > { %4051 = vmatprep.subr.bf16.mxu0 %v8495_v7  ;;  %6239 = vmatprep.subr.bf16.mxu1 %v8468_v9 }
 0xcc9   : > { %v3697_v57 = vpop.f32.mrf.mxu0  ;;  %v3738_v34 = vpop.f32.mrf.mxu1 }
 0xcca   : > { %v3698_v1 = vadd.f32 %v3697_v57, %v8496_v0  ;;  %v8498_v57 = vld [vmem:[#allocation13_spill] sm:$0xff] }
 0xccb   : > { %v3699_v27 = vpop.f32.mrf.mxu0  ;;  %v6213_v23 = vpop.f32.mrf.mxu1 }
 0xccc   : > { %v3700_v55 = vadd.f32 %v3699_v27, %v7294_v14  ;;  %v8499_v27 = vld [vmem:[#allocation25_spill] sm:$0xff] }
 0xccd   : > { %v3701_v47 = vpop.f32.mrf.mxu0  ;;  %v3741_v13 = vpop.f32.mrf.mxu1  ;;  %v1097_v23 = vadd.f32 %v8499_v27, %v8498_v57 }
 0xccf   : > { %v3702_v62 = vpop.f32.mrf.mxu0  ;;  %v6214_v58 = vpop.f32.mrf.mxu1 }
 0xcd1   : > { %v3782_v22 = vpop.f32.mrf.mxu0  ;;  %v3823_v42 = vpop.f32.mrf.mxu1 }
 0xcd2   : > { %v3829_v8 = vadd.f32 %v3782_v22, %v3698_v1 }
 0xcd3   : > { %v3784_v35 = vpop.f32.mrf.mxu0  ;;  %v6221_v26 = vpop.f32.mrf.mxu1 }
 0xcd4   : > { %v5753_v16 = vmul.f32 -1.442695, %v3829_v8  ;;  %v3836_v10 = vadd.f32 %v3784_v35, %v3700_v55 }
 0xcd5   : > { %v3786_v60 = vpop.f32.mrf.mxu0  ;;  %v3826_v19 = vpop.f32.mrf.mxu1 }
 0xcd6   : > { %6563 = vpow2.f32 %v5753_v16  ;;  %v5754_v61 = vmul.f32 -1.442695, %v3836_v10  ;;  %v3843_v16 = vadd.f32 %v7785_v44, %v3823_v42  ;;  %v3739_v60 = vadd.f32 %v3738_v34, %v7307_v18 }
 0xcd7   : > { %v3787_v2 = vpop.f32.mrf.mxu0  ;;  %v6222_v39 = vpop.f32.mrf.mxu1 }
 0xcd9   : > { %v3885_v21 = vpop.f32.mrf.mxu0  ;;  %v3926_v32 = vpop.f32.mrf.mxu1 }
 0xcda   : > { %v3932_v45 = vadd.f32 %v3885_v21, %v8497_v29  ;;  %v3946_v29 = vadd.f32 %v7588_v4, %v3926_v32 }
 0xcdb   : > { %v3887_v51 = vpop.f32.mrf.mxu0  ;;  %v6229_v25 = vpop.f32.mrf.mxu1 }
 0xcdc   : > { %v5757_v11 = vmul.f32 -1.442695, %v3932_v45  ;;  %v3939_v62 = vadd.f32 %v3887_v51, %v1097_v23  ;;  %v8500_v51 = vld [vmem:[#allocation10_spill] sm:$0xff]  ;;  %v8501_v25 = vld [vmem:[#allocation21_spill] sm:$0xff] }
 0xcdd   : > { %v3889_v38 = vpop.f32.mrf.mxu0  ;;  %v3929_v7 = vpop.f32.mrf.mxu1 }
 0xcde   : > { %6565 = vpow2.f32 %v5757_v11  ;;  %v5758_v22 = vmul.f32 -1.442695, %v3939_v62 }
 0xcdf   : > { %v3890_v47 = vpop.f32.mrf.mxu0  ;;  %v6230_v13 = vpop.f32.mrf.mxu1  ;;  %6567 = vpow2.f32 %v5754_v61  ;;  %v1163_v61 = vadd.f32 %v8501_v25, %v8500_v51 }
 0xce3   : > { %v6564_v58 = vpop.eup %6563 }
 0xce4   : > { %v3833_v1 = vadd.f32 1.0, %v6564_v58 }
 0xce6   : > { %6569 = vrcp.f32 %v3833_v1 }
 0xce7   : > { %6571 = vpow2.f32 %v5758_v22 }
 0xceb   : > { %v6566_v55 = vpop.eup %6565 }
 0xcec   : > { %v3936_v8 = vadd.f32 1.0, %v6566_v55  ;;  %v6568_v35 = vpop.eup %6567 }
 0xced   : > { %v3840_v26 = vadd.f32 1.0, %v6568_v35 }
 0xcee   : > { %6573 = vrcp.f32 %v3936_v8 }
 0xcef   : > { %6575 = vrcp.f32 %v3840_v26 }
 0xcf3   : > { %v6570_v10 = vpop.eup %6569 }
 0xcf4   : > { %v3844_v19 = vmul.f32 %v6570_v10, %v3843_v16  ;;  %v6572_v2 = vpop.eup %6571 }
 0xcf5   : > { %v3943_v21 = vadd.f32 1.0, %v6572_v2 }
 0xcf6   : > { %v3845_v39 = vadd.f32 %v3844_v19, %v3739_v60 }
 0xcf8   : > { %6577 = vtanh.f32 %v3845_v39 }
 0xcf9   : > { %6579 = vrcp.f32 %v3943_v21 }
 0xcfb   : > { %v6574_v45 = vpop.eup %6573 }
 0xcfc   : > { %v3947_v11 = vmul.f32 %v6574_v45, %v3946_v29  ;;  %v6576_v42 = vpop.eup %6575 }
 0xcfd   : > { %v3847_v7 = vsub.f32 1.0, %v6576_v42  ;;  %v3849_v23 = vmul.f32 %v6576_v42, %v7792_v46 }
 0xcfe   : > { %v3948_v38 = vadd.f32 %v3947_v11, %v1163_v61 }
 0xd00   : > { %6581 = vtanh.f32 %v3948_v38 }
 0xd05   : > { %v6578_v27 = vpop.eup %6577 }
 0xd06   : > { %v3848_v34 = vmul.f32 %v6578_v27, %v3847_v7  ;;  %v6580_v13 = vpop.eup %6579 }
 0xd07   : > { %v3950_v62 = vsub.f32 1.0, %v6580_v13  ;;  %v3952_v4 = vmul.f32 %v6580_v13, %v7795_v20 }
 0xd08   : > { %v7898_v47 = vadd.f32 %v3849_v23, %v3848_v34 }
 0xd0d   : > { %v6582_v58 = vpop.eup %6581 }
 0xd0e   : > { %v3951_v32 = vmul.f32 %v6582_v58, %v3950_v62  ;;  %v8009_v62 = vld [vmem:[%s8405_s7 + $0x4c] ss:$12 sps:$4 sm:$0xff]   ;;  %v8020_v58 = vld [vmem:[%s8405_s7 + $0x48] ss:$12 sps:$4 sm:$0xff]  }
 0xd10   : > { %v7901_v1 = vadd.f32 %v3952_v4, %v3951_v32  ;;  %v8026_v4 = vld [vmem:[%s8405_s7 + $0x50] ss:$12 sps:$4 sm:$0xff]   ;;  %v8032_v32 = vld [vmem:[%s8405_s7 + $0x34] ss:$12 sps:$4 sm:$0xff]  }
 0xd12   : > { %v7905_v22 = vpack.c.bf16 %v7901_v1, %v7901_v1 }
 0xd14   : > { %5759 = vmatmul.mubr.msk.bf16.vlgmr.msra.gmra.mxu0 %vm861_vm5, %v7905_v22  ;;  %6236 = vmatmul.mubr.msk.bf16.vlgmr.msra.gmra.mxu1 %vm861_vm5, %v7905_v22 }
 0xd15   : > { %4052 = vmatpush1.bf16.msra.mxu0 %v7609_v5  ;;  %6240 = vmatpush3.bf16.msra.mxu1 %v7615_v36 }
 0xd16   : > { %4053 = vmatprep.subr.bf16.mxu0 %v7621_v63  ;;  %6241 = vmatprep.subr.bf16.mxu1 %v8468_v9 }
 0xd17   : > { %4071 = vmatprep.mubr.bf16.mxu0 %v8469_v53  ;;  %6243 = vmatprep.mubr.msk.bf16.mxu1 %vm6757_vm2, %v8468_v9 }
 0xd19   : > { %4054 = vmatpush1.bf16.msra.mxu0 %v7631_v41  ;;  %6242 = vmatpush3.bf16.msra.mxu1 %v7637_v48 }
 0xd1a   : > { %4158 = vmatprep.subr.bf16.mxu0 %v7643_v52  ;;  %6247 = vmatprep.subr.bf16.mxu1 %v8468_v9 }
 0xd1c   : > { %5761 = vmatmul.mubr.msk.bf16.vlgmr.msra.gmra.mxu0 %vm861_vm5, %v7840_v28  ;;  %6244 = vmatmul.mubr.msk.bf16.vlgmr.msra.gmra.mxu1 %vm861_vm5, %v7840_v28 }
 0xd1d   : > { %4159 = vmatpush1.bf16.msra.mxu0 %v7654_v24  ;;  %6248 = vmatpush3.bf16.msra.mxu1 %v7660_v54 }
 0xd1e   : > { %4160 = vmatprep.subr.bf16.mxu0 %v7666_v56  ;;  %6249 = vmatprep.subr.bf16.mxu1 %v8468_v9 }
 0xd1f   : > { %4178 = vmatprep.mubr.bf16.mxu0 %v8469_v53  ;;  %6251 = vmatprep.mubr.msk.bf16.mxu1 %vm6757_vm2, %v8468_v9 }
 0xd21   : > { %4161 = vmatpush1.bf16.msra.mxu0 %v7676_v33  ;;  %6250 = vmatpush3.bf16.msra.mxu1 %v7682_v30 }
 0xd22   : > { %4243 = vmatprep.subr.bf16.mxu0 %v7688_v31  ;;  %6255 = vmatprep.subr.bf16.mxu1 %v8468_v9 }
 0xdd4   : > { %v3992_v5 = vpop.f32.mrf.mxu0  ;;  %v4033_v36 = vpop.f32.mrf.mxu1 }
 0xdd5   : > { %v3993_v56 = vadd.f32 %v3992_v5, %v7196_v12  ;;  %v4034_v25 = vadd.f32 %v4033_v36, %v7209_v49  ;;  %v8048_v5 = vld [vmem:[%s8405_s7 + $0x38] ss:$12 sps:$4 sm:$0xff]  }
 0xdd6   : > { %v3994_v63 = vpop.f32.mrf.mxu0  ;;  %v6237_v41 = vpop.f32.mrf.mxu1  ;;  %v8054_v36 = vld [vmem:[%s8406_s8 + $0x4c] ss:$12 sps:$4 sm:$0xff]  }
 0xdd7   : > { %v3995_v26 = vadd.f32 %v3994_v63, %v7200_v3 }
 0xdd8   : > { %v3996_v48 = vpop.f32.mrf.mxu0  ;;  %v4036_v52 = vpop.f32.mrf.mxu1 }
 0xdda   : > { %v3997_v24 = vpop.f32.mrf.mxu0  ;;  %v6238_v54 = vpop.f32.mrf.mxu1 }
 0xddc   : > { %v4073_v20 = vpop.f32.mrf.mxu0  ;;  %v4114_v28 = vpop.f32.mrf.mxu1 }
 0xddd   : > { %v4120_v55 = vadd.f32 %v4073_v20, %v3993_v56  ;;  %v4134_v45 = vadd.f32 %v7697_v43, %v4114_v28  ;;  %v7964_v43 = vld [vmem:[%s8406_s8 + $0x1c] ss:$12 sps:$4 sm:$0xff]  }
 0xdde   : > { %v4075_v33 = vpop.f32.mrf.mxu0  ;;  %v6245_v8 = vpop.f32.mrf.mxu1 }
 0xddf   : > { %v5763_v30 = vmul.f32 -1.442695, %v4120_v55  ;;  %v4127_v60 = vadd.f32 %v4075_v33, %v3995_v26 }
 0xde0   : > { %v4077_v35 = vpop.f32.mrf.mxu0  ;;  %v4117_v31 = vpop.f32.mrf.mxu1 }
 0xde1   : > { %6583 = vpow2.f32 %v5763_v30  ;;  %v5764_v19 = vmul.f32 -1.442695, %v4127_v60 }
 0xde2   : > { %v4078_v16 = vpop.f32.mrf.mxu0  ;;  %v6246_v10 = vpop.f32.mrf.mxu1 }
 0xde3   : > { %6585 = vpow2.f32 %v5764_v19 }
 0xdee   : > { %v6584_v2 = vpop.eup %6583 }
 0xdef   : > { %v4124_v39 = vadd.f32 1.0, %v6584_v2 }
 0xdf0   : > { %v6586_v21 = vpop.eup %6585 }
 0xdf1   : > { %6587 = vrcp.f32 %v4124_v39  ;;  %v4131_v29 = vadd.f32 1.0, %v6586_v21 }
 0xdf3   : > { %6589 = vrcp.f32 %v4131_v29  ;;  %v8502_v29 = vld [vmem:[#allocation26_spill] sm:$0xff] }
 0xdfe   : > { %v6588_v51 = vpop.eup %6587 }
 0xdff   : > { %v4135_v61 = vmul.f32 %v6588_v51, %v4134_v45 }
 0xe00   : > { %v6590_v38 = vpop.eup %6589 }
 0xe01   : > { %v4136_v11 = vadd.f32 %v4135_v61, %v4034_v25  ;;  %v4138_v42 = vsub.f32 1.0, %v6590_v38  ;;  %v4140_v27 = vmul.f32 %v6590_v38, %v7836_v50  ;;  %v8003_v50 = vld [vmem:[%s8406_s8 + $0x8] ss:$12 sps:$4 sm:$0xff]  }
 0xe03   : > { %6591 = vtanh.f32 %v4136_v11 }
 0xe10   : > { %v6592_v7 = vpop.eup %6591 }
 0xe11   : > { %v4139_v34 = vmul.f32 %v6592_v7, %v4138_v42 }
 0xe13   : > { %v7942_v23 = vadd.f32 %v4140_v27, %v4139_v34  ;;  %v8503_v34 = vld [vmem:[#allocation27_spill] sm:$0xff] }
 0xe15   : > { %v7946_v13 = vpack.c.bf16 %v7942_v23, %v7942_v23 }
 0xe17   : > { %5765 = vmatmul.mubr.msk.bf16.vlgmr.msra.gmra.mxu0 %vm861_vm5, %v7946_v13  ;;  %6252 = vmatmul.mubr.msk.bf16.vlgmr.msra.gmra.mxu1 %vm861_vm5, %v7946_v13 }
 0xe18   : > { %4244 = vmatpush1.bf16.msra.mxu0 %v7715_v40  ;;  %6256 = vmatpush3.bf16.msra.mxu1 %v7721_v59  ;;  %v4227_v40 = vpack.c.bf16 %v7898_v47, %v7898_v47  ;;  %v7975_v59 = vld [vmem:[%s8406_s8 + $0x18] ss:$12 sps:$4 sm:$0xff]  }
 0xe19   : > { %4245 = vmatprep.subr.bf16.mxu0 %v7727_v17  ;;  %6257 = vmatprep.subr.bf16.mxu1 %v8468_v9  ;;  %v7981_v17 = vld [vmem:[%s8406_s8 + $0x20] ss:$12 sps:$4 sm:$0xff]  }
 0xe1a   : > { %4263 = vmatprep.mubr.bf16.mxu0 %v8469_v53  ;;  %6259 = vmatprep.mubr.msk.bf16.mxu1 %vm6757_vm2, %v8468_v9 }
 0xe1c   : > { %4246 = vmatpush1.bf16.msra.mxu0 %v7737_v15  ;;  %6258 = vmatpush3.bf16.msra.mxu1 %v7743_v6  ;;  %v7987_v15 = vld [vmem:[%s8406_s8 + $0x4] ss:$12 sps:$4 sm:$0xff]   ;;  %v7997_v6 = vld [vmem:[%s8406_s8] ss:$12 sps:$4 sm:$0xff]  }
 0xe1d   : > { %4346 = vmatprep.subr.bf16.mxu0 %v7964_v43  ;;  %6263 = vmatprep.subr.bf16.mxu1 %v8468_v9 }
 0xe1f   : > { %5767 = vmatmul.mubr.msk.bf16.vlgmr.msra.gmra.mxu0 %vm861_vm5, %v4227_v40  ;;  %6260 = vmatmul.mubr.msk.bf16.vlgmr.msra.gmra.mxu1 %vm861_vm5, %v4227_v40 }
 0xe20   : > { %4347 = vmatpush1.bf16.msra.mxu0 %v7975_v59  ;;  %6264 = vmatpush3.bf16.msra.mxu1 %v7981_v17 }
 0xe21   : > { %4348 = vmatprep.subr.bf16.mxu0 %v7987_v15  ;;  %6265 = vmatprep.subr.bf16.mxu1 %v8468_v9 }
 0xe22   : > { %4366 = vmatprep.mubr.bf16.mxu0 %v8469_v53  ;;  %6267 = vmatprep.mubr.msk.bf16.mxu1 %vm6757_vm2, %v8468_v9 }
 0xe24   : > { %4349 = vmatpush1.bf16.msra.mxu0 %v7997_v6  ;;  %6266 = vmatpush3.bf16.msra.mxu1 %v8003_v50 }
 0xe25   : > { %4453 = vmatprep.subr.bf16.mxu0 %v8009_v62  ;;  %6271 = vmatprep.subr.bf16.mxu1 %v8468_v9 }
 0xe27   : > { %5771 = vmatmul.mubr.msk.bf16.vlgmr.msra.gmra.mxu0 %vm861_vm5, %v7905_v22  ;;  %6268 = vmatmul.mubr.msk.bf16.vlgmr.msra.gmra.mxu1 %vm861_vm5, %v7905_v22  ;;  %v8042_v22 = vld [vmem:[%s8405_s7 + $0x30] ss:$12 sps:$4 sm:$0xff]  }
 0xe28   : > { %4454 = vmatpush1.bf16.msra.mxu0 %v8020_v58  ;;  %6272 = vmatpush3.bf16.msra.mxu1 %v8026_v4 }
 0xe29   : > { %4455 = vmatprep.subr.bf16.mxu0 %v8032_v32  ;;  %6273 = vmatprep.subr.bf16.mxu1 %v8468_v9 }
 0xe2a   : > { %4473 = vmatprep.mubr.bf16.mxu0 %v8469_v53  ;;  %6275 = vmatprep.mubr.msk.bf16.mxu1 %vm6757_vm2, %v8468_v9 }
 0xe2c   : > { %4456 = vmatpush1.bf16.msra.mxu0 %v8042_v22  ;;  %6274 = vmatpush3.bf16.msra.mxu1 %v8048_v5 }
 0xe2d   : > { %4534 = vmatprep.subr.bf16.mxu0 %v8054_v36  ;;  %6279 = vmatprep.subr.bf16.mxu1 %v8468_v9 }
 0xed7   : > { %v4180_v63 = vpop.f32.mrf.mxu0  ;;  %v4221_v41 = vpop.f32.mrf.mxu1 }
 0xed8   : > { %v4181_v28 = vadd.f32 %v4180_v63, %v8496_v0 }
 0xed9   : > { %v4182_v48 = vpop.f32.mrf.mxu0  ;;  %v6253_v52 = vpop.f32.mrf.mxu1 }
 0xeda   : > { %v4183_v8 = vadd.f32 %v4182_v48, %v7294_v14 }
 0xedb   : > { %v4184_v24 = vpop.f32.mrf.mxu0  ;;  %v4224_v54 = vpop.f32.mrf.mxu1 }
 0xedd   : > { %v4185_v56 = vpop.f32.mrf.mxu0  ;;  %v6254_v20 = vpop.f32.mrf.mxu1 }
 0xedf   : > { %v4265_v55 = vpop.f32.mrf.mxu0  ;;  %v4306_v33 = vpop.f32.mrf.mxu1 }
 0xee0   : > { %v4312_v30 = vadd.f32 %v4265_v55, %v4181_v28  ;;  %v4326_v28 = vadd.f32 %v7785_v44, %v4306_v33  ;;  %v8504_v44 = vld [vmem:[#allocation15_spill] sm:$0xff] }
 0xee1   : > { %v4267_v35 = vpop.f32.mrf.mxu0  ;;  %v6261_v31 = vpop.f32.mrf.mxu1 }
 0xee2   : > { %v5769_v26 = vmul.f32 -1.442695, %v4312_v30  ;;  %v4319_v16 = vadd.f32 %v4267_v35, %v4183_v8  ;;  %v4222_v8 = vadd.f32 %v4221_v41, %v7307_v18 }
 0xee3   : > { %v4269_v10 = vpop.f32.mrf.mxu0  ;;  %v4309_v60 = vpop.f32.mrf.mxu1 }
 0xee4   : > { %6593 = vpow2.f32 %v5769_v26  ;;  %v5770_v61 = vmul.f32 -1.442695, %v4319_v16  ;;  %v8067_v16 = vld [vmem:[%s8408_s10] ss:$0 sm:$0xff] }
 0xee5   : > { %v4270_v19 = vpop.f32.mrf.mxu0  ;;  %v6262_v2 = vpop.f32.mrf.mxu1 }
 0xee7   : > { %v4368_v39 = vpop.f32.mrf.mxu0  ;;  %v4409_v21 = vpop.f32.mrf.mxu1 }
 0xee8   : > { %v4415_v45 = vadd.f32 %v4368_v39, %v8502_v29  ;;  %v4429_v10 = vadd.f32 %v8067_v16, %v4409_v21 }
 0xee9   : > { %v4370_v51 = vpop.f32.mrf.mxu0  ;;  %v6269_v25 = vpop.f32.mrf.mxu1 }
 0xeea   : > { %v5773_v11 = vmul.f32 -1.442695, %v4415_v45  ;;  %v4422_v40 = vadd.f32 %v4370_v51, %v8503_v34  ;;  %v8100_v34 = vld [vmem:[%s8406_s8 + $0x34] ss:$12 sps:$4 sm:$0xff]  }
 0xeeb   : > { %v4372_v38 = vpop.f32.mrf.mxu0  ;;  %v4412_v42 = vpop.f32.mrf.mxu1 }
 0xeec   : > { %6595 = vpow2.f32 %v5773_v11  ;;  %v5774_v52 = vmul.f32 -1.442695, %v4422_v40  ;;  %v8110_v40 = vld [vmem:[%s8406_s8 + $0x30] ss:$12 sps:$4 sm:$0xff]  }
 0xeed   : > { %v4373_v7 = vpop.f32.mrf.mxu0  ;;  %v6270_v27 = vpop.f32.mrf.mxu1  ;;  %6597 = vpow2.f32 %v5770_v61 }
 0xeee   : > { %v8088_v27 = vld [vmem:[%s8406_s8 + $0x48] ss:$12 sps:$4 sm:$0xff]  }
 0xef1   : > { %v6594_v63 = vpop.eup %6593 }
 0xef2   : > { %v4316_v48 = vadd.f32 1.0, %v6594_v63  ;;  %v8116_v63 = vld [vmem:[%s8406_s8 + $0x38] ss:$12 sps:$4 sm:$0xff]  }
 0xef4   : > { %6599 = vrcp.f32 %v4316_v48  ;;  %v8122_v48 = vld [vmem:[%s8405_s7 + $0x7c] ss:$12 sps:$4 sm:$0xff]  }
 0xef5   : > { %6601 = vpow2.f32 %v5774_v52  ;;  %v8133_v52 = vld [vmem:[%s8405_s7 + $0x78] ss:$12 sps:$4 sm:$0xff]  }
 0xef9   : > { %v6596_v24 = vpop.eup %6595 }
 0xefa   : > { %v4419_v54 = vadd.f32 1.0, %v6596_v24  ;;  %v6598_v56 = vpop.eup %6597  ;;  %v8139_v24 = vld [vmem:[%s8405_s7 + $0x80] ss:$12 sps:$4 sm:$0xff]  }
 0xefb   : > { %v4323_v20 = vadd.f32 1.0, %v6598_v56  ;;  %v8161_v56 = vld [vmem:[%s8405_s7 + $0x68] ss:$12 sps:$4 sm:$0xff]  }
 0xefc   : > { %6603 = vrcp.f32 %v4419_v54  ;;  %v8145_v54 = vld [vmem:[%s8405_s7 + $0x64] ss:$12 sps:$4 sm:$0xff]  }
 0xefd   : > { %6605 = vrcp.f32 %v4323_v20  ;;  %v8167_v20 = vld [vmem:[%s8406_s8 + $0x7c] ss:$12 sps:$4 sm:$0xff]  }
 0xf01   : > { %v6600_v55 = vpop.eup %6599 }
 0xf02   : > { %v4327_v30 = vmul.f32 %v6600_v55, %v4326_v28  ;;  %v6602_v35 = vpop.eup %6601 }
 0xf03   : > { %v4426_v26 = vadd.f32 1.0, %v6602_v35 }
 0xf04   : > { %v4328_v31 = vadd.f32 %v4327_v30, %v4222_v8 }
 0xf06   : > { %6607 = vtanh.f32 %v4328_v31 }
 0xf07   : > { %6609 = vrcp.f32 %v4426_v26 }
 0xf09   : > { %v6604_v60 = vpop.eup %6603 }
 0xf0a   : > { %v4430_v19 = vmul.f32 %v6604_v60, %v4429_v10  ;;  %v6606_v41 = vpop.eup %6605 }
 0xf0b   : > { %v4330_v2 = vsub.f32 1.0, %v6606_v41  ;;  %v4332_v45 = vmul.f32 %v6606_v41, %v7898_v47 }
 0xf0c   : > { %v4431_v33 = vadd.f32 %v4430_v19, %v8504_v44 }
 0xf0e   : > { %6611 = vtanh.f32 %v4431_v33 }
 0xf13   : > { %v6608_v39 = vpop.eup %6607 }
 0xf14   : > { %v4331_v29 = vmul.f32 %v6608_v39, %v4330_v2  ;;  %v6610_v25 = vpop.eup %6609 }
 0xf15   : > { %v4433_v61 = vsub.f32 1.0, %v6610_v25  ;;  %v4435_v38 = vmul.f32 %v6610_v25, %v7901_v1  ;;  %v8094_v1 = vld [vmem:[%s8406_s8 + $0x50] ss:$12 sps:$4 sm:$0xff]  }
 0xf16   : > { %v8072_v51 = vadd.f32 %v4332_v45, %v4331_v29 }
 0xf1b   : > { %v6612_v11 = vpop.eup %6611 }
 0xf1c   : > { %v4434_v21 = vmul.f32 %v6612_v11, %v4433_v61 }
 0xf1e   : > { %v8075_v42 = vadd.f32 %v4435_v38, %v4434_v21 }
 0xf20   : > { %v8079_v7 = vpack.c.bf16 %v8075_v42, %v8075_v42 }
 0xf22   : > { %5775 = vmatmul.mubr.msk.bf16.vlgmr.msra.gmra.mxu0 %vm861_vm5, %v8079_v7  ;;  %6276 = vmatmul.mubr.msk.bf16.vlgmr.msra.gmra.mxu1 %vm861_vm5, %v8079_v7 }
 0xf23   : > { %4535 = vmatpush1.bf16.msra.mxu0 %v8088_v27  ;;  %6280 = vmatpush3.bf16.msra.mxu1 %v8094_v1 }
 0xf24   : > { %4536 = vmatprep.subr.bf16.mxu0 %v8100_v34  ;;  %6281 = vmatprep.subr.bf16.mxu1 %v8468_v9 }
 0xf25   : > { %4554 = vmatprep.mubr.bf16.mxu0 %v8469_v53  ;;  %6283 = vmatprep.mubr.msk.bf16.mxu1 %vm6757_vm2, %v8468_v9 }
 0xf27   : > { %4537 = vmatpush1.bf16.msra.mxu0 %v8110_v40  ;;  %6282 = vmatpush3.bf16.msra.mxu1 %v8116_v63 }
 0xf28   : > { %4641 = vmatprep.subr.bf16.mxu0 %v8122_v48  ;;  %6287 = vmatprep.subr.bf16.mxu1 %v8468_v9 }
 0xf2a   : > { %5777 = vmatmul.mubr.msk.bf16.vlgmr.msra.gmra.mxu0 %vm861_vm5, %v7946_v13  ;;  %6284 = vmatmul.mubr.msk.bf16.vlgmr.msra.gmra.mxu1 %vm861_vm5, %v7946_v13  ;;  %v8155_v13 = vld [vmem:[%s8405_s7 + $0x60] ss:$12 sps:$4 sm:$0xff]  }
 0xf2b   : > { %4642 = vmatpush1.bf16.msra.mxu0 %v8133_v52  ;;  %6288 = vmatpush3.bf16.msra.mxu1 %v8139_v24 }
 0xf2c   : > { %4643 = vmatprep.subr.bf16.mxu0 %v8145_v54  ;;  %6289 = vmatprep.subr.bf16.mxu1 %v8468_v9 }
 0xf2d   : > { %4661 = vmatprep.mubr.bf16.mxu0 %v8469_v53  ;;  %6291 = vmatprep.mubr.msk.bf16.mxu1 %vm6757_vm2, %v8468_v9 }
 0xf2f   : > { %4644 = vmatpush1.bf16.msra.mxu0 %v8155_v13  ;;  %6290 = vmatpush3.bf16.msra.mxu1 %v8161_v56 }
 0xf30   : > { %4726 = vmatprep.subr.bf16.mxu0 %v8167_v20  ;;  %6295 = vmatprep.subr.bf16.mxu1 %v8468_v9 }
 0xfe2   : > { %v4475_v28 = vpop.f32.mrf.mxu0  ;;  %v4516_v55 = vpop.f32.mrf.mxu1 }
 0xfe3   : > { %v4476_v60 = vadd.f32 %v4475_v28, %v7196_v12 }
 0xfe4   : > { %v4477_v8 = vpop.f32.mrf.mxu0  ;;  %v6277_v30 = vpop.f32.mrf.mxu1 }
 0xfe5   : > { %v4478_v25 = vadd.f32 %v4477_v8, %v7200_v3  ;;  %v4517_v8 = vadd.f32 %v4516_v55, %v7209_v49  ;;  %v8194_v55 = vld [vmem:[%s8406_s8 + $0x78] ss:$12 sps:$4 sm:$0xff]  }
 0xfe6   : > { %v4479_v35 = vpop.f32.mrf.mxu0  ;;  %v4519_v31 = vpop.f32.mrf.mxu1 }
 0xfe8   : > { %v4480_v26 = vpop.f32.mrf.mxu0  ;;  %v6278_v10 = vpop.f32.mrf.mxu1 }
 0xfe9   : > { %v8176_v26 = vld [vmem:[%s8408_s10 + $0x1] ss:$0 sm:$0xff] }
 0xfea   : > { %v4556_v19 = vpop.f32.mrf.mxu0  ;;  %v4597_v44 = vpop.f32.mrf.mxu1 }
 0xfeb   : > { %v4603_v33 = vadd.f32 %v4556_v19, %v4476_v60  ;;  %v4617_v10 = vadd.f32 %v8176_v26, %v4597_v44  ;;  %v8206_v44 = vld [vmem:[%s8406_s8 + $0x64] ss:$12 sps:$4 sm:$0xff]  }
 0xfec   : > { %v4558_v41 = vpop.f32.mrf.mxu0  ;;  %v6285_v2 = vpop.f32.mrf.mxu1 }
 0xfed   : > { %v5779_v39 = vmul.f32 -1.442695, %v4603_v33  ;;  %v4610_v38 = vadd.f32 %v4558_v41, %v4478_v25 }
 0xfee   : > { %v4560_v29 = vpop.f32.mrf.mxu0  ;;  %v4600_v45 = vpop.f32.mrf.mxu1 }
 0xfef   : > { %6613 = vpow2.f32 %v5779_v39  ;;  %v5780_v21 = vmul.f32 -1.442695, %v4610_v38  ;;  %v8222_v38 = vld [vmem:[%s8406_s8 + $0x68] ss:$12 sps:$4 sm:$0xff]  }
 0xff0   : > { %v4561_v61 = vpop.f32.mrf.mxu0  ;;  %v6286_v11 = vpop.f32.mrf.mxu1 }
 0xff1   : > { %6615 = vpow2.f32 %v5780_v21  ;;  %v8216_v11 = vld [vmem:[%s8406_s8 + $0x60] ss:$12 sps:$4 sm:$0xff]   ;;  %v4710_v21 = vpack.c.bf16 %v8072_v51, %v8072_v51 }
 0xffc   : > { %v6614_v30 = vpop.eup %6613 }
 0xffd   : > { %v4607_v35 = vadd.f32 1.0, %v6614_v30 }
 0xffe   : > { %v6616_v28 = vpop.eup %6615 }
 0xfff   : > { %6617 = vrcp.f32 %v4607_v35  ;;  %v4614_v31 = vadd.f32 1.0, %v6616_v28 }
0x1001   : > { %6619 = vrcp.f32 %v4614_v31 }
0x100c   : > { %v6618_v60 = vpop.eup %6617 }
0x100d   : > { %v4618_v19 = vmul.f32 %v6618_v60, %v4617_v10 }
0x100e   : > { %v6620_v41 = vpop.eup %6619 }
0x100f   : > { %v4619_v33 = vadd.f32 %v4618_v19, %v4517_v8  ;;  %v4621_v2 = vsub.f32 1.0, %v6620_v41  ;;  %v4623_v29 = vmul.f32 %v6620_v41, %v7942_v23  ;;  %v8200_v23 = vld [vmem:[%s8406_s8 + $0x80] ss:$12 sps:$4 sm:$0xff]  }
0x1010   : > { %v8505_v41 = vld [vmem:[#allocation28_spill] sm:$0xff] }
0x1011   : > { %6621 = vtanh.f32 %v4619_v33 }
0x101e   : > { %v6622_v39 = vpop.eup %6621 }
0x101f   : > { %v4622_v45 = vmul.f32 %v6622_v39, %v4621_v2 }
0x1021   : > { %v8181_v25 = vadd.f32 %v4623_v29, %v4622_v45 }
0x1023   : > { %v8185_v61 = vpack.c.bf16 %v8181_v25, %v8181_v25 }
0x1025   : > { %5781 = vmatmul.mubr.msk.bf16.vlgmr.msra.gmra.mxu0 %vm861_vm5, %v8185_v61  ;;  %6292 = vmatmul.mubr.msk.bf16.vlgmr.msra.gmra.mxu1 %vm861_vm5, %v8185_v61 }
0x1026   : > { %4727 = vmatpush1.bf16.msra.mxu0 %v8194_v55  ;;  %6296 = vmatpush3.bf16.msra.mxu1 %v8200_v23 }
0x1027   : > { %4728 = vmatprep.subr.bf16.mxu0 %v8206_v44  ;;  %6297 = vmatprep.subr.bf16.mxu1 %v8468_v9 }
0x1028   : > { %4746 = vmatprep.mubr.bf16.mxu0 %v8469_v53  ;;  %6299 = vmatprep.mubr.msk.bf16.mxu1 %vm6757_vm2, %v8468_v9 }
0x102a   : > { %4729 = vmatpush1.bf16.msra.mxu0 %v8216_v11  ;;  %6298 = vmatpush3.bf16.msra.mxu1 %v8222_v38 }
0x102b   : > { %4829 = vmatprep.subr.bf16.mxu0 %v7964_v43  ;;  %6303 = vmatprep.subr.bf16.mxu1 %v8468_v9 }
0x102d   : > { %5783 = vmatmul.mubr.msk.bf16.vlgmr.msra.gmra.mxu0 %vm861_vm5, %v4710_v21  ;;  %6300 = vmatmul.mubr.msk.bf16.vlgmr.msra.gmra.mxu1 %vm861_vm5, %v4710_v21 }
0x102e   : > { %4830 = vmatpush1.bf16.msra.mxu0 %v7975_v59  ;;  %6304 = vmatpush3.bf16.msra.mxu1 %v7981_v17 }
0x102f   : > { %4831 = vmatprep.subr.bf16.mxu0 %v7987_v15  ;;  %6305 = vmatprep.subr.bf16.mxu1 %v8468_v9 }
0x1030   : > { %4849 = vmatprep.mubr.bf16.mxu0 %v8469_v53  ;;  %6307 = vmatprep.mubr.msk.bf16.mxu1 %vm6757_vm2, %v8468_v9 }
0x1032   : > { %4832 = vmatpush1.bf16.msra.mxu0 %v7997_v6  ;;  %6306 = vmatpush3.bf16.msra.mxu1 %v8003_v50 }
0x1033   : > { %4936 = vmatprep.subr.bf16.mxu0 %v8009_v62  ;;  %6311 = vmatprep.subr.bf16.mxu1 %v8468_v9 }
0x1035   : > { %5787 = vmatmul.mubr.msk.bf16.vlgmr.msra.gmra.mxu0 %vm861_vm5, %v8079_v7  ;;  %6308 = vmatmul.mubr.msk.bf16.vlgmr.msra.gmra.mxu1 %vm861_vm5, %v8079_v7 }
0x1036   : > { %4937 = vmatpush1.bf16.msra.mxu0 %v8020_v58  ;;  %6312 = vmatpush3.bf16.msra.mxu1 %v8026_v4 }
0x1037   : > { %4938 = vmatprep.subr.bf16.mxu0 %v8032_v32  ;;  %6313 = vmatprep.subr.bf16.mxu1 %v8468_v9 }
0x1038   : > { %4956 = vmatprep.mubr.bf16.mxu0 %v8469_v53  ;;  %6315 = vmatprep.mubr.msk.bf16.mxu1 %vm6757_vm2, %v8468_v9 }
0x103a   : > { %4939 = vmatpush1.bf16.msra.mxu0 %v8042_v22  ;;  %6314 = vmatpush3.bf16.msra.mxu1 %v8048_v5 }
0x103b   : > { %5017 = vmatprep.subr.bf16.mxu0 %v8054_v36  ;;  %6319 = vmatprep.subr.bf16.mxu1 %v8468_v9 }
0x10e5   : > { %v4663_v43 = vpop.f32.mrf.mxu0  ;;  %v4704_v59 = vpop.f32.mrf.mxu1 }
0x10e6   : > { %v4664_v4 = vadd.f32 %v4663_v43, %v8496_v0 }
0x10e7   : > { %v4665_v17 = vpop.f32.mrf.mxu0  ;;  %v6293_v15 = vpop.f32.mrf.mxu1 }
0x10e8   : > { %v4666_v22 = vadd.f32 %v4665_v17, %v7294_v14  ;;  %v8506_v15 = vld [vmem:[#allocation29_spill] sm:$0xff] }
0x10e9   : > { %v4667_v6 = vpop.f32.mrf.mxu0  ;;  %v4707_v50 = vpop.f32.mrf.mxu1 }
0x10ea   : > { %v1107_v6 = vadd.f32 %v8506_v15, %v8498_v57 }
0x10eb   : > { %v4668_v62 = vpop.f32.mrf.mxu0  ;;  %v6294_v58 = vpop.f32.mrf.mxu1 }
0x10ed   : > { %v4748_v32 = vpop.f32.mrf.mxu0  ;;  %v4789_v7 = vpop.f32.mrf.mxu1 }
0x10ee   : > { %v4795_v30 = vadd.f32 %v4748_v32, %v4664_v4 }
0x10ef   : > { %v4750_v5 = vpop.f32.mrf.mxu0  ;;  %v6301_v35 = vpop.f32.mrf.mxu1 }
0x10f0   : > { %v5785_v36 = vmul.f32 -1.442695, %v4795_v30  ;;  %v4802_v28 = vadd.f32 %v4750_v5, %v4666_v22 }
0x10f1   : > { %v4752_v31 = vpop.f32.mrf.mxu0  ;;  %v4792_v10 = vpop.f32.mrf.mxu1 }
0x10f2   : > { %6623 = vpow2.f32 %v5785_v36  ;;  %v5786_v45 = vmul.f32 -1.442695, %v4802_v28  ;;  %v8265_v28 = vld [vmem:[%s8408_s10 + $0x2] ss:$0 sm:$0xff]  ;;  %v4705_v10 = vadd.f32 %v4704_v59, %v7307_v18 }
0x10f3   : > { %v4753_v60 = vpop.f32.mrf.mxu0  ;;  %v6302_v8 = vpop.f32.mrf.mxu1  ;;  %v4809_v57 = vadd.f32 %v8265_v28, %v4789_v7 }
0x10f5   : > { %v4851_v19 = vpop.f32.mrf.mxu0  ;;  %v4892_v33 = vpop.f32.mrf.mxu1 }
0x10f6   : > { %v4898_v2 = vadd.f32 %v4851_v19, %v8505_v41 }
0x10f7   : > { %v4853_v39 = vpop.f32.mrf.mxu0  ;;  %v6309_v29 = vpop.f32.mrf.mxu1 }
0x10f8   : > { %v5789_v21 = vmul.f32 -1.442695, %v4898_v2  ;;  %v4905_v58 = vadd.f32 %v4853_v39, %v1107_v6  ;;  %v4912_v2 = vadd.f32 %v8067_v16, %v4892_v33 }
0x10f9   : > { %v4855_v43 = vpop.f32.mrf.mxu0  ;;  %v4895_v17 = vpop.f32.mrf.mxu1 }
0x10fa   : > { %6625 = vpow2.f32 %v5789_v21  ;;  %v5790_v22 = vmul.f32 -1.442695, %v4905_v58 }
0x10fb   : > { %v4856_v50 = vpop.f32.mrf.mxu0  ;;  %v6310_v62 = vpop.f32.mrf.mxu1  ;;  %6627 = vpow2.f32 %v5786_v45  ;;  %v8507_v45 = vld [vmem:[#allocation19_spill] sm:$0xff] }
0x10ff   : > { %v6624_v4 = vpop.eup %6623 }
0x1100   : > { %v4799_v32 = vadd.f32 1.0, %v6624_v4 }
0x1102   : > { %6629 = vrcp.f32 %v4799_v32 }
0x1103   : > { %6631 = vpow2.f32 %v5790_v22 }
0x1107   : > { %v6626_v30 = vpop.eup %6625 }
0x1108   : > { %v4902_v5 = vadd.f32 1.0, %v6626_v30  ;;  %v6628_v35 = vpop.eup %6627 }
0x1109   : > { %v4806_v36 = vadd.f32 1.0, %v6628_v35 }
0x110a   : > { %6633 = vrcp.f32 %v4902_v5 }
0x110b   : > { %6635 = vrcp.f32 %v4806_v36 }
0x110f   : > { %v6630_v31 = vpop.eup %6629 }
0x1110   : > { %v4810_v60 = vmul.f32 %v6630_v31, %v4809_v57  ;;  %v6632_v8 = vpop.eup %6631 }
0x1111   : > { %v4909_v41 = vadd.f32 1.0, %v6632_v8 }
0x1112   : > { %v4811_v19 = vadd.f32 %v4810_v60, %v4705_v10 }
0x1114   : > { %6637 = vtanh.f32 %v4811_v19 }
0x1115   : > { %6639 = vrcp.f32 %v4909_v41 }
0x1117   : > { %v6634_v39 = vpop.eup %6633 }
0x1118   : > { %v4913_v29 = vmul.f32 %v6634_v39, %v4912_v2  ;;  %v6636_v43 = vpop.eup %6635 }
0x1119   : > { %v4813_v17 = vsub.f32 1.0, %v6636_v43  ;;  %v4815_v59 = vmul.f32 %v6636_v43, %v8072_v51 }
0x111a   : > { %v4914_v21 = vadd.f32 %v4913_v29, %v8507_v45 }
0x111c   : > { %6641 = vtanh.f32 %v4914_v21 }
0x1121   : > { %v6638_v7 = vpop.eup %6637 }
0x1122   : > { %v4814_v15 = vmul.f32 %v6638_v7, %v4813_v17  ;;  %v6640_v50 = vpop.eup %6639 }
0x1123   : > { %v4916_v62 = vsub.f32 1.0, %v6640_v50  ;;  %v4918_v4 = vmul.f32 %v6640_v50, %v8075_v42 }
0x1124   : > { %v8272_v6 = vadd.f32 %v4815_v59, %v4814_v15 }
0x1129   : > { %v6642_v58 = vpop.eup %6641 }
0x112a   : > { %v4917_v16 = vmul.f32 %v6642_v58, %v4916_v62 }
0x112c   : > { %v4919_v33 = vadd.f32 %v4918_v4, %v4917_v16 }
0x112e   : > { %v4920_v32 = vpack.c.bf16 %v4919_v33, %v4919_v33 }
0x1130   : > { %5791 = vmatmul.mubr.msk.bf16.vlgmr.msra.gmra.mxu0 %vm861_vm5, %v4920_v32  ;;  %6316 = vmatmul.mubr.msk.bf16.vlgmr.msra.gmra.mxu1 %vm861_vm5, %v4920_v32 }
0x1131   : > { %5018 = vmatpush1.bf16.msra.mxu0 %v8088_v27  ;;  %6320 = vmatpush3.bf16.msra.mxu1 %v8094_v1 }
0x1132   : > { %5019 = vmatprep.subr.bf16.mxu0 %v8100_v34  ;;  %6321 = vmatprep.subr.bf16.mxu1 %v8468_v9 }
0x1133   : > { %5037 = vmatprep.mubr.bf16.mxu0 %v8469_v53  ;;  %6323 = vmatprep.mubr.msk.bf16.mxu1 %vm6757_vm2, %v8468_v9 }
0x1135   : > { %5020 = vmatpush1.bf16.msra.mxu0 %v8110_v40  ;;  %6322 = vmatpush3.bf16.msra.mxu1 %v8116_v63 }
0x1136   : > { %5124 = vmatprep.subr.bf16.mxu0 %v8122_v48  ;;  %6327 = vmatprep.subr.bf16.mxu1 %v8468_v9 }
0x1138   : > { %5793 = vmatmul.mubr.msk.bf16.vlgmr.msra.gmra.mxu0 %vm861_vm5, %v8185_v61  ;;  %6324 = vmatmul.mubr.msk.bf16.vlgmr.msra.gmra.mxu1 %vm861_vm5, %v8185_v61 }
0x1139   : > { %5125 = vmatpush1.bf16.msra.mxu0 %v8133_v52  ;;  %6328 = vmatpush3.bf16.msra.mxu1 %v8139_v24 }
0x113a   : > { %5126 = vmatprep.subr.bf16.mxu0 %v8145_v54  ;;  %6329 = vmatprep.subr.bf16.mxu1 %v8468_v9 }
0x113b   : > { %5144 = vmatprep.mubr.bf16.mxu0 %v8469_v53  ;;  %6331 = vmatprep.mubr.msk.bf16.mxu1 %vm6757_vm2, %v8468_v9 }
0x113d   : > { %5127 = vmatpush1.bf16.msra.mxu0 %v8155_v13  ;;  %6330 = vmatpush3.bf16.msra.mxu1 %v8161_v56 }
0x113e   : > { %5209 = vmatprep.subr.bf16.mxu0 %v8167_v20  ;;  %6335 = vmatprep.subr.bf16.mxu1 %v8468_v9 }
0x11f0   : > { %v4958_v42 = vpop.f32.mrf.mxu0  ;;  %v4999_v27 = vpop.f32.mrf.mxu1 }
0x11f1   : > { %v4959_v24 = vadd.f32 %v4958_v42, %v7196_v12  ;;  %v5000_v39 = vadd.f32 %v4999_v27, %v7209_v49  ;;  %v6421_v49 = vld [vmem:[%s8409_s11 + $0x8] sm:$0xff]  }
0x11f2   : > { %v4960_v1 = vpop.f32.mrf.mxu0  ;;  %v6317_v34 = vpop.f32.mrf.mxu1 }
0x11f3   : > { %v4961_v35 = vadd.f32 %v4960_v1, %v7200_v3 }
0x11f4   : > { %v4962_v40 = vpop.f32.mrf.mxu0  ;;  %v5002_v63 = vpop.f32.mrf.mxu1 }
0x11f6   : > { %v4963_v48 = vpop.f32.mrf.mxu0  ;;  %v6318_v52 = vpop.f32.mrf.mxu1 }
0x11f8   : > { %v5039_v54 = vpop.f32.mrf.mxu0  ;;  %v5080_v61 = vpop.f32.mrf.mxu1 }
0x11f9   : > { %v5086_v22 = vadd.f32 %v5039_v54, %v4959_v24  ;;  %v5100_v41 = vadd.f32 %v8176_v26, %v5080_v61  ;;  %v5193_v26 = vpack.c.bf16 %v8272_v6, %v8272_v6 }
0x11fa   : > { %v5041_v13 = vpop.f32.mrf.mxu0  ;;  %v6325_v30 = vpop.f32.mrf.mxu1 }
0x11fb   : > { %v5795_v56 = vmul.f32 -1.442695, %v5086_v22  ;;  %v5093_v31 = vadd.f32 %v5041_v13, %v4961_v35 }
0x11fc   : > { %v5043_v5 = vpop.f32.mrf.mxu0  ;;  %v5083_v20 = vpop.f32.mrf.mxu1 }
0x11fd   : > { %6643 = vpow2.f32 %v5795_v56  ;;  %v5796_v10 = vmul.f32 -1.442695, %v5093_v31 }
0x11fe   : > { %v5044_v36 = vpop.f32.mrf.mxu0  ;;  %v6326_v57 = vpop.f32.mrf.mxu1 }
0x11ff   : > { %6645 = vpow2.f32 %v5796_v10 }
0x120a   : > { %v6644_v60 = vpop.eup %6643 }
0x120b   : > { %v5090_v8 = vadd.f32 1.0, %v6644_v60 }
0x120c   : > { %v6646_v12 = vpop.eup %6645 }
0x120d   : > { %6647 = vrcp.f32 %v5090_v8  ;;  %v5097_v19 = vadd.f32 1.0, %v6646_v12 }
0x120f   : > { %6649 = vrcp.f32 %v5097_v19 }
0x121a   : > { %v6648_v2 = vpop.eup %6647 }
0x121b   : > { %v5101_v29 = vmul.f32 %v6648_v2, %v5100_v41 }
0x121c   : > { %v6650_v3 = vpop.eup %6649 }
0x121d   : > { %v5102_v45 = vadd.f32 %v5101_v29, %v5000_v39  ;;  %v5104_v21 = vsub.f32 1.0, %v6650_v3  ;;  %v5106_v17 = vmul.f32 %v6650_v3, %v8181_v25  ;;  %v6422_v25 = vld [vmem:[%s8409_s11] sm:$0xff]  }
0x121f   : > { %6651 = vtanh.f32 %v5102_v45  ;;  %v5803_v45 = vld [vmem:[%s8410_s12] ss:$0 sm:$0xff] }
0x122c   : > { %v6652_v43 = vpop.eup %6651 }
0x122d   : > { %v5105_v7 = vmul.f32 %v6652_v43, %v5104_v21 }
0x122f   : > { %v5107_v15 = vadd.f32 %v5106_v17, %v5105_v7 }
0x1231   : > { %v5108_v59 = vpack.c.bf16 %v5107_v15, %v5107_v15 }
0x1233   : > { %5797 = vmatmul.mubr.msk.bf16.vlgmr.msra.gmra.mxu0 %vm861_vm5, %v5108_v59  ;;  %6332 = vmatmul.mubr.msk.bf16.vlgmr.msra.gmra.mxu1 %vm861_vm5, %v5108_v59 }
0x1234   : > { %5210 = vmatpush1.bf16.msra.mxu0 %v8194_v55  ;;  %6336 = vmatpush3.bf16.msra.mxu1 %v8200_v23  ;;  %v8508_v55 = vld [vmem:[#allocation31_spill] sm:$0xff] }
0x1235   : > { %5211 = vmatprep.subr.bf16.mxu0 %v8206_v44  ;;  %6337 = vmatprep.subr.bf16.mxu1 %v8468_v9  ;;  %v8509_v23 = vld [vmem:[#allocation3_spill] sm:$0xff] }
0x1236   : > { %5229 = vmatprep.mubr.bf16.mxu0 %v8469_v53  ;;  %6339 = vmatprep.mubr.msk.bf16.mxu1 %vm6757_vm2, %v8468_v9  ;;  %v5300_v44 = vpack.c.bf16 %v8509_v23, %v8508_v55  ;;  %v5301_v9 = vpack.c.bf16 %v7792_v46, %v7593_v37  ;;  %v5302_v53 = vpack.c.bf16 %v8072_v51, %v7898_v47 }
0x1238   : > { %5212 = vmatpush1.bf16.msra.mxu0 %v8216_v11  ;;  %6338 = vmatpush3.bf16.msra.mxu1 %v8222_v38 }
0x1239   : > { %6343 = vmatprep.subr.bf16.mxu0 %v6421_v49 }
0x123b   : > { %5799 = vmatmul.mubr.msk.bf16.vlgmr.msra.gmra.mxu0 %vm861_vm5, %v5193_v26  ;;  %6340 = vmatmul.mubr.msk.bf16.vlgmr.msra.gmra.mxu1 %vm861_vm5, %v5193_v26 }
0x123c   : > { %6344 = vmatpush3.bf16.msra.mxu0 %v6421_v49  ;;  %6347 = vmatprep.mubr.msk.bf16.mxu0 %vm861_vm5, %v5300_v44 }
0x123d   : > { %6345 = vmatprep.subr.bf16.mxu0 %v6422_v25 }
0x1240   : > { %6346 = vmatpush3.bf16.msra.mxu0 %v6422_v25 }
0x1243   : > { %6348 = vmatmul.mubr.msk.bf16.vlgmr.msra.gmra.mxu0 %vm861_vm5, %v5301_v9 }
0x1244   : > { %6351 = vmatprep.mubr.msk.bf16.mxu0 %vm861_vm5, %v5302_v53 }
0x12f3   : > { %v5146_v11 = vpop.f32.mrf.mxu0  ;;  %v5187_v38 = vpop.f32.mrf.mxu1 }
0x12f4   : > { %v5147_v32 = vadd.f32 %v5146_v11, %v8496_v0  ;;  %v5188_v36 = vadd.f32 %v5187_v38, %v7307_v18 }
0x12f5   : > { %v5148_v50 = vpop.f32.mrf.mxu0  ;;  %v6333_v62 = vpop.f32.mrf.mxu1 }
0x12f6   : > { %v5149_v24 = vadd.f32 %v5148_v50, %v7294_v14 }
0x12f7   : > { %v5150_v58 = vpop.f32.mrf.mxu0  ;;  %v5190_v4 = vpop.f32.mrf.mxu1 }
0x12f9   : > { %v5151_v16 = vpop.f32.mrf.mxu0  ;;  %v6334_v33 = vpop.f32.mrf.mxu1 }
0x12fb   : > { %v5231_v42 = vpop.f32.mrf.mxu0  ;;  %v5272_v27 = vpop.f32.mrf.mxu1 }
0x12fc   : > { %v5278_v1 = vadd.f32 %v5231_v42, %v5147_v32  ;;  %v5292_v20 = vadd.f32 %v8265_v28, %v5272_v27 }
0x12fd   : > { %v5233_v34 = vpop.f32.mrf.mxu0  ;;  %v6341_v40 = vpop.f32.mrf.mxu1 }
0x12fe   : > { %v5801_v63 = vmul.f32 -1.442695, %v5278_v1  ;;  %v5285_v22 = vadd.f32 %v5233_v34, %v5149_v24 }
0x12ff   : > { %v5235_v48 = vpop.f32.mrf.mxu0  ;;  %v5275_v52 = vpop.f32.mrf.mxu1 }
0x1300   : > { %6653 = vpow2.f32 %v5801_v63  ;;  %v5802_v13 = vmul.f32 -1.442695, %v5285_v22 }
0x1301   : > { %v5236_v54 = vpop.f32.mrf.mxu0  ;;  %v6342_v61 = vpop.f32.mrf.mxu1 }
0x1302   : > { %6655 = vpow2.f32 %v5802_v13 }
0x1303   : > { %v6349_v28 = vpop.f32.mrf.mxu0 }
0x1304   : > { %v5382_v15 = vadd.f32 %v6349_v28, %v5803_v45 }
0x1305   : > { %v5373_v2 = vpop.f32.mrf.mxu0 }
0x1306   : > { %v5374_v59 = vadd.f32 %v5803_v45, %v5373_v2  ;;  %v5406_v62 = vsel %vm861_vm5, %v5382_v15, -inf }
0x1307   : > { %v6350_v18 = vpop.f32.mrf.mxu0 }
0x1308   : > { %v5385_v3 = vadd.f32 %v6350_v18, %v5803_v45  ;;  %v5404_v58 = vsel %vm861_vm5, %v5374_v59, -inf }
0x1309   : > { %v5376_v39 = vpop.f32.mrf.mxu0 }
0x130a   : > { %v5377_v49 = vadd.f32 %v5803_v45, %v5376_v39  ;;  %v5407_v25 = vsel %vm861_vm5, %v5385_v3, -inf }
0x130c   : > { %v5405_v4 = vsel %vm861_vm5, %v5377_v49, -inf }
0x130d   : > { %v6654_v30 = vpop.eup %6653 }
0x130e   : > { %v5282_v56 = vadd.f32 1.0, %v6654_v30 }
0x130f   : > { %v6656_v0 = vpop.eup %6655 }
0x1310   : > { %6657 = vrcp.f32 %v5282_v56  ;;  %v5289_v5 = vadd.f32 1.0, %v6656_v0 }
0x1312   : > { %6659 = vrcp.f32 %v5289_v5 }
0x131d   : > { %v6658_v35 = vpop.eup %6657 }
0x131e   : > { %v5293_v57 = vmul.f32 %v6658_v35, %v5292_v20 }
0x131f   : > { %v6660_v14 = vpop.eup %6659 }
0x1320   : > { %v5294_v31 = vadd.f32 %v5293_v57, %v5188_v36  ;;  %v5296_v10 = vsub.f32 1.0, %v6660_v14  ;;  %v5298_v12 = vmul.f32 %v6660_v14, %v8272_v6 }
0x1322   : > { %6661 = vtanh.f32 %v5294_v31 }
0x132f   : > { %v6662_v60 = vpop.eup %6661 }
0x1330   : > { %v5297_v8 = vmul.f32 %v6662_v60, %v5296_v10 }
0x1332   : > { %v8343_v19 = vadd.f32 %v5298_v12, %v5297_v8 }
0x1334   : > { %v5303_v41 = vpack.c.bf16 %v8343_v19, %v8272_v6 }
0x1336   : > { %6352 = vmatmul.mubr.msk.bf16.gmra.mxu0 %vm861_vm5, %v5303_v41 }
0x13f6   : > { %v6353_v29 = vpop.f32.mrf.mxu0 }
0x13f7   : > { %v5398_v43 = vadd.f32 %v6353_v29, %v5803_v45 }
0x13f8   : > { %v5389_v21 = vpop.f32.mrf.mxu0 }
0x13f9   : > { %v5390_v17 = vadd.f32 %v5803_v45, %v5389_v21  ;;  %v5412_v9 = vsel %vm861_vm5, %v5398_v43, -inf }
0x13fa   : > { %v6354_v7 = vpop.f32.mrf.mxu0  ;;  %v5413_v33 = vmax.f32 %v5406_v62, %v5412_v9 }
0x13fb   : > { %v5401_v26 = vadd.f32 %v6354_v7, %v5803_v45  ;;  %v5408_v53 = vsel %vm861_vm5, %v5390_v17, -inf }
0x13fc   : > { %v5392_v44 = vpop.f32.mrf.mxu0  ;;  %v5409_v32 = vmax.f32 %v5404_v58, %v5408_v53 }
0x13fd   : > { %v5414_v11 = vsel %vm861_vm5, %v5401_v26, -inf  ;;  %v5393_v38 = vadd.f32 %v5803_v45, %v5392_v44 }
0x13fe   : > { %v5415_v50 = vmax.f32 %v5407_v25, %v5414_v11 }
0x13ff   : > { %v5410_v16 = vsel %vm861_vm5, %v5393_v38, -inf }
0x1400   : > { %v5411_v42 = vmax.f32 %v5405_v4, %v5410_v16  ;;  %v5417_v27 = vmax.f32 %v5413_v33, %v5415_v50 }
0x1402   : > { %v5416_v1 = vmax.f32 %v5409_v32, %v5411_v42 }
0x1404   : > { %v5418_v34 = vmax.f32 %v5416_v1, %v5417_v27 }
0x1406   : > { %v5419_v40 = vsub.f32 %v5374_v59, %v5418_v34  ;;  %v5420_v63 = vsub.f32 %v5377_v49, %v5418_v34  ;;  %v5421_v48 = vsub.f32 %v5382_v15, %v5418_v34  ;;  %v5422_v52 = vsub.f32 %v5385_v3, %v5418_v34 }
0x1407   : > { %v5423_v24 = vsub.f32 %v5390_v17, %v5418_v34  ;;  %v5424_v13 = vsub.f32 %v5393_v38, %v5418_v34  ;;  %v5425_v56 = vsub.f32 %v5398_v43, %v5418_v34  ;;  %v5426_v20 = vsub.f32 %v5401_v26, %v5418_v34 }
0x1408   : > { %v5427_v54 = vmul.f32 1.442695, %v5419_v40  ;;  %v5429_v61 = vmul.f32 1.442695, %v5420_v63  ;;  %v5431_v22 = vmul.f32 1.442695, %v5421_v48 }
0x1409   : > { %v5433_v30 = vmul.f32 1.442695, %v5422_v52  ;;  %v5435_v0 = vmul.f32 1.442695, %v5423_v24  ;;  %v5437_v5 = vmul.f32 1.442695, %v5424_v13 }
0x140a   : > { %6663 = vpow2.f32 %v5427_v54  ;;  %v5439_v35 = vmul.f32 1.442695, %v5425_v56  ;;  %v5441_v36 = vmul.f32 1.442695, %v5426_v20  ;;  %v5810_v48 = vld [vmem:[%s8411_s13] ss:$0 sm:$0xff] }
0x140b   : > { %6665 = vpow2.f32 %v5429_v61  ;;  %v5491_v24 = vmul.f32 %v5810_v48, %v8343_v19  ;;  %v5812_v13 = vld [vmem:[#allocation2] ss:$0 sm:$0xff] }
0x140c   : > { %6667 = vpow2.f32 %v5431_v22 }
0x140d   : > { %6669 = vpow2.f32 %v5433_v30 }
0x140e   : > { %6671 = vpow2.f32 %v5435_v0 }
0x140f   : > { %6673 = vpow2.f32 %v5437_v5 }
0x1410   : > { %6675 = vpow2.f32 %v5439_v35 }
0x1411   : > { %6677 = vpow2.f32 %v5441_v36 }
0x1417   : > { %v6664_v57 = vpop.eup %6663 }
0x1418   : > { %v6666_v31 = vpop.eup %6665  ;;  %v5443_v14 = vsel %vm861_vm5, %v6664_v57, 0.0  ;;  %v5459_v10 = vmul.f32 %v6664_v57, %v8508_v55 }
0x1419   : > { %v6668_v60 = vpop.eup %6667  ;;  %v5444_v8 = vsel %vm861_vm5, %v6666_v31, 0.0  ;;  %v5460_v12 = vmul.f32 %v6666_v31, %v8509_v23 }
0x141a   : > { %v6670_v41 = vpop.eup %6669  ;;  %v5445_v28 = vadd.f32 %v5444_v8, %v5443_v14  ;;  %v5467_v2 = vsel %vm861_vm5, %v5459_v10, 0.0  ;;  %v5446_v18 = vsel %vm861_vm5, %v6668_v60, 0.0  ;;  %v5461_v39 = vmul.f32 %v6668_v60, %v7593_v37 }
0x141b   : > { %v5468_v29 = vsel %vm861_vm5, %v5460_v12, 0.0  ;;  %v6672_v45 = vpop.eup %6671  ;;  %v5448_v55 = vsel %vm861_vm5, %v6670_v41, 0.0  ;;  %v5462_v23 = vmul.f32 %v6670_v41, %v7792_v46 }
0x141c   : > { %v5447_v3 = vadd.f32 %v5446_v18, %v5445_v28  ;;  %v5469_v21 = vadd.f32 %v5468_v29, %v5467_v2  ;;  %v6674_v43 = vpop.eup %6673  ;;  %v5450_v7 = vsel %vm861_vm5, %v6672_v45, 0.0  ;;  %v5470_v15 = vsel %vm861_vm5, %v5461_v39, 0.0 }
0x141d   : > { %v6676_v59 = vpop.eup %6675  ;;  %v5452_v37 = vsel %vm861_vm5, %v6674_v43, 0.0  ;;  %v5463_v53 = vmul.f32 %v6672_v45, %v7898_v47  ;;  %v5472_v11 = vsel %vm861_vm5, %v5462_v23, 0.0  ;;  %v5464_v58 = vmul.f32 %v6674_v43, %v8072_v51 }
0x141e   : > { %v5449_v17 = vadd.f32 %v5448_v55, %v5447_v3  ;;  %v5471_v26 = vadd.f32 %v5470_v15, %v5469_v21  ;;  %v6678_v25 = vpop.eup %6677  ;;  %v5454_v9 = vsel %vm861_vm5, %v6676_v59, 0.0  ;;  %v5465_v33 = vmul.f32 %v6676_v59, %v8272_v6  ;;  %v5811_v6 = vld [vmem:[%s8412_s14] ss:$0 sm:$0xff] }
0x141f   : > { %v5456_v62 = vsel %vm861_vm5, %v6678_v25, 0.0  ;;  %v5474_v4 = vsel %vm861_vm5, %v5463_v53, 0.0  ;;  %v5476_v32 = vsel %vm861_vm5, %v5464_v58, 0.0  ;;  %v5466_v47 = vmul.f32 %v6678_v25, %v8343_v19 }
0x1420   : > { %v5451_v49 = vadd.f32 %v5450_v7, %v5449_v17  ;;  %v5473_v50 = vadd.f32 %v5472_v11, %v5471_v26  ;;  %v5478_v27 = vsel %vm861_vm5, %v5465_v33, 0.0 }
0x1421   : > { %v5480_v34 = vsel %vm861_vm5, %v5466_v47, 0.0 }
0x1422   : > { %v5453_v44 = vadd.f32 %v5452_v37, %v5451_v49  ;;  %v5475_v16 = vadd.f32 %v5474_v4, %v5473_v50 }
0x1424   : > { %v5455_v38 = vadd.f32 %v5454_v9, %v5453_v44  ;;  %v5477_v42 = vadd.f32 %v5476_v32, %v5475_v16 }
0x1426   : > { %v5457_v46 = vadd.f32 %v5456_v62, %v5455_v38  ;;  %v5479_v1 = vadd.f32 %v5478_v27, %v5477_v42 }
0x1428   : > { %6679 = vrcp.f32 %v5457_v46  ;;  %v5481_v40 = vadd.f32 %v5480_v34, %v5479_v1 }
0x1435   : > { %v6680_v63 = vpop.eup %6679 }
0x1436   : > { %v5482_v51 = vmul.f32 %v6680_v63, %v5481_v40 }
0x1438   : > { %v5483_v52 = vmul.f32 0.125, %v5482_v51 }
0x143a   : > { %v5499_v54 = vmul.f32 %v5811_v6, %v5483_v52 }
0x143c   : > { %v5500_v61 = vadd.f32 %v5499_v54, %v5491_v24 }
0x143e   : > { %v5501_v22 = vsel %vm861_vm5, %v5500_v61, 0.0 }
0x143f   : > { %5502 = vadd.xlane.f32.xlu0 %v5501_v22 }
0x14c8   : > { %v5503_v30 = vpop.xlane.xlu0 %5502 }
0x14c9   : > { %v5511_v56 = vadd.f32 %v5812_v13, %v5503_v30 }
0x14cb   : > { %5513 = vst.msk [vmem:[%s521_s19] sm:$0xff] %vm5512_vm3, %v5511_v56 }
0x14cc PF: > { %s28_s23 = sadd.s32 1, %s6753_s23  }
0x14cd   : > { %p25_p4 = scmp.ge.s32.totalorder %s28_s23, 4  }
0x14cf   :  { %27 = sbr.rel (!%p25_p4) target bundleno = 3 (0x3), region = 122 }

</bundles_post_ra>
